<compile_context>
chip_gen: v5e
topology: v5e:2x2
jax: 0.10.0
libtpu: 0.0.40
codegen_flags: <defaults>
</compile_context>

<pallas_src>
import functools

import jax
import jax.numpy as jnp
import numpy as np
from jax.experimental import pallas as pl
from jax.experimental.pallas import tpu as pltpu


def _round_up(x, m):
    return ((x + m - 1) // m) * m


def _routing_tables(depth: int):
    """Static tables reproducing the torch repeat/slice routing loop.

    node[l, j]: index (into the linear layer's n_leaf outputs) of leaf j's ancestor
                decision node used at tree layer l (torch code starts at index 1).
    sign[l, j]: +1 if the path multiplies by d (left child), -1 if by (1 - d) (right).
    """
    n_leaf = 2 ** depth
    node = np.zeros((depth, n_leaf), dtype=np.int64)
    sign = np.ones((depth, n_leaf), dtype=np.float32)
    for l in range(depth):
        for j in range(n_leaf):
            node[l, j] = 2 ** l + (j >> (depth - l))
            if (j >> (depth - 1 - l)) & 1:
                sign[l, j] = -1.0
    return node, sign


# ----------------------------------------------------------------------------
# Pallas kernel: one batch tile per grid step.
#   x_ref : [TBp, rowpack*n_in]            (bf16 or f32)
#   w_ref : [rowpack*n_in, depth*lblk]     (block-diagonal routed weights, resident)
#   b_ref : [1, depth*lblk]                (f32, resident)
#   mu_ref: [TBp, lblk]                    (lblk = rowpack*n_leaf >= 128, lane-dense)
# ----------------------------------------------------------------------------
def _tree_kernel(x_ref, w_ref, b_ref, mu_ref, *, depth, lblk, highest):
    prec = jax.lax.Precision.HIGHEST if highest else None
    logits = jnp.dot(x_ref[...], w_ref[...],
                     preferred_element_type=jnp.float32,
                     precision=prec) + b_ref[...]
    route = jax.nn.sigmoid(logits)                     # [TBp, depth*lblk] f32
    # mu = prod over layers; every slice starts at a multiple of 128 lanes (vreg-aligned).
    mu = route[:, 0:lblk]
    for l in range(1, depth):
        mu = mu * route[:, l * lblk:(l + 1) * lblk]
    mu_ref[...] = mu                                   # lane-dense store (>=128 lanes)


def tree_forward(x, feature_mask, W, b, depth, *, block_batch=8192,
                 compute_dtype=jnp.bfloat16):
    """x: [B, n_in_feature] -> mu: [B, n_leaf] (leaf routing probabilities)."""
    assert depth >= 1
    B, n_in = x.shape
    n_leaf = 2 ** depth
    hp = jax.lax.Precision.HIGHEST

    # ---- fold feature_mask + routing tables into one weight matrix (exact, wrapper) ----
    W_eff = jnp.matmul(feature_mask.astype(jnp.float32),
                       W.T.astype(jnp.float32), precision=hp)         # [n_in, n_leaf]
    node, sign = _routing_tables(depth)                                # compile-time consts
    flat_node = node.reshape(-1)
    W_routed = (W_eff[:, flat_node] * jnp.asarray(sign.reshape(1, -1))
                ).reshape(n_in, depth, n_leaf)                         # [n_in, depth, n_leaf]
    b_routed = (b.astype(jnp.float32)[flat_node] * jnp.asarray(sign.reshape(-1))
                ).reshape(depth, n_leaf)                               # [depth, n_leaf]

    # ---- lane-dense packing: pack `rowpack` batch rows per kernel row -----------------
    # (block-diagonal weights, column layout [depth, rowpack, n_leaf]) so that x loads,
    # per-layer slices and the mu store are all multiples of 128 lanes.
    rowpack = max(1, 128 // n_leaf)                   # 16 for depth=3
    lblk = rowpack * n_leaf                           # per-layer lane block (>= 128)
    kp = rowpack * n_in                               # packed contraction dim

    eye = jnp.eye(rowpack, dtype=jnp.float32)
    W_bd = jnp.einsum('st,fln->sfltn', eye, W_routed, precision=hp)
    W_bd = W_bd.reshape(kp, depth * lblk).astype(compute_dtype)        # [kp, depth*lblk]
    b_bd = jnp.broadcast_to(b_routed[:, None, :],
                            (depth, rowpack, n_leaf)).reshape(1, depth * lblk)

    # ---- batch tiling: big sublane-aligned tiles, >= ~8 grid steps for large batches --
    align = 16 * rowpack                              # TB/rowpack multiple of 16 (bf16 tile)
    tb_target = _round_up(max(1, -(-B // 8)), align)  # ceil(B/8), aligned
    TB = max(align, min(_round_up(block_batch, align), tb_target))
    Bp = _round_up(B, TB)
    if Bp != B:
        x = jnp.pad(x, ((0, Bp - B), (0, 0)))
    xp = x.astype(compute_dtype).reshape(Bp // rowpack, kp)            # lane-dense rows
    grid = (Bp // TB,)
    tbp = TB // rowpack

    kernel = functools.partial(_tree_kernel, depth=depth, lblk=lblk,
                               highest=(compute_dtype == jnp.float32))
    out = pl.pallas_call(
        kernel,
        out_shape=jax.ShapeDtypeStruct((Bp // rowpack, lblk), jnp.float32),
        grid_spec=pltpu.PrefetchScalarGridSpec(
            num_scalar_prefetch=0,
            grid=grid,
            in_specs=[
                pl.BlockSpec((tbp, kp), lambda i: (i, 0)),             # x tile (streamed)
                pl.BlockSpec((kp, depth * lblk), lambda i: (0, 0)),    # weights (resident)
                pl.BlockSpec((1, depth * lblk), lambda i: (0, 0)),     # bias (resident)
            ],
            out_specs=pl.BlockSpec((tbp, lblk), lambda i: (i, 0)),     # lane-dense out
        ),
        compiler_params=pltpu.CompilerParams(
            dimension_semantics=("parallel",),
            # Safe ceiling on v7x (64 MiB physical); tiles here use only a few MiB.
            vmem_limit_bytes=32 * 1024 * 1024,
        ),
    )(xp, W_bd, b_bd)
    # Free row-major view back to [Bp, n_leaf]; the [:B] slice (drops padded-row garbage)
    # only costs an output-sized copy when padding was added.
    return out.reshape(Bp, n_leaf)[:B]


# ----------------------------------------------------------------------------
# Pure-JAX reference (mirrors the torch code line by line).
# ----------------------------------------------------------------------------
def tree_forward_ref(x, feature_mask, W, b, depth):
    hp = jax.lax.Precision.HIGHEST
    n_leaf = 2 ** depth
    feats = jnp.matmul(x, feature_mask, precision=hp)
    d = jax.nn.sigmoid(jnp.matmul(feats, W.T, precision=hp) + b)
    dec = jnp.stack([d, 1.0 - d], axis=2)              # [B, n_leaf, 2]
    B = x.shape[0]
    mu = jnp.ones((B, 1, 1), dtype=x.dtype)
    begin, end = 1, 2
    for l in range(depth):
        mu = jnp.repeat(mu.reshape(B, -1, 1), 2, axis=2)
        mu = mu * dec[:, begin:end, :]
        begin = end
        end = begin + 2 ** (l + 1)
    return mu.reshape(B, n_leaf)


if __name__ == "__main__":
    # Module hyper-parameters (small, consistent with Tree.__init__)
    depth = 3
    n_in_feature = 32
    used_feature_rate = 0.5
    n_class = 4
    n_leaf = 2 ** depth
    n_used_feature = int(n_in_feature * used_feature_rate)
    batch = 600                    # not a multiple of the tile -> multi-step grid + padding

    key = jax.random.PRNGKey(0)
    k_x, k_idx, k_w, k_b, k_pi = jax.random.split(key, 5)

    # Input
    x = jax.random.normal(k_x, (batch, n_in_feature), dtype=jnp.float32)

    # feature_mask = onehot[using_idx].T  -> [n_in_feature, n_used_feature]
    using_idx = jax.random.permutation(k_idx, n_in_feature)[:n_used_feature]
    feature_mask = jnp.eye(n_in_feature, dtype=jnp.float32)[using_idx].T

    # nn.Linear(n_used_feature, n_leaf): W [n_leaf, n_used], b [n_leaf]
    bound = 1.0 / np.sqrt(n_used_feature)
    W = jax.random.uniform(k_w, (n_leaf, n_used_feature), jnp.float32, -bound, bound)
    b = jax.random.uniform(k_b, (n_leaf,), jnp.float32, -bound, bound)

    # pi (leaf class distribution) — not used in forward(), defined for completeness.
    pi = jax.random.uniform(k_pi, (n_leaf, n_class), jnp.float32)

    mu_ref = tree_forward_ref(x, feature_mask, W, b, depth)

    # --- exact path (f32 streaming, HIGHEST precision matmul): tight tolerance ---
    mu32 = tree_forward(x, feature_mask, W, b, depth, compute_dtype=jnp.float32)
    mu32 = jax.block_until_ready(mu32)
    assert mu32.shape == (batch, n_leaf)
    np.testing.assert_allclose(np.asarray(mu32), np.asarray(mu_ref), rtol=1e-5, atol=1e-5)
    np.testing.assert_allclose(np.asarray(mu32).sum(-1), np.ones(batch), rtol=1e-4)

    # --- fast path (bf16 streaming of x / routed weights): relaxed tolerance ---
    mu16 = tree_forward(x, feature_mask, W, b, depth, compute_dtype=jnp.bfloat16)
    mu16 = jax.block_until_ready(mu16)
    assert mu16.shape == (batch, n_leaf)
    np.testing.assert_allclose(np.asarray(mu16), np.asarray(mu_ref), rtol=6e-2, atol=5e-4)
    np.testing.assert_allclose(np.asarray(mu16).sum(-1), np.ones(batch), rtol=1e-4)

    print("KERNEL_OK")
</pallas_src>

<mosaic_0001>
module attributes {stable_mosaic.version = 11 : i64} {
  func.func @_tree_kernel(%arg0: i32, %arg1: memref<16x512xf32, #tpu.memory_space<vmem>>, %arg2: memref<512x384xf32, #tpu.memory_space<vmem>>, %arg3: memref<1x384xf32, #tpu.memory_space<vmem>>, %arg4: memref<16x128xf32, #tpu.memory_space<vmem>>) attributes {dimension_semantics = [#tpu.dimension_semantics<parallel>], iteration_bounds = array<i64: 3>, scalar_prefetch = 0 : i64, scratch_operands = 0 : i64, tpu.core_type = #tpu.core_type<tc>, window_params = [{transform_indices = @transform_0, window_bounds = array<i64: 16, 512>}, {pipeline_mode = #tpu.pipeline_mode<synchronous>, transform_indices = @transform_1, window_bounds = array<i64: 512, 384>}, {pipeline_mode = #tpu.pipeline_mode<synchronous>, transform_indices = @transform_2, window_bounds = array<i64: 1, 384>}, {transform_indices = @transform_3, window_bounds = array<i64: 16, 128>}]} {
    %c0 = arith.constant 0 : index
    %c0_0 = arith.constant 0 : index
    %0 = vector.load %arg1[%c0, %c0_0] : memref<16x512xf32, #tpu.memory_space<vmem>>, vector<16x512xf32>
    %c0_1 = arith.constant 0 : index
    %c0_2 = arith.constant 0 : index
    %1 = vector.load %arg2[%c0_1, %c0_2] : memref<512x384xf32, #tpu.memory_space<vmem>>, vector<512x384xf32>
    %cst = arith.constant dense<0.000000e+00> : vector<16x384xf32>
    %2 = tpu.matmul %0, %1, %cst {dimension_numbers = #tpu.dot_dimension_numbers<[1], [0], [0], [1], [0, 0, 1, 1], [], []>, precision = #tpu.contract_precision<fp32>} : vector<16x512xf32>, vector<512x384xf32>, vector<16x384xf32> -> vector<16x384xf32>
    %c0_3 = arith.constant 0 : index
    %c0_4 = arith.constant 0 : index
    %3 = vector.load %arg3[%c0_3, %c0_4] : memref<1x384xf32, #tpu.memory_space<vmem>>, vector<1x384xf32>
    %4 = vector.broadcast %3 : vector<1x384xf32> to vector<16x384xf32>
    %5 = arith.addf %2, %4 : vector<16x384xf32>
    %6 = arith.negf %5 : vector<16x384xf32>
    %7 = math.exp %6 : vector<16x384xf32>
    %cst_5 = arith.constant 1.000000e+00 : f32
    %8 = vector.broadcast %cst_5 : f32 to vector<16x384xf32>
    %9 = arith.addf %8, %7 : vector<16x384xf32>
    %10 = arith.divf %8, %9 : vector<16x384xf32>
    %11 = vector.extract_strided_slice %10 {offsets = [0, 0], sizes = [16, 128], strides = [1, 1]} : vector<16x384xf32> to vector<16x128xf32>
    %12 = vector.extract_strided_slice %10 {offsets = [0, 128], sizes = [16, 128], strides = [1, 1]} : vector<16x384xf32> to vector<16x128xf32>
    %13 = arith.mulf %11, %12 : vector<16x128xf32>
    %14 = vector.extract_strided_slice %10 {offsets = [0, 256], sizes = [16, 128], strides = [1, 1]} : vector<16x384xf32> to vector<16x128xf32>
    %15 = arith.mulf %13, %14 : vector<16x128xf32>
    %c0_6 = arith.constant 0 : index
    %c0_7 = arith.constant 0 : index
    %16 = vector.load %arg4[%c0_6, %c0_7] : memref<16x128xf32, #tpu.memory_space<vmem>>, vector<16x128xf32>
    tpu.vector_store %arg4[%c0_6, %c0_7], %15 {strides = array<i32>} : memref<16x128xf32, #tpu.memory_space<vmem>>, vector<16x128xf32>,
    return
  }
  func.func @transform_0(%arg0: i32) -> (i32, i32) {
    %c0_i32 = arith.constant 0 : i32
    %c0_i32_0 = arith.constant 0 : i32
    return %arg0, %c0_i32 : i32, i32
  }
  func.func @transform_1(%arg0: i32) -> (i32, i32) {
    %c0_i32 = arith.constant 0 : i32
    %c0_i32_0 = arith.constant 0 : i32
    %c0_i32_1 = arith.constant 0 : i32
    return %c0_i32, %c0_i32_0 : i32, i32
  }
  func.func @transform_2(%arg0: i32) -> (i32, i32) {
    %c0_i32 = arith.constant 0 : i32
    %c0_i32_0 = arith.constant 0 : i32
    %c0_i32_1 = arith.constant 0 : i32
    return %c0_i32, %c0_i32_0 : i32, i32
  }
  func.func @transform_3(%arg0: i32) -> (i32, i32) {
    %c0_i32 = arith.constant 0 : i32
    %c0_i32_0 = arith.constant 0 : i32
    return %arg0, %c0_i32 : i32, i32
  }
}

</mosaic_0001>

<bundles_post_ra>
// kernel: tpu_custom_call.1
= control target key start
LH: loop header
LB: loop body
LE: loop exit
PB: predicated region body
PF: predicated region fallthrough
CT: control target
= control target key end

     0   :  { %8 = vsyncpa [#allocation3], 0  ;;  %s8960_s0 = inlined_call_operand.hbm [shape: f32[48,512], index: 0, kind: input, shape index: {}]   ;;  %s8961_s1 = inlined_call_operand.hbm [shape: f32[512,384], index: 1, kind: input, shape index: {}]   ;;  %s8962_s2 = inlined_call_operand.hbm [shape: f32[1,384], index: 2, kind: input, shape index: {}]   ;;  %s8963_s3 = inlined_call_operand.hbm [shape: f32[48,128], index: 3, kind: output, shape index: {}]  }
   0x1   :  { %10 = vsyncpa [#allocation3 + $0x1], 0 }
   0x2   :  { %11 = vsyncpa [#allocation6], 0 }
   0x3   :  { %12 = vsyncpa [#allocation4], 0 }
   0x4   :  { %14 = vsyncpa [#allocation4 + $0x1], 0  ;;  %s5441_s12 = smov 0   ;;  %s5443_s13 = smov 0  }
   0x5   :  { %s5445_s14 = smov 0   ;;  %s5447_s15 = smov 0  }
   0x6 LB: > { %s5462_s16 = sadd.s32 4294967295, %s5411_s15   ;;  %s5125_s17 = sadd.s32 4294967294, %s5411_s15   ;;  %s5411_s15 = sphi %s5447_s15, %s9558_s15   ;;  %s5407_s14 = sphi %s5445_s14, %s9557_s14   ;;  %s5403_s13 = sphi %s5443_s13, %s9556_s13   ;;  %s5399_s12 = sphi %s5441_s12, %s9555_s12  }
   0x7   : > { %p40_p0 = scmp.ne.s32.totalorder %s5403_s13, %s5399_s12  ;;  %p41_p1 = scmp.eq.s32.totalorder %s5462_s16, 0 }
   0x8   : > { %p106_p2 = scmp.eq.s32.totalorder %s5462_s16, 2  ;;  %p112_p3 = scmp.eq.s32.totalorder %s5125_s17, 2 }
   0x9   : > { %p5471_p4 = por %p41_p1, %p40_p0  ;;  %p5126_p5 = scmp.ge.s32.totalorder %s5411_s15, 1 }
   0xa   : > { %p5476_p6 = por %p112_p3, %p40_p0  ;;  %p119_p7 = scmp.lt.s32.totalorder %s5411_s15, 4 }
   0xb   : > { %s130_s22 = sshll.u32 %s8961_s1, 4  ;;  %s5413_s24 = smov [#allocation5]   ;;  %s131_s22 = int_to_ptr.hbm [resolvable:$true] %s130_s22 }
   0xc   : > { %p5484_p8 = pnand %p5126_p5, %p119_p7  ;;  %s132_s25 = sshll.u32 %s5413_s24, 4  ;;  %s133_s25 = int_to_ptr.vmem [resolvable:$true] %s132_s25 }
   0xd   : > { %s145_s28 = sshll.u32 %s8962_s2, 4  ;;  %s5414_s29 = smov 384   ;;  %s146_s28 = int_to_ptr.hbm [resolvable:$true] %s145_s28 }
   0xe   : > { %p5165_p9 = pneg %p5484_p8  ;;  %s5415_s30 = smov 24  }
   0xf   : > { %s5416_s4 = smov [#allocation7]   ;;  %s5496_s6 = sadd.s32 1, %s5411_s15  }
  0x10   : > { %p5166_p10 = pnand %p5165_p9, %p41_p1  ;;  %s147_s5 = sshll.u32 %s5416_s4, 4  ;;  %s148_s5 = int_to_ptr.vmem [resolvable:$true] %s147_s5 }
  0x11   : > { %s27_s7 = sadd.s32 1, %s5407_s14  ;;  %s24_s8 = ssub.s32 %s5411_s15, %s5496_s6 }
  0x12   : > { %5168 = dma.hbm_to_vmem [thread:$0]  (!%p5166_p10), %s131_s22, 24576, %s133_s25, [#allocation6], %s5414_s29, %s5414_s29, %s5415_s30  }
  0x13   : > { %5171 = dma.hbm_to_vmem [thread:$0]  (!%p5166_p10), %s146_s28, 48, %s148_s5, [#allocation6]  }
  0x14   : > { %p34_p11 = scmp.ne.s32.totalorder %s5407_s14, %s5403_s13  ;;  %p25_p12 = scmp.eq.s32.totalorder %s24_s8, 0 }
  0x15   : > { %p35_p13 = scmp.eq.s32.totalorder %s5411_s15, 0  ;;  %p5182_p3 = scmp.lt.s32.totalorder %s5411_s15, 3 }
  0x16   : > { %p5506_p0 = por %p106_p2, %p34_p11  ;;  %s158_s11 = sand.u32 1, %s5407_s14  }
  0x17   : > { %s5512_s10 = scalar_select %p25_p12, %s5407_s14, %s27_s7  }
  0x18   : > { %p36_p5 = por %p35_p13, %p34_p11  ;;  %s5130_s17 = sshll.u32 %s158_s11, 6 }
  0x19   : > { %s5151_s20 = sshll.u32 %s5411_s15, 6  ;;  %s162_s25 = scalar_lea.vmem [#allocation2], %s5130_s17 }
  0x1a   : > { %s168_s24 = scalar_lea.hbm %s8960_s0, %s5151_s20  ;;  %s171_s26 = sshll.u32 %s162_s25, 4  ;;  %s172_s26 = int_to_ptr.vmem [resolvable:$true] %s171_s26 }
  0x1b   : > { %s169_s27 = sshll.u32 %s168_s24, 4  ;;  %p5519_p2 = pnand %p5182_p3, %p36_p5  ;;  %s170_s27 = int_to_ptr.hbm [resolvable:$true] %s169_s27 }
  0x1c   : > { %s159_s29 = scalar_lea.sflag [#allocation3], %s158_s11  ;;  %s5311_s30 = sshra.s32 %s170_s27, 4  ;;  %s5312_s30 = int_to_ptr.hbm [resolvable:$true] %s5311_s30 }
  0x1d   : > { %s5313_s4 = scalar_lea.hbm %s5312_s30, 64  ;;  %p5315_p9 = pneg %p5519_p2 }
  0x1e   : > { %p5314_p7 = scmp.ne.s32.totalorder %s5312_s30, %s5313_s4  ;;  %s5318_s8 = scalar_lea.hbm %s8960_s0, 192 }
  0x1f   : > { %p5319_p12 = scmp.lt.s32.totalorder %s5312_s30, %s8960_s0  ;;  %p5320_p13 = scmp.lt.s32.totalorder %s5318_s8, %s5313_s4 }
  0x20   : > { %p5316_p10 = pnand %p5315_p9, %p5314_p7 }
  0x21   : > { %p5321_p3 = por %p5320_p13, %p5319_p12 }
  0x22   : > { %p5317_p11 = pneg %p5316_p10 }
  0x24   : > { %p5322_p5 = pnand %p5321_p3, %p5317_p11 }
  0x26   : > { %5325 = shalt.err (!%p5322_p5)
}
  0x27   : > { %s5417_s11 = smov 512   ;;  %s5418_s21 = smov 32  }
  0x28   : > { %5175 = dma.hbm_to_vmem [thread:$0]  (!%p5519_p2), %s170_s27, 1024, %s172_s26, %s159_s29, %s5417_s11, %s5417_s11, %s5418_s21  }
  0x29   : > { %183 = sbr.rel (%p5484_p8) target bundleno = 879 (0x36f), region = 32 }
  0x2e   : > { %s5536_s22 = sand.u32 1, %s5403_s13  }
  0x2f   : > { %s5135_s24 = sshll.u32 %s5536_s22, 6  ;;  %s186_s25 = scalar_lea.sflag [#allocation3], %s5536_s22 }
  0x30   : > { %s5540_s30 = scalar_lea.vmem [#allocation2], %s5135_s24 }
  0x31   : > { %5386 = dma.done.wait (%p5471_p4), %s186_s25, 1024  }
  0x32   : > { %5388 = vsyncadd (%p5471_p4), %s186_s25, 4294966272 }
  0x33   : > { %5390 = dma.done.wait (%p41_p1), [#allocation6], 24624  }
  0x34   : > { %5392 = vsyncadd (%p41_p1), [#allocation6], 4294942672  ;;  %v278_v0 = vld [vmem:[#allocation5 + $0x168] sm:$0xff]  ;;  %v275_v1 = vld [vmem:[#allocation5 + $0x150] sm:$0xff]  ;;  %s5138_s18 = sshll.u32 %s5536_s22, 4  ;;  %s5152_s23 = sshll.u32 %s5462_s16, 4 }
  0x35   : > { %v272_v2 = vld [vmem:[#allocation5 + $0x138] sm:$0xff]  ;;  %v5550_v3 = vand.u32 4294901760, %v278_v0  ;;  %v5552_v4 = vand.u32 4294901760, %v275_v1  ;;  %v269_v6 = vld [vmem:[#allocation5 + $0x120] sm:$0xff]  ;;  %v266_v7 = vld [vmem:[#allocation5 + $0x108] sm:$0xff]  ;;  %s5029_s27 = scalar_lea.hbm %s8963_s3, %s5152_s23  ;;  %s222_s28 = scalar_lea.vmem [#allocation8], %s5138_s18 }
  0x36   : > { %v5554_v5 = vand.u32 4294901760, %v272_v2  ;;  %v263_v8 = vld [vmem:[#allocation5 + $0xf0] sm:$0xff]  ;;  %v5556_v9 = vand.u32 4294901760, %v269_v6  ;;  %v5558_v10 = vand.u32 4294901760, %v266_v7  ;;  %v260_v12 = vld [vmem:[#allocation5 + $0xd8] sm:$0xff]  ;;  %v257_v13 = vld [vmem:[#allocation5 + $0xc0] sm:$0xff] }
  0x37   : > { %v5560_v11 = vand.u32 4294901760, %v263_v8  ;;  %434 = vmatpush.msra.mxu0 %v5550_v3  ;;  %v5564_v14 = vsub.f32 %v278_v0, %v5550_v3  ;;  %v5567_v15 = vsub.f32 %v275_v1, %v5552_v4  ;;  %647 = vmatpush.msra.mxu3 %v5550_v3  ;;  %v5573_v17 = vand.u32 4294901760, %v260_v12  ;;  %v254_v18 = vld [vmem:[#allocation5 + $0xa8] sm:$0xff]  ;;  %v251_v26 = vld [vmem:[#allocation5 + $0x90] sm:$0xff]  ;;  %v248_v36 = vld [vmem:[#allocation5 + $0x78] sm:$0xff]  ;;  %s5030_s29 = sshll.u32 %s222_s28, 4  ;;  %s5031_s29 = int_to_ptr.vmem [resolvable:$true] %s5030_s29 }
  0x38   : > { %v5571_v16 = vsub.f32 %v272_v2, %v5554_v5  ;;  %v5576_v19 = vsub.f32 %v269_v6, %v5556_v9  ;;  %v5579_v20 = vsub.f32 %v266_v7, %v5558_v10  ;;  %v5581_v21 = vand.u32 4294901760, %v257_v13  ;;  %v245_v42 = vld [vmem:[#allocation5 + $0x60] sm:$0xff]  ;;  %v242_v48 = vld [vmem:[#allocation5 + $0x48] sm:$0xff]  ;;  %v239_v54 = vld [vmem:[#allocation5 + $0x30] sm:$0xff]  ;;  %s5032_s4 = sshll.u32 %s5029_s27, 4  ;;  %s5018_s5 = scalar_lea.sflag [#allocation4], %s5536_s22  ;;  %s5033_s4 = int_to_ptr.hbm [resolvable:$true] %s5032_s4 }
  0x39   : > { %436 = vmatpush.msra.mxu0 %v5552_v4  ;;  %589 = vmatpush.msra.mxu2 %v5564_v14  ;;  %v484_v22 = vand.u32 4294901760, %v5564_v14  ;;  %v8979_v23 = vand.u32 4294901760, %v5567_v15  ;;  %v5589_v25 = vsub.f32 %v263_v8, %v5560_v11  ;;  %v5593_v28 = vand.u32 4294901760, %v254_v18  ;;  %v326_v59 = vld [vmem:[#allocation5 + $0x2e8] sm:$0xff]  ;;  %v236_v61 = vld [vmem:[#allocation5 + $0x18] sm:$0xff]  ;;  %v323_v2 = vld [vmem:[#allocation5 + $0x2d0] sm:$0xff] }
  0x3a   : > { %v8977_v24 = vand.u32 4294901760, %v5571_v16  ;;  %649 = vmatpush.msra.mxu3 %v5552_v4  ;;  %v8976_v27 = vand.u32 4294901760, %v5576_v19  ;;  %v5596_v29 = vsub.f32 %v260_v12, %v5573_v17  ;;  %v8973_v33 = vand.u32 4294901760, %v5579_v20  ;;  %v233_v7 = vld [vmem:[#allocation5] sm:$0xff]  ;;  %s5355_s7 = sshra.s32 %s5033_s4, 4  ;;  %s5361_s11 = scalar_lea.hbm %s8963_s3, 48  ;;  %s5356_s7 = int_to_ptr.hbm [resolvable:$true] %s5355_s7 }
  0x3b   : > { %438 = vmatpush.msra.mxu0 %v5554_v5  ;;  %592 = vmatpush.msra.mxu2 %v5567_v15  ;;  %v485_v30 = vsub.f32 %v5564_v14, %v484_v22  ;;  %v491_v31 = vsub.f32 %v5567_v15, %v8979_v23  ;;  %v5611_v34 = vand.u32 4294901760, %v251_v26  ;;  %v5614_v35 = vsub.f32 %v257_v13, %v5581_v21  ;;  %v299_v23 = vld [vmem:[#allocation5 + $0x210] sm:$0xff]  ;;  %s5357_s8 = scalar_lea.hbm %s5356_s7, 16  ;;  %p5362_p2 = scmp.lt.s32.totalorder %s5356_s7, %s8963_s3 }
  0x3c   : > { %v497_v32 = vsub.f32 %v5571_v16, %v8977_v24  ;;  %651 = vmatpush.msra.mxu3 %v5554_v5  ;;  %v503_v39 = vsub.f32 %v5576_v19, %v8976_v27  ;;  %v8972_v40 = vand.u32 4294901760, %v5589_v25  ;;  %v5624_v41 = vsub.f32 %v254_v18, %v5593_v28  ;;  %p5358_p1 = scmp.ne.s32.totalorder %s5356_s7, %s5357_s8  ;;  %p5363_p7 = scmp.lt.s32.totalorder %s5361_s11, %s5357_s8 }
  0x3d   : > { %440 = vmatpush.msra.mxu0 %v5556_v9  ;;  %v486_v37 = vand.u32 4294901760, %v485_v30  ;;  %595 = vmatpush.msra.mxu2 %v5571_v16  ;;  %v492_v38 = vand.u32 4294901760, %v491_v31  ;;  %v509_v44 = vsub.f32 %v5579_v20, %v8973_v33  ;;  %v5630_v45 = vand.u32 4294901760, %v248_v36 }
  0x3e   : > { %653 = vmatpush.msra.mxu3 %v5556_v9  ;;  %v498_v43 = vand.u32 4294901760, %v497_v32  ;;  %v8970_v46 = vand.u32 4294901760, %v5596_v29  ;;  %v8969_v47 = vand.u32 4294901760, %v5614_v35  ;;  %v504_v49 = vand.u32 4294901760, %v503_v39  ;;  %v320_v32 = vld [vmem:[#allocation5 + $0x2b8] sm:$0xff]  ;;  %p5359_p4 = pnand %p5358_p1, %p5506_p0  ;;  %p5364_p9 = por %p5363_p7, %p5362_p2 }
  0x3f   : > { %442 = vmatpush.msra.mxu0 %v5558_v10  ;;  %487 = vmatpush.msra.mxu1 %v486_v37  ;;  %v515_v50 = vsub.f32 %v5589_v25, %v8972_v40  ;;  %v5640_v51 = vand.u32 4294901760, %v245_v42  ;;  %v5643_v52 = vsub.f32 %v251_v26, %v5611_v34  ;;  %v8967_v53 = vand.u32 4294901760, %v5624_v41 }
  0x40   : > { %598 = vmatpush.msra.mxu2 %v5576_v19  ;;  %655 = vmatpush.msra.mxu3 %v5558_v10  ;;  %v510_v55 = vand.u32 4294901760, %v509_v44  ;;  %v521_v56 = vsub.f32 %v5596_v29, %v8970_v46  ;;  %v5652_v57 = vand.u32 4294901760, %v242_v48  ;;  %v5655_v58 = vsub.f32 %v248_v36, %v5630_v45  ;;  %p5360_p8 = pneg %p5359_p4 }
  0x41   : > { %444 = vmatpush.msra.mxu0 %v5560_v11  ;;  %493 = vmatpush.msra.mxu1 %v492_v38  ;;  %v527_v60 = vsub.f32 %v5614_v35, %v8969_v47  ;;  %v516_v62 = vand.u32 4294901760, %v515_v50  ;;  %v5663_v63 = vand.u32 4294901760, %v239_v54  ;;  %v8966_v0 = vand.u32 4294901760, %v5643_v52 }
  0x42   : > { %601 = vmatpush.msra.mxu2 %v5579_v20  ;;  %657 = vmatpush.msra.mxu3 %v5560_v11  ;;  %v5667_v1 = vsub.f32 %v245_v42, %v5640_v51  ;;  %v533_v6 = vsub.f32 %v5624_v41, %v8967_v53  ;;  %v5674_v8 = vand.u32 4294901760, %v326_v59  ;;  %v522_v12 = vand.u32 4294901760, %v521_v56  ;;  %v317_v42 = vld [vmem:[#allocation5 + $0x2a0] sm:$0xff]  ;;  %p5365_p10 = pnand %p5364_p9, %p5360_p8 }
  0x43   : > { %446 = vmatpush.msra.mxu0 %v5573_v17  ;;  %499 = vmatpush.msra.mxu1 %v498_v43  ;;  %v5677_v13 = vand.u32 4294901760, %v236_v61  ;;  %v8964_v18 = vand.u32 4294901760, %v5655_v58  ;;  %v5681_v26 = vsub.f32 %v242_v48, %v5652_v57  ;;  %v528_v30 = vand.u32 4294901760, %v527_v60 }
  0x44   : > { %604 = vmatpush.msra.mxu2 %v5589_v25  ;;  %659 = vmatpush.msra.mxu3 %v5573_v17  ;;  %v5685_v31 = vand.u32 4294901760, %v323_v2  ;;  %v539_v36 = vsub.f32 %v5643_v52, %v8966_v0  ;;  %v5691_v37 = vand.u32 4294901760, %v233_v7  ;;  %v8965_v38 = vand.u32 4294901760, %v5667_v1 }
  0x45   : > { %448 = vmatpush.msra.mxu0 %v5581_v21  ;;  %505 = vmatpush.msra.mxu1 %v504_v49  ;;  %v5695_v39 = vsub.f32 %v239_v54, %v5663_v63  ;;  %v534_v43 = vand.u32 4294901760, %v533_v6  ;;  %v5700_v44 = vsub.f32 %v326_v59, %v5674_v8  ;;  %v545_v48 = vsub.f32 %v5655_v58, %v8964_v18  ;;  %v311_v18 = vld [vmem:[#allocation5 + $0x270] sm:$0xff] }
  0x46   : > { %607 = vmatpush.msra.mxu2 %v5596_v29  ;;  %661 = vmatpush.msra.mxu3 %v5581_v21  ;;  %9131 = vst [vmem:[#allocation12_spill] sm:$0xff] %v5691_v37  ;;  %v8968_v49 = vand.u32 4294901760, %v5681_v26  ;;  %v5708_v50 = vsub.f32 %v236_v61, %v5677_v13  ;;  %v5710_v54 = vand.u32 4294901760, %v320_v32  ;;  %v5715_v56 = vsub.f32 %v323_v2, %v5685_v31 }
  0x47   : > { %450 = vmatpush.msra.mxu0 %v5593_v28  ;;  %511 = vmatpush.msra.mxu1 %v510_v55  ;;  %v314_v55 = vld [vmem:[#allocation5 + $0x288] sm:$0xff]  ;;  %v5717_v59 = vand.u32 4294901760, %v317_v42  ;;  %v540_v60 = vand.u32 4294901760, %v539_v36  ;;  %v551_v61 = vsub.f32 %v5667_v1, %v8965_v38  ;;  %v5725_v6 = vsub.f32 %v233_v7, %v5691_v37 }
  0x48   : > { %610 = vmatpush.msra.mxu2 %v5614_v35  ;;  %663 = vmatpush.msra.mxu3 %v5593_v28  ;;  %v8974_v2 = vand.u32 4294901760, %v5700_v44  ;;  %v557_v36 = vsub.f32 %v5681_v26, %v8968_v49  ;;  %v8975_v7 = vand.u32 4294901760, %v5708_v50  ;;  %v5738_v38 = vsub.f32 %v320_v32, %v5710_v54 }
  0x49   : > { %452 = vmatpush.msra.mxu0 %v5611_v34  ;;  %517 = vmatpush.msra.mxu1 %v516_v62  ;;  %v8971_v62 = vand.u32 4294901760, %v5695_v39  ;;  %v8978_v0 = vand.u32 4294901760, %v5715_v56  ;;  %v5744_v53 = vsub.f32 %v317_v42, %v5717_v59  ;;  %v8980_v32 = vand.u32 4294901760, %v5725_v6 }
  0x4a   : > { %613 = vmatpush.msra.mxu2 %v5624_v41  ;;  %665 = vmatpush.msra.mxu3 %v5611_v34  ;;  %v5751_v47 = vand.u32 4294901760, %v311_v18  ;;  %v857_v42 = vsub.f32 %v5700_v44, %v8974_v2  ;;  %v8981_v40 = vand.u32 4294901760, %v5738_v38  ;;  %v9132_v14 = vand.u32 4294901760, %v5567_v15 }
  0x4b   : > { %454 = vmatpush.msra.mxu0 %v5630_v45  ;;  %523 = vmatpush.msra.mxu1 %v522_v12  ;;  %v5730_v12 = vand.u32 4294901760, %v314_v55  ;;  %v563_v49 = vsub.f32 %v5695_v39, %v8971_v62  ;;  %v569_v62 = vsub.f32 %v5708_v50, %v8975_v7  ;;  %v575_v7 = vsub.f32 %v5725_v6, %v8980_v32 }
  0x4c   : > { %616 = vmatpush.msra.mxu2 %v5643_v52  ;;  %667 = vmatpush.msra.mxu3 %v5630_v45  ;;  %v5779_v27 = vsub.f32 %v311_v18, %v5751_v47  ;;  %v869_v18 = vsub.f32 %v5738_v38, %v8981_v40  ;;  %v5807_v15 = vand.u32 4294901760, %v299_v23 }
  0x4d   : > { %456 = vmatpush.msra.mxu0 %v5640_v51  ;;  %529 = vmatpush.msra.mxu1 %v528_v30  ;;  %v546_v30 = vand.u32 4294901760, %v545_v48  ;;  %v552_v48 = vand.u32 4294901760, %v551_v61  ;;  %v5759_v46 = vsub.f32 %v314_v55, %v5730_v12  ;;  %v558_v61 = vand.u32 4294901760, %v557_v36 }
  0x4e   : > { %619 = vmatpush.msra.mxu2 %v5655_v58  ;;  %669 = vmatpush.msra.mxu3 %v5640_v51  ;;  %v863_v55 = vsub.f32 %v5715_v56, %v8978_v0  ;;  %v564_v36 = vand.u32 4294901760, %v563_v49  ;;  %v858_v0 = vand.u32 4294901760, %v857_v42  ;;  %v570_v49 = vand.u32 4294901760, %v569_v62 }
  0x4f   : > { %458 = vmatpush.msra.mxu0 %v5652_v57  ;;  %535 = vmatpush.msra.mxu1 %v534_v43  ;;  %v308_v43 = vld [vmem:[#allocation5 + $0x258] sm:$0xff]  ;;  %v9133_v42 = vand.u32 4294901760, %v5744_v53  ;;  %v576_v40 = vand.u32 4294901760, %v575_v7  ;;  %v870_v7 = vand.u32 4294901760, %v869_v18 }
  0x50   : > { %622 = vmatpush.msra.mxu2 %v5667_v1  ;;  %671 = vmatpush.msra.mxu3 %v5652_v57  ;;  %v5766_v33 = vand.u32 4294901760, %v308_v43 }
  0x51   : > { %460 = vmatpush.msra.mxu0 %v5663_v63  ;;  %541 = vmatpush.msra.mxu1 %v540_v60  ;;  %v305_v60 = vld [vmem:[#allocation5 + $0x240] sm:$0xff]  ;;  %v875_v62 = vsub.f32 %v5744_v53, %v9133_v42 }
  0x52   : > { %625 = vmatpush.msra.mxu2 %v5681_v26  ;;  %673 = vmatpush.msra.mxu3 %v5663_v63  ;;  %v5781_v24 = vand.u32 4294901760, %v305_v60 }
  0x53   : > { %462 = vmatpush.msra.mxu0 %v5677_v13  ;;  %547 = vmatpush.msra.mxu1 %v546_v30  ;;  %v302_v30 = vld [vmem:[#allocation5 + $0x228] sm:$0xff] }
  0x54   : > { %628 = vmatpush.msra.mxu2 %v5695_v39  ;;  %675 = vmatpush.msra.mxu3 %v5677_v13  ;;  %v5794_v32 = vand.u32 4294901760, %v302_v30  ;;  %v5805_v2 = vsub.f32 %v305_v60, %v5781_v24 }
  0x55   : > { %464 = vmatpush.msra.mxu0 %v5691_v37  ;;  %553 = vmatpush.msra.mxu1 %v552_v48  ;;  %v5792_v48 = vsub.f32 %v308_v43, %v5766_v33 }
  0x56   : > { %631 = vmatpush.msra.mxu2 %v5708_v50  ;;  %677 = vmatpush.msra.mxu3 %v5691_v37  ;;  %v5817_v60 = vsub.f32 %v302_v30, %v5794_v32  ;;  %v5830_v30 = vsub.f32 %v299_v23, %v5807_v15 }
  0x57   : > { %694 = vmatpush.msrb.mxu0 %v484_v22  ;;  %559 = vmatpush.msra.mxu1 %v558_v61  ;;  %v864_v22 = vand.u32 4294901760, %v863_v55  ;;  %v296_v61 = vld [vmem:[#allocation5 + $0x1f8] sm:$0xff]  ;;  %v9135_v55 = vand.u32 4294901760, %v5759_v46 }
  0x58   : > { %634 = vmatpush.msra.mxu2 %v5725_v6  ;;  %859 = vmatpush.msrb.mxu3 %v858_v0  ;;  %v5819_v37 = vand.u32 4294901760, %v296_v61  ;;  %v876_v0 = vand.u32 4294901760, %v875_v62 }
  0x59   : > { %698 = vmatpush.msrb.mxu0 %v9132_v14  ;;  %565 = vmatpush.msra.mxu1 %v564_v36  ;;  %v9134_v14 = vand.u32 4294901760, %v5571_v16  ;;  %v881_v42 = vsub.f32 %v5759_v46, %v9135_v55  ;;  %v293_v36 = vld [vmem:[#allocation5 + $0x1e0] sm:$0xff]  ;;  %v9136_v16 = vand.u32 4294901760, %v5576_v19  ;;  %v9138_v19 = vand.u32 4294901760, %v5579_v20  ;;  %v290_v55 = vld [vmem:[#allocation5 + $0x1c8] sm:$0xff] }
  0x5a   : > { %806 = vmatpush.msrb.mxu2 %v5674_v8  ;;  %865 = vmatpush.msrb.mxu3 %v864_v22  ;;  %v5832_v43 = vand.u32 4294901760, %v293_v36  ;;  %v5843_v23 = vsub.f32 %v296_v61, %v5819_v37  ;;  %v9141_v20 = vand.u32 4294901760, %v5589_v25 }
  0x5b   : > { %702 = vmatpush.msrb.mxu0 %v9134_v14  ;;  %571 = vmatpush.msra.mxu1 %v570_v49  ;;  %v225_v14 = vld [vmem:[%s5540_s30] sm:$0xff]  ;;  %v9137_v49 = vand.u32 4294901760, %v5779_v27  ;;  %v882_v22 = vand.u32 4294901760, %v881_v42  ;;  %v9142_v42 = vand.u32 4294901760, %v5805_v2 }
  0x5c   : > { %808 = vmatpush.msrb.mxu2 %v5685_v31  ;;  %871 = vmatpush.msrb.mxu3 %v870_v7  ;;  %v5856_v61 = vsub.f32 %v293_v36, %v5832_v43 }
  0x5d   : > { %706 = vmatpush.msrb.mxu0 %v9136_v16  ;;  %577 = vmatpush.msra.mxu1 %v576_v40  ;;  %v887_v18 = vsub.f32 %v5779_v27, %v9137_v49  ;;  %v9139_v40 = vand.u32 4294901760, %v5792_v48  ;;  %v5845_v49 = vand.u32 4294901760, %v225_v14  ;;  %v899_v7 = vsub.f32 %v5805_v2, %v9142_v42 }
  0x5e   : > { %810 = vmatpush.msrb.mxu2 %v5710_v54  ;;  %877 = vmatpush.msrb.mxu3 %v876_v0  ;;  %v9143_v16 = vand.u32 4294901760, %v5596_v29  ;;  %v9144_v0 = vand.u32 4294901760, %v5817_v60  ;;  %v284_v29 = vld [vmem:[#allocation5 + $0x198] sm:$0xff]  ;;  %v922_v42 = vand.u32 4294901760, %v5856_v61 }
  0x5f   : > { %710 = vmatpush.msrb.mxu0 %v9138_v19  ;;  %765 = vmatpush.msrb.mxu1 %v5550_v3  ;;  %v893_v62 = vsub.f32 %v5792_v48, %v9139_v40  ;;  %9140 = vst [vmem:[#allocation13_spill] sm:$0xff] %v5845_v49  ;;  %v888_v3 = vand.u32 4294901760, %v887_v18  ;;  %v910_v19 = vand.u32 4294901760, %v5830_v30  ;;  %v287_v40 = vld [vmem:[#allocation5 + $0x1b0] sm:$0xff]  ;;  %v5869_v36 = vsub.f32 %v225_v14, %v5845_v49 }
  0x60   : > { %812 = vmatpush.msrb.mxu2 %v5717_v59  ;;  %883 = vmatpush.msrb.mxu3 %v882_v22  ;;  %v905_v18 = vsub.f32 %v5817_v60, %v9144_v0  ;;  %v900_v22 = vand.u32 4294901760, %v899_v7  ;;  %v9147_v14 = vand.u32 4294901760, %v5624_v41  ;;  %v281_v0 = vld [vmem:[#allocation5 + $0x180] sm:$0xff] }
  0x61   : > { %714 = vmatpush.msrb.mxu0 %v9141_v20  ;;  %767 = vmatpush.msrb.mxu1 %v5552_v4  ;;  %v5861_v4 = vand.u32 4294901760, %v290_v55  ;;  %v894_v25 = vand.u32 4294901760, %v893_v62  ;;  %v8983_v20 = vand.u32 4294901760, %v5843_v23  ;;  %9145 = vst [vmem:[#allocation14_spill] sm:$0xff] %v5869_v36  ;;  %v911_v62 = vsub.f32 %v5830_v30, %v910_v19 }
  0x62   : > { %814 = vmatpush.msrb.mxu2 %v5730_v12  ;;  %889 = vmatpush.msrb.mxu3 %v888_v3  ;;  %v906_v3 = vand.u32 4294901760, %v905_v18  ;;  %v5895_v41 = vand.u32 4294901760, %v5869_v36  ;;  %v923_v18 = vsub.f32 %v5856_v61, %v922_v42 }
  0x63   : > { %718 = vmatpush.msrb.mxu0 %v9143_v16  ;;  %769 = vmatpush.msrb.mxu1 %v5554_v5  ;;  %v9146_v16 = vand.u32 4294901760, %v5614_v35  ;;  %v5874_v5 = vand.u32 4294901760, %v287_v40  ;;  %v5885_v35 = vsub.f32 %v290_v55, %v5861_v4  ;;  %v917_v7 = vsub.f32 %v5843_v23, %v8983_v20 }
  0x64   : > { %816 = vmatpush.msrb.mxu2 %v5751_v47  ;;  %895 = vmatpush.msrb.mxu3 %v894_v25  ;;  %9148 = vst [vmem:[#allocation15_spill] sm:$0xff] %v5895_v41  ;;  %v912_v25 = vand.u32 4294901760, %v911_v62  ;;  %v468_v62 = vsub.f32 %v5869_v36, %v5895_v41 }
  0x65   : > { %722 = vmatpush.msrb.mxu0 %v9146_v16  ;;  %771 = vmatpush.msrb.mxu1 %v5556_v9  ;;  %v5887_v9 = vand.u32 4294901760, %v284_v29  ;;  %v229_v16 = vld [vmem:[%s5540_s30 + $0x20] sm:$0xff]  ;;  %v5901_v55 = vsub.f32 %v287_v40, %v5874_v5 }
  0x66   : > { %818 = vmatpush.msrb.mxu2 %v5766_v33  ;;  %901 = vmatpush.msrb.mxu3 %v900_v22  ;;  %v5909_v20 = vand.u32 4294901760, %v229_v16  ;;  %v918_v22 = vand.u32 4294901760, %v917_v7  ;;  %v9154_v7 = vand.u32 4294901760, %v5681_v26 }
  0x67   : > { %726 = vmatpush.msrb.mxu0 %v9147_v14  ;;  %773 = vmatpush.msrb.mxu1 %v5558_v10  ;;  %v9149_v10 = vand.u32 4294901760, %v5643_v52  ;;  %v5907_v14 = vand.u32 4294901760, %v281_v0  ;;  %v9151_v52 = vand.u32 4294901760, %v5655_v58  ;;  %v5916_v40 = vsub.f32 %v284_v29, %v5887_v9 }
  0x68   : > { %820 = vmatpush.msrb.mxu2 %v5781_v24  ;;  %9150 = vst [vmem:[#allocation16_spill] sm:$0xff] %v5909_v20  ;;  %907 = vmatpush.msrb.mxu3 %v906_v3  ;;  %v924_v58 = vand.u32 4294901760, %v923_v18  ;;  %v5927_v29 = vsub.f32 %v229_v16, %v5909_v20  ;;  %v5941_v16 = vand.u32 4294901760, %v468_v62  ;;  %v9160_v62 = vand.u32 4294901760, %v5725_v6 }
  0x69   : > { %730 = vmatpush.msrb.mxu0 %v9149_v10  ;;  %775 = vmatpush.msrb.mxu1 %v5560_v11  ;;  %v928_v11 = vand.u32 4294901760, %v5885_v35  ;;  %v9152_v10 = vand.u32 4294901760, %v5667_v1  ;;  %v5930_v3 = vsub.f32 %v281_v0, %v5907_v14  ;;  %v940_v1 = vand.u32 4294901760, %v5916_v40 }
  0x6a   : > { %822 = vmatpush.msrb.mxu2 %v5794_v32  ;;  %913 = vmatpush.msrb.mxu3 %v912_v25  ;;  %9153 = vst [vmem:[#allocation17_spill] sm:$0xff] %v5927_v29  ;;  %v9156_v0 = vand.u32 4294901760, %v5695_v39  ;;  %v5952_v25 = vand.u32 4294901760, %v5927_v29 }
  0x6b   : > { %734 = vmatpush.msrb.mxu0 %v9151_v52  ;;  %777 = vmatpush.msrb.mxu1 %v5573_v17  ;;  %v934_v17 = vand.u32 4294901760, %v5901_v55  ;;  %v226_v52 = vld [vmem:[%s5540_s30 + $0x8] sm:$0xff]  ;;  %9155 = vst [vmem:[#allocation18_spill] sm:$0xff] %v5941_v16  ;;  %v946_v26 = vand.u32 4294901760, %v5930_v3  ;;  %v941_v39 = vsub.f32 %v5916_v40, %v940_v1 }
  0x6c   : > { %824 = vmatpush.msrb.mxu2 %v5807_v15  ;;  %919 = vmatpush.msrb.mxu3 %v918_v22  ;;  %9157 = vst [vmem:[#allocation19_spill] sm:$0xff] %v5952_v25  ;;  %v5954_v18 = vand.u32 4294901760, %v226_v52  ;;  %v9159_v22 = vand.u32 4294901760, %v5708_v50  ;;  %v476_v50 = vsub.f32 %v5927_v29, %v5952_v25 }
  0x6d   : > { %738 = vmatpush.msrb.mxu0 %v9152_v10  ;;  %779 = vmatpush.msrb.mxu1 %v5581_v21  ;;  %v929_v21 = vsub.f32 %v5885_v35, %v928_v11  ;;  %v942_v6 = vand.u32 4294901760, %v941_v39  ;;  %v353_v39 = vld [vmem:[#allocation5 + $0x3c0] sm:$0xff] }
  0x6e   : > { %826 = vmatpush.msrb.mxu2 %v5819_v37  ;;  %925 = vmatpush.msrb.mxu3 %v924_v58  ;;  %9158 = vst [vmem:[#allocation20_spill] sm:$0xff] %v5954_v18  ;;  %v5975_v58 = vsub.f32 %v226_v52, %v5954_v18  ;;  %v9165_v52 = vand.u32 4294901760, %v5715_v56 }
  0x6f   : > { %742 = vmatpush.msrb.mxu0 %v9154_v7  ;;  %781 = vmatpush.msrb.mxu1 %v5593_v28  ;;  %v935_v28 = vsub.f32 %v5901_v55, %v934_v17  ;;  %v5983_v7 = vand.u32 4294901760, %v476_v50 }
  0x70   : > { %828 = vmatpush.msrb.mxu2 %v5832_v43  ;;  %470 = vmatmul.f32.vlgmr.msra.gmra.mxu0 %v5941_v16  ;;  %9161 = vst [vmem:[#allocation21_spill] sm:$0xff] %v5975_v58 }
  0x71   : > { %746 = vmatpush.msrb.mxu0 %v9156_v0  ;;  %783 = vmatpush.msrb.mxu1 %v5611_v34  ;;  %v930_v34 = vand.u32 4294901760, %v929_v21  ;;  %v936_v10 = vand.u32 4294901760, %v935_v28  ;;  %9162 = vst [vmem:[#allocation22_spill] sm:$0xff] %v5983_v7  ;;  %v5986_v21 = vand.u32 4294901760, %v5975_v58  ;;  %v9166_v0 = vld [vmem:[#allocation12_spill] sm:$0xff] }
  0x72   : > { %637 = vmatmul.f32.vlgmr.msra.gmra.mxu2 %v5869_v36  ;;  %681 = vmatmul.f32.vlgmr.msra.gmra.mxu3 %v5895_v41 }
  0x73   : > { %750 = vmatpush.msrb.mxu0 %v9159_v22  ;;  %785 = vmatpush.msrb.mxu1 %v5630_v45  ;;  %v947_v45 = vsub.f32 %v5930_v3, %v946_v26  ;;  %9163 = vst [vmem:[#allocation23_spill] sm:$0xff] %v5986_v21 }
  0x74   : > { %830 = vmatpush.msrb.mxu2 %v5861_v4  ;;  %931 = vmatpush.msrb.mxu3 %v930_v34 }
  0x75   : > { %754 = vmatpush.msrb.mxu0 %v9160_v62  ;;  %787 = vmatpush.msrb.mxu1 %v5640_v51  ;;  %v948_v51 = vand.u32 4294901760, %v947_v45  ;;  %v350_v62 = vld [vmem:[#allocation5 + $0x3a8] sm:$0xff] }
  0x76   : > { %832 = vmatpush.msrb.mxu2 %v5874_v5  ;;  %579 = vmatmul.f32.vlgmr.msra.gmra.mxu1 %v5845_v49 }
  0x77   : > { %961 = vmatpush.msra.mxu0 %v5700_v44  ;;  %789 = vmatpush.msrb.mxu1 %v5652_v57  ;;  %v9164_v57 = vand.u32 4294901760, %v5700_v44  ;;  %v9167_v44 = vand.u32 4294901760, %v5738_v38 }
  0x78   : > { %834 = vmatpush.msrb.mxu2 %v5887_v9  ;;  %937 = vmatpush.msrb.mxu3 %v936_v10 }
  0x79   : > { %964 = vmatpush.msra.mxu0 %v5715_v56  ;;  %791 = vmatpush.msrb.mxu1 %v5663_v63  ;;  %v840_v63 = vsub.f32 %v5975_v58, %v5986_v21  ;;  %v9169_v56 = vand.u32 4294901760, %v5744_v53 }
  0x7a   : > { %836 = vmatpush.msrb.mxu2 %v5907_v14  ;;  %943 = vmatpush.msrb.mxu3 %v942_v6 }
  0x7b   : > { %642 = vmatmul.f32.gmra.mxu2 %v5927_v29  ;;  %967 = vmatpush.msra.mxu0 %v5738_v38  ;;  %v6008_v28 = vand.u32 4294901760, %v840_v63  ;;  %v9175_v38 = vand.u32 4294901760, %v5792_v48 }
  0x7c   : > { %1066 = vmatpush.msra.mxu2 %v9164_v57  ;;  %793 = vmatpush.msrb.mxu1 %v5677_v13  ;;  %v230_v13 = vld [vmem:[%s5540_s30 + $0x28] sm:$0xff]  ;;  %v347_v57 = vld [vmem:[#allocation5 + $0x390] sm:$0xff] }
  0x7d   : > { %949 = vmatpush.msrb.mxu3 %v948_v51  ;;  %478 = vmatmul.f32.gmra.mxu0 %v5983_v7  ;;  %9168 = vst [vmem:[#allocation12_spill] sm:$0xff] %v6008_v28  ;;  %v6015_v22 = vand.u32 4294901760, %v230_v13 }
  0x7e   : > { %687 = vmatmul.f32.gmra.mxu3 %v5952_v25  ;;  %970 = vmatpush.msra.mxu0 %v5744_v53  ;;  %v407_v25 = vld [vmem:[#allocation5 + $0x570] sm:$0xff] }
  0x7f   : > { %1070 = vmatpush.msra.mxu2 %v9165_v52  ;;  %1137 = vmatpush.msra.mxu3 %v5674_v8  ;;  %9170 = vst [vmem:[#allocation24_spill] sm:$0xff] %v6015_v22  ;;  %v6027_v53 = vsub.f32 %v230_v13, %v6015_v22  ;;  %v344_v13 = vld [vmem:[#allocation5 + $0x378] sm:$0xff] }
  0x80   : > { %795 = vmatpush.msrb.mxu1 %v9166_v0  ;;  %973 = vmatpush.msra.mxu0 %v5759_v46 }
  0x81   : > { %583 = vmatmul.f32.gmra.mxu1 %v5909_v20  ;;  %1074 = vmatpush.msra.mxu2 %v9167_v44  ;;  %9172 = vst [vmem:[#allocation25_spill] sm:$0xff] %v6027_v53 }
  0x82   : > { %1019 = vmatpush.msra.mxu1 %v5674_v8  ;;  %1139 = vmatpush.msra.mxu3 %v5685_v31  ;;  %v9171_v8 = vand.u32 4294901760, %v5759_v46  ;;  %v6039_v46 = vand.u32 4294901760, %v6027_v53 }
  0x83   : > { %976 = vmatpush.msra.mxu0 %v5779_v27  ;;  %1078 = vmatpush.msra.mxu2 %v9169_v56  ;;  %v6170_v56 = vand.u32 4294901760, %v347_v57 }
  0x84   : > { %1021 = vmatpush.msra.mxu1 %v5685_v31  ;;  %1141 = vmatpush.msra.mxu3 %v5710_v54  ;;  %v9173_v31 = vand.u32 4294901760, %v5779_v27  ;;  %9174 = vst [vmem:[#allocation26_spill] sm:$0xff] %v6039_v46  ;;  %v9176_v27 = vand.u32 4294901760, %v5805_v2 }
  0x85   : > { %842 = vmatmul.f32.vlgmr.msrb.gmra.mxu2 %v6008_v28  ;;  %979 = vmatpush.msra.mxu0 %v5792_v48 }
  0x86   : > { %1023 = vmatpush.msra.mxu1 %v5710_v54  ;;  %1082 = vmatpush.msra.mxu2 %v9171_v8  ;;  %v848_v54 = vsub.f32 %v6027_v53, %v6039_v46 }
  0x87   : > { %1143 = vmatpush.msra.mxu3 %v5717_v59  ;;  %756 = vmatmul.f32.vlgmr.msrb.gmra.mxu0 %v5845_v49 }
  0x88   : > { %951 = vmatmul.f32.vlgmr.msrb.gmra.mxu3 %v5954_v18  ;;  %982 = vmatpush.msra.mxu0 %v5805_v2  ;;  %v371_v2 = vld [vmem:[#allocation5 + $0x450] sm:$0xff] }
  0x89   : > { %1025 = vmatpush.msra.mxu1 %v5717_v59  ;;  %1086 = vmatpush.msra.mxu2 %v9173_v31  ;;  %v9177_v59 = vand.u32 4294901760, %v5817_v60 }
  0x8a   : > { %1145 = vmatpush.msra.mxu3 %v5730_v12  ;;  %797 = vmatmul.f32.vlgmr.msrb.gmra.mxu1 %v5845_v49  ;;  %v6348_v49 = vand.u32 4294901760, %v407_v25 }
  0x8b   : > { %985 = vmatpush.msra.mxu0 %v5817_v60  ;;  %1027 = vmatpush.msra.mxu1 %v5730_v12  ;;  %v9179_v12 = vand.u32 4294901760, %v5843_v23 }
  0x8c   : > { %1090 = vmatpush.msra.mxu2 %v9175_v38  ;;  %1147 = vmatpush.msra.mxu3 %v5751_v47  ;;  %v341_v38 = vld [vmem:[#allocation5 + $0x360] sm:$0xff]  ;;  %v6372_v36 = vsub.f32 %v407_v25, %v6348_v49 }
  0x8d   : > { %988 = vmatpush.msra.mxu0 %v5830_v30  ;;  %1029 = vmatpush.msra.mxu1 %v5751_v47  ;;  %v374_v47 = vld [vmem:[#allocation5 + $0x468] sm:$0xff]  ;;  %v365_v30 = vld [vmem:[#allocation5 + $0x420] sm:$0xff] }
  0x8e   : > { %1094 = vmatpush.msra.mxu2 %v9176_v27  ;;  %1149 = vmatpush.msra.mxu3 %v5766_v33  ;;  %v6068_v48 = vand.u32 4294901760, %v374_v47  ;;  %v6179_v27 = vand.u32 4294901760, %v344_v13 }
  0x8f   : > { %991 = vmatpush.msra.mxu0 %v5843_v23  ;;  %1031 = vmatpush.msra.mxu1 %v5766_v33  ;;  %v6063_v33 = vand.u32 4294901760, %v848_v54  ;;  %v362_v23 = vld [vmem:[#allocation5 + $0x408] sm:$0xff] }
  0x90   : > { %1098 = vmatpush.msra.mxu2 %v9177_v59  ;;  %1151 = vmatpush.msra.mxu3 %v5781_v24 }
  0x91   : > { %994 = vmatpush.msra.mxu0 %v5856_v61  ;;  %1033 = vmatpush.msra.mxu1 %v5781_v24  ;;  %9178 = vst [vmem:[#allocation27_spill] sm:$0xff] %v6063_v33  ;;  %v368_v24 = vld [vmem:[#allocation5 + $0x438] sm:$0xff]  ;;  %v6101_v61 = vand.u32 4294901760, %v362_v23 }
  0x92   : > { %1102 = vmatpush.msra.mxu2 %v910_v19  ;;  %1153 = vmatpush.msra.mxu3 %v5794_v32  ;;  %v6081_v60 = vand.u32 4294901760, %v368_v24 }
  0x93   : > { %760 = vmatmul.f32.gmra.mxu0 %v5909_v20  ;;  %1035 = vmatpush.msra.mxu1 %v5794_v32  ;;  %v6075_v32 = vand.u32 4294901760, %v371_v2 }
  0x94   : > { %997 = vmatpush.msra.mxu0 %v5885_v35  ;;  %1106 = vmatpush.msra.mxu2 %v9179_v12  ;;  %v6105_v35 = vsub.f32 %v368_v24, %v6081_v60  ;;  %v338_v12 = vld [vmem:[#allocation5 + $0x348] sm:$0xff] }
  0x95   : > { %1155 = vmatpush.msra.mxu3 %v5807_v15  ;;  %1037 = vmatpush.msra.mxu1 %v5807_v15  ;;  %v6084_v15 = vsub.f32 %v374_v47, %v6068_v48  ;;  %v6092_v19 = vsub.f32 %v371_v2, %v6075_v32  ;;  %v227_v47 = vld [vmem:[%s5540_s30 + $0x10] sm:$0xff] }
  0x96   : > { %1000 = vmatpush.msra.mxu0 %v5901_v55  ;;  %1110 = vmatpush.msra.mxu2 %v922_v42  ;;  %v356_v55 = vld [vmem:[#allocation5 + $0x3d8] sm:$0xff]  ;;  %v9197_v16 = vand.u32 4294901760, %v6105_v35 }
  0x97   : > { %1157 = vmatpush.msra.mxu3 %v5819_v37  ;;  %850 = vmatmul.f32.gmra.mxu2 %v6063_v33  ;;  %v8993_v42 = vand.u32 4294901760, %v6084_v15  ;;  %v9193_v7 = vand.u32 4294901760, %v6084_v15  ;;  %v9195_v33 = vand.u32 4294901760, %v6092_v19 }
  0x98   : > { %1003 = vmatpush.msra.mxu0 %v5916_v40  ;;  %1039 = vmatpush.msra.mxu1 %v5819_v37  ;;  %v6097_v37 = vand.u32 4294901760, %v365_v30  ;;  %v8991_v40 = vand.u32 4294901760, %v6105_v35 }
  0x99   : > { %1114 = vmatpush.msra.mxu2 %v928_v11  ;;  %1159 = vmatpush.msra.mxu3 %v5832_v43  ;;  %v359_v11 = vld [vmem:[#allocation5 + $0x3f0] sm:$0xff] }
  0x9a   : > { %955 = vmatmul.f32.gmra.mxu3 %v6015_v22  ;;  %1006 = vmatpush.msra.mxu0 %v5930_v3  ;;  %v6118_v34 = vsub.f32 %v365_v30, %v6097_v37  ;;  %v1241_v6 = vsub.f32 %v6105_v35, %v8991_v40 }
  0x9b   : > { %1041 = vmatpush.msra.mxu1 %v5832_v43  ;;  %1118 = vmatpush.msra.mxu2 %v934_v17  ;;  %v8992_v43 = vand.u32 4294901760, %v6092_v19  ;;  %v6115_v17 = vand.u32 4294901760, %v359_v11 }
  0x9c   : > { %1161 = vmatpush.msra.mxu3 %v5861_v4  ;;  %801 = vmatmul.f32.gmra.mxu1 %v5909_v20  ;;  %v8989_v10 = vand.u32 4294901760, %v6118_v34  ;;  %v1242_v8 = vand.u32 4294901760, %v1241_v6  ;;  %v6210_v6 = vsub.f32 %v344_v13, %v6179_v27  ;;  %v332_v13 = vld [vmem:[#allocation5 + $0x318] sm:$0xff] }
  0x9d   : > { %1009 = vmatmul.f32.vlgmr.msra.gmra.mxu0 %v5975_v58  ;;  %1043 = vmatpush.msra.mxu1 %v5861_v4  ;;  %v1229_v4 = vsub.f32 %v6084_v15, %v8993_v42  ;;  %v1235_v3 = vsub.f32 %v6092_v19, %v8992_v43  ;;  %v6145_v45 = vsub.f32 %v359_v11, %v6115_v17  ;;  %v419_v42 = vld [vmem:[#allocation5 + $0x5d0] sm:$0xff] }
  0x9e   : > { %1178 = vmatpush.msrb.mxu0 %v6068_v48  ;;  %1122 = vmatpush.msra.mxu2 %v940_v1  ;;  %v6128_v1 = vsub.f32 %v362_v23, %v6101_v61  ;;  %v1247_v44 = vsub.f32 %v6118_v34, %v8989_v10  ;;  %v6193_v23 = vand.u32 4294901760, %v341_v38  ;;  %v6196_v11 = vsub.f32 %v347_v57, %v6170_v56  ;;  %v231_v10 = vld [vmem:[%s5540_s30 + $0x30] sm:$0xff] }
  0x9f   : > { %1163 = vmatpush.msra.mxu3 %v5874_v5  ;;  %1045 = vmatpush.msra.mxu1 %v5874_v5  ;;  %v6132_v5 = vand.u32 4294901760, %v356_v55  ;;  %v1230_v50 = vand.u32 4294901760, %v1229_v4  ;;  %v1236_v52 = vand.u32 4294901760, %v1235_v3  ;;  %v6199_v4 = vand.u32 4294901760, %v227_v47 }
  0xa0   : > { %1180 = vmatpush.msrb.mxu0 %v6075_v32  ;;  %1126 = vmatpush.msra.mxu2 %v946_v26  ;;  %v6139_v26 = vand.u32 4294901760, %v353_v39  ;;  %v8988_v51 = vand.u32 4294901760, %v6128_v1  ;;  %v1248_v24 = vand.u32 4294901760, %v1247_v44 }
  0xa1   : > { %1165 = vmatpush.msra.mxu3 %v5887_v9  ;;  %1128 = vmatmul.f32.vlgmr.msra.gmra.mxu2 %v5954_v18  ;;  %v6158_v63 = vsub.f32 %v356_v55, %v6132_v5  ;;  %9180 = vst [vmem:[#allocation28_spill] sm:$0xff] %v6199_v4 }
  0xa2   : > { %1182 = vmatpush.msrb.mxu0 %v6081_v60  ;;  %1333 = vmatpush.msrb.mxu2 %v6084_v15  ;;  %v6163_v0 = vsub.f32 %v353_v39, %v6139_v26  ;;  %v1253_v31 = vsub.f32 %v6128_v1, %v8988_v51  ;;  %v335_v39 = vld [vmem:[#allocation5 + $0x330] sm:$0xff]  ;;  %v6266_v51 = vand.u32 4294901760, %v231_v10 }
  0xa3   : > { %1047 = vmatpush.msra.mxu1 %v5887_v9  ;;  %1167 = vmatpush.msra.mxu3 %v5907_v14  ;;  %v6155_v9 = vand.u32 4294901760, %v350_v62  ;;  %v8984_v54 = vand.u32 4294901760, %v6158_v63  ;;  %v6218_v44 = vand.u32 4294901760, %v335_v39 }
  0xa4   : > { %1169 = vmatmul.f32.vlgmr.msra.gmra.mxu3 %v5954_v18  ;;  %1184 = vmatpush.msrb.mxu0 %v6097_v37  ;;  %v8985_v2 = vand.u32 4294901760, %v6163_v0  ;;  %v1254_v55 = vand.u32 4294901760, %v1253_v31  ;;  %v6222_v31 = vsub.f32 %v341_v38, %v6193_v23  ;;  %v8994_v38 = vand.u32 4294901760, %v6210_v6  ;;  %9183 = vst [vmem:[#allocation31_spill] sm:$0xff] %v6266_v51 }
  0xa5   : > { %1336 = vmatpush.msrb.mxu2 %v6092_v19  ;;  %1391 = vmatpush.msrb.mxu3 %v6068_v48  ;;  %v6183_v59 = vsub.f32 %v350_v62, %v6155_v9  ;;  %v1265_v3 = vsub.f32 %v6158_v63, %v8984_v54  ;;  %v6206_v62 = vand.u32 4294901760, %v338_v12  ;;  %v6227_v54 = vsub.f32 %v227_v47, %v6199_v4 }
  0xa6   : > { %1049 = vmatpush.msra.mxu1 %v5907_v14  ;;  %1186 = vmatpush.msrb.mxu0 %v6101_v61  ;;  %v8986_v14 = vand.u32 4294901760, %v6145_v45  ;;  %v1271_v57 = vsub.f32 %v6163_v0, %v8985_v2 }
  0xa7   : > { %1053 = vmatmul.f32.vlgmr.msra.gmra.mxu1 %v5986_v21  ;;  %1339 = vmatpush.msrb.mxu2 %v6105_v35  ;;  %9181 = vst [vmem:[#allocation29_spill] sm:$0xff] %v6227_v54  ;;  %v6235_v2 = vsub.f32 %v338_v12, %v6206_v62  ;;  %v6247_v12 = vsub.f32 %v335_v39, %v6218_v44  ;;  %v416_v21 = vld [vmem:[#allocation5 + $0x5b8] sm:$0xff] }
  0xa8   : > { %1231 = vmatpush.msrb.mxu1 %v1230_v50  ;;  %1393 = vmatpush.msrb.mxu3 %v6075_v32  ;;  %v1259_v30 = vsub.f32 %v6145_v45, %v8986_v14  ;;  %v8987_v50 = vand.u32 4294901760, %v6183_v59  ;;  %v1272_v47 = vand.u32 4294901760, %v1271_v57  ;;  %v422_v14 = vld [vmem:[#allocation5 + $0x5e8] sm:$0xff]  ;;  %v6253_v57 = vand.u32 4294901760, %v6227_v54  ;;  %v392_v35 = vld [vmem:[#allocation5 + $0x4f8] sm:$0xff] }
  0xa9   : > { %1188 = vmatpush.msrb.mxu0 %v6115_v17  ;;  %1342 = vmatpush.msrb.mxu2 %v6118_v34  ;;  %v6260_v39 = vand.u32 4294901760, %v422_v14  ;;  %v6302_v18 = vand.u32 4294901760, %v416_v21 }
  0xaa   : > { %1237 = vmatpush.msrb.mxu1 %v1236_v52  ;;  %1395 = vmatpush.msrb.mxu3 %v6081_v60  ;;  %v1260_v52 = vand.u32 4294901760, %v1259_v30  ;;  %v1277_v30 = vsub.f32 %v6183_v59, %v8987_v50  ;;  %v329_v50 = vld [vmem:[#allocation5 + $0x300] sm:$0xff]  ;;  %9182 = vst [vmem:[#allocation30_spill] sm:$0xff] %v6253_v57 }
  0xab   : > { %1132 = vmatmul.f32.gmra.mxu2 %v6015_v22  ;;  %1190 = vmatpush.msrb.mxu0 %v6132_v5  ;;  %v6264_v43 = vand.u32 4294901760, %v329_v50  ;;  %9188 = vst [vmem:[#allocation33_spill] sm:$0xff] %v6302_v18 }
  0xac   : > { %1243 = vmatpush.msrb.mxu1 %v1242_v8  ;;  %1345 = vmatpush.msrb.mxu2 %v6128_v1  ;;  %v8990_v8 = vand.u32 4294901760, %v6196_v11 }
  0xad   : > { %1397 = vmatpush.msrb.mxu3 %v6097_v37  ;;  %1014 = vmatmul.f32.gmra.mxu0 %v6027_v53  ;;  %v1212_v53 = vsub.f32 %v6227_v54, %v6253_v57  ;;  %v6292_v58 = vsub.f32 %v329_v50, %v6264_v43 }
  0xae   : > { %1173 = vmatmul.f32.gmra.mxu3 %v6015_v22  ;;  %1192 = vmatpush.msrb.mxu0 %v6139_v26  ;;  %v6295_v22 = vsub.f32 %v231_v10, %v6266_v51  ;;  %v410_v10 = vld [vmem:[#allocation5 + $0x588] sm:$0xff] }
  0xaf   : > { %1249 = vmatpush.msrb.mxu1 %v1248_v24  ;;  %1348 = vmatpush.msrb.mxu2 %v6145_v45  ;;  %v1266_v24 = vand.u32 4294901760, %v1265_v3  ;;  %v6243_v3 = vand.u32 4294901760, %v332_v13  ;;  %v6306_v50 = vand.u32 4294901760, %v1212_v53  ;;  %v6328_v20 = vand.u32 4294901760, %v410_v10 }
  0xb0   : > { %1399 = vmatpush.msrb.mxu3 %v6101_v61  ;;  %1059 = vmatmul.f32.gmra.mxu1 %v6039_v46  ;;  %v6287_v46 = vand.u32 4294901760, %v419_v42  ;;  %9186 = vst [vmem:[#allocation32_spill] sm:$0xff] %v6295_v22  ;;  %v6319_v53 = vand.u32 4294901760, %v6295_v22  ;;  %v9194_v29 = vand.u32 4294901760, %v6292_v58 }
  0xb1   : > { %1194 = vmatpush.msrb.mxu0 %v6155_v9  ;;  %1255 = vmatpush.msrb.mxu1 %v1254_v55  ;;  %v1283_v55 = vsub.f32 %v6196_v11, %v8990_v8  ;;  %v1289_v8 = vsub.f32 %v6210_v6, %v8994_v38  ;;  %v6273_v40 = vsub.f32 %v332_v13, %v6243_v3 }
  0xb2   : > { %1351 = vmatpush.msrb.mxu2 %v6158_v63  ;;  %1401 = vmatpush.msrb.mxu3 %v6115_v17  ;;  %v6285_v13 = vsub.f32 %v422_v14, %v6260_v39  ;;  %v9187_v14 = vand.u32 4294901760, %v6247_v12  ;;  %9189 = vst [vmem:[#allocation34_spill] sm:$0xff] %v6306_v50  ;;  %v6311_v28 = vsub.f32 %v419_v42, %v6287_v46 }
  0xb3   : > { %1196 = vmatpush.msrb.mxu0 %v6170_v56  ;;  %1261 = vmatpush.msrb.mxu1 %v1260_v52  ;;  %v1278_v52 = vand.u32 4294901760, %v1277_v30  ;;  %v9184_v30 = vand.u32 4294901760, %v6222_v31  ;;  %9190 = vst [vmem:[#allocation35_spill] sm:$0xff] %v6319_v53  ;;  %v6353_v15 = vsub.f32 %v410_v10, %v6328_v20 }
  0xb4   : > { %1354 = vmatpush.msrb.mxu2 %v6163_v0  ;;  %1403 = vmatpush.msrb.mxu3 %v6132_v5 }
  0xb5   : > { %1198 = vmatpush.msrb.mxu0 %v6179_v27  ;;  %1267 = vmatpush.msrb.mxu1 %v1266_v24  ;;  %v1284_v24 = vand.u32 4294901760, %v1283_v55  ;;  %v1295_v38 = vsub.f32 %v6222_v31, %v9184_v30  ;;  %v9185_v55 = vand.u32 4294901760, %v6235_v2 }
  0xb6   : > { %1357 = vmatpush.msrb.mxu2 %v6183_v59  ;;  %1405 = vmatpush.msrb.mxu3 %v6139_v26 }
  0xb7   : > { %1200 = vmatpush.msrb.mxu0 %v6193_v23  ;;  %1273 = vmatpush.msrb.mxu1 %v1272_v47  ;;  %v1290_v47 = vand.u32 4294901760, %v1289_v8  ;;  %v1301_v30 = vsub.f32 %v6235_v2, %v9185_v55  ;;  %v413_v8 = vld [vmem:[#allocation5 + $0x5a0] sm:$0xff]  ;;  %v1307_v55 = vsub.f32 %v6247_v12, %v9187_v14 }
  0xb8   : > { %1360 = vmatpush.msrb.mxu2 %v6196_v11  ;;  %1407 = vmatpush.msrb.mxu3 %v6155_v9  ;;  %v6313_v14 = vand.u32 4294901760, %v413_v8 }
  0xb9   : > { %1202 = vmatpush.msrb.mxu0 %v6206_v62  ;;  %1279 = vmatpush.msrb.mxu1 %v1278_v52  ;;  %v1296_v52 = vand.u32 4294901760, %v1295_v38  ;;  %v6326_v38 = vsub.f32 %v416_v21, %v6302_v18  ;;  %v404_v21 = vld [vmem:[#allocation5 + $0x558] sm:$0xff] }
  0xba   : > { %1363 = vmatpush.msrb.mxu2 %v6210_v6  ;;  %1409 = vmatpush.msrb.mxu3 %v6170_v56 }
  0xbb   : > { %1204 = vmatpush.msrb.mxu0 %v6218_v44  ;;  %1285 = vmatpush.msrb.mxu1 %v1284_v24  ;;  %v1302_v24 = vand.u32 4294901760, %v1301_v30  ;;  %v9191_v30 = vand.u32 4294901760, %v6273_v40 }
  0xbc   : > { %1366 = vmatpush.msrb.mxu2 %v6222_v31  ;;  %1411 = vmatpush.msrb.mxu3 %v6179_v27 }
  0xbd   : > { %1206 = vmatpush.msrb.mxu0 %v6243_v3  ;;  %1291 = vmatpush.msrb.mxu1 %v1290_v47  ;;  %v1308_v47 = vand.u32 4294901760, %v1307_v55  ;;  %v1313_v42 = vsub.f32 %v6273_v40, %v9191_v30  ;;  %v6338_v30 = vsub.f32 %v413_v8, %v6313_v14 }
  0xbe   : > { %1369 = vmatpush.msrb.mxu2 %v6235_v2  ;;  %1413 = vmatpush.msrb.mxu3 %v6193_v23 }
  0xbf   : > { %1208 = vmatpush.msrb.mxu0 %v6264_v43  ;;  %1297 = vmatpush.msrb.mxu1 %v1296_v52  ;;  %v9192_v52 = vand.u32 4294901760, %v6285_v13  ;;  %v1314_v8 = vand.u32 4294901760, %v1313_v42  ;;  %v9033_v10 = vand.u32 4294901760, %v6338_v30 }
  0xc0   : > { %1372 = vmatpush.msrb.mxu2 %v6247_v12  ;;  %1415 = vmatpush.msrb.mxu3 %v6206_v62 }
  0xc1   : > { %1214 = vmatmul.f32.vlgmr.msrb.gmra.mxu0 %v6306_v50  ;;  %1303 = vmatpush.msrb.mxu1 %v1302_v24  ;;  %v1601_v55 = vsub.f32 %v6285_v13, %v9192_v52  ;;  %v1319_v50 = vsub.f32 %v6292_v58, %v9194_v29  ;;  %v1220_v24 = vsub.f32 %v6295_v22, %v6319_v53  ;;  %v6358_v29 = vand.u32 4294901760, %v404_v21  ;;  %v398_v52 = vld [vmem:[#allocation5 + $0x528] sm:$0xff] }
  0xc2   : > { %1438 = vmatpush.msra.mxu0 %v9193_v7  ;;  %1375 = vmatpush.msrb.mxu2 %v6273_v40  ;;  %v401_v7 = vld [vmem:[#allocation5 + $0x540] sm:$0xff] }
  0xc3   : > { %1417 = vmatpush.msrb.mxu3 %v6218_v44  ;;  %1309 = vmatpush.msrb.mxu1 %v1308_v47  ;;  %v1602_v41 = vand.u32 4294901760, %v1601_v55  ;;  %v9196_v47 = vand.u32 4294901760, %v6311_v28  ;;  %v6369_v19 = vand.u32 4294901760, %v1220_v24  ;;  %v9199_v55 = vand.u32 4294901760, %v6326_v38 }
  0xc4   : > { %1442 = vmatpush.msra.mxu0 %v9195_v33  ;;  %1378 = vmatpush.msrb.mxu2 %v6292_v58  ;;  %v1320_v33 = vand.u32 4294901760, %v1319_v50  ;;  %v9200_v50 = vand.u32 4294901760, %v6118_v34  ;;  %v6385_v25 = vsub.f32 %v404_v21, %v6358_v29  ;;  %v6387_v24 = vand.u32 4294901760, %v398_v52 }
  0xc5   : > { %1419 = vmatpush.msrb.mxu3 %v6243_v3  ;;  %1381 = vmatmul.f32.vlgmr.msrb.gmra.mxu2 %v6227_v54  ;;  %v1607_v42 = vsub.f32 %v6311_v28, %v9196_v47  ;;  %9198 = vst [vmem:[#allocation36_spill] sm:$0xff] %v6369_v19  ;;  %v6374_v54 = vand.u32 4294901760, %v401_v7  ;;  %v1613_v47 = vsub.f32 %v6326_v38, %v9199_v55 }
  0xc6   : > { %1446 = vmatpush.msra.mxu0 %v9197_v16  ;;  %1550 = vmatpush.msra.mxu2 %v6260_v39  ;;  %v395_v16 = vld [vmem:[#allocation5 + $0x510] sm:$0xff]  ;;  %v1619_v55 = vsub.f32 %v6338_v30, %v9033_v10  ;;  %v6410_v34 = vsub.f32 %v398_v52, %v6387_v24 }
  0xc7   : > { %1315 = vmatpush.msrb.mxu1 %v1314_v8  ;;  %1421 = vmatpush.msrb.mxu3 %v6264_v43  ;;  %v1608_v8 = vand.u32 4294901760, %v1607_v42  ;;  %v6398_v21 = vand.u32 4294901760, %v395_v16  ;;  %v1614_v42 = vand.u32 4294901760, %v1613_v47 }
  0xc8   : > { %1425 = vmatmul.f32.vlgmr.msrb.gmra.mxu3 %v6253_v57  ;;  %1450 = vmatpush.msra.mxu0 %v9200_v50  ;;  %v6396_v50 = vsub.f32 %v401_v7, %v6374_v54  ;;  %v9202_v57 = vand.u32 4294901760, %v6353_v15  ;;  %v1620_v47 = vand.u32 4294901760, %v1619_v55 }
  0xc9   : > { %1552 = vmatpush.msra.mxu2 %v6287_v46  ;;  %1603 = vmatpush.msra.mxu3 %v1602_v41  ;;  %v9201_v41 = vand.u32 4294901760, %v6128_v1  ;;  %v9203_v1 = vand.u32 4294901760, %v6145_v45  ;;  %v6423_v52 = vsub.f32 %v395_v16, %v6398_v21 }
  0xca   : > { %1321 = vmatpush.msrb.mxu1 %v1320_v33  ;;  %1222 = vmatmul.f32.gmra.mxu0 %v6369_v19  ;;  %v1625_v10 = vsub.f32 %v6353_v15, %v9202_v57  ;;  %v389_v33 = vld [vmem:[#allocation5 + $0x4e0] sm:$0xff]  ;;  %v6412_v19 = vand.u32 4294901760, %v392_v35  ;;  %v9038_v7 = vand.u32 4294901760, %v6396_v50 }
  0xcb   : > { %1323 = vmatmul.f32.vlgmr.msrb.gmra.mxu1 %v6199_v4  ;;  %1454 = vmatpush.msra.mxu0 %v9201_v41  ;;  %v386_v41 = vld [vmem:[#allocation5 + $0x4c8] sm:$0xff] }
  0xcc   : > { %1509 = vmatpush.msra.mxu1 %v6068_v48  ;;  %1554 = vmatpush.msra.mxu2 %v6302_v18  ;;  %v9204_v48 = vand.u32 4294901760, %v6372_v36  ;;  %v6425_v18 = vand.u32 4294901760, %v389_v33  ;;  %v1626_v45 = vand.u32 4294901760, %v1625_v10  ;;  %v6436_v16 = vsub.f32 %v392_v35, %v6412_v19 }
  0xcd   : > { %1609 = vmatpush.msra.mxu3 %v1608_v8  ;;  %1458 = vmatpush.msra.mxu0 %v9203_v1  ;;  %v9205_v8 = vand.u32 4294901760, %v6158_v63  ;;  %v9207_v63 = vand.u32 4294901760, %v6163_v0  ;;  %v1643_v10 = vsub.f32 %v6396_v50, %v9038_v7  ;;  %v228_v1 = vld [vmem:[%s5540_s30 + $0x18] sm:$0xff] }
  0xce   : > { %1511 = vmatpush.msra.mxu1 %v6075_v32  ;;  %1556 = vmatpush.msra.mxu2 %v6313_v14  ;;  %v1631_v57 = vsub.f32 %v6372_v36, %v9204_v48  ;;  %v9206_v32 = vand.u32 4294901760, %v6385_v25  ;;  %v6438_v48 = vand.u32 4294901760, %v386_v41  ;;  %v6449_v35 = vsub.f32 %v389_v33, %v6425_v18 }
  0xcf   : > { %1615 = vmatpush.msra.mxu3 %v1614_v42  ;;  %1386 = vmatmul.f32.gmra.mxu2 %v6295_v22  ;;  %v383_v42 = vld [vmem:[#allocation5 + $0x4b0] sm:$0xff]  ;;  %v9212_v22 = vand.u32 4294901760, %v6196_v11  ;;  %v9214_v11 = vand.u32 4294901760, %v6210_v6  ;;  %v9216_v6 = vand.u32 4294901760, %v6222_v31 }
  0xd0   : > { %1462 = vmatpush.msra.mxu0 %v9205_v8  ;;  %1513 = vmatpush.msra.mxu1 %v6081_v60  ;;  %v1637_v55 = vsub.f32 %v6385_v25, %v9206_v32  ;;  %v1632_v60 = vand.u32 4294901760, %v1631_v57  ;;  %v380_v32 = vld [vmem:[#allocation5 + $0x498] sm:$0xff]  ;;  %v9208_v57 = vand.u32 4294901760, %v6410_v34  ;;  %v6462_v33 = vsub.f32 %v386_v41, %v6438_v48  ;;  %v377_v8 = vld [vmem:[#allocation5 + $0x480] sm:$0xff] }
  0xd1   : > { %1558 = vmatpush.msra.mxu2 %v6328_v20  ;;  %1621 = vmatpush.msra.mxu3 %v1620_v47  ;;  %v6454_v47 = vand.u32 4294901760, %v383_v42  ;;  %v1666_v41 = vand.u32 4294901760, %v6449_v35 }
  0xd2   : > { %1431 = vmatmul.f32.gmra.mxu3 %v6319_v53  ;;  %1466 = vmatpush.msra.mxu0 %v9207_v63  ;;  %v1638_v0 = vand.u32 4294901760, %v1637_v55  ;;  %v1649_v63 = vsub.f32 %v6410_v34, %v9208_v57  ;;  %v6467_v53 = vand.u32 4294901760, %v380_v32  ;;  %v1644_v55 = vand.u32 4294901760, %v1643_v10 }
  0xd3   : > { %1515 = vmatpush.msra.mxu1 %v6097_v37  ;;  %1560 = vmatpush.msra.mxu2 %v6348_v49  ;;  %v9209_v37 = vand.u32 4294901760, %v6183_v59  ;;  %v9211_v57 = vand.u32 4294901760, %v6423_v52  ;;  %v6482_v59 = vand.u32 4294901760, %v377_v8  ;;  %v9213_v10 = vand.u32 4294901760, %v6436_v16 }
  0xd4   : > { %1627 = vmatpush.msra.mxu3 %v1626_v45  ;;  %1327 = vmatmul.f32.gmra.mxu1 %v6266_v51  ;;  %v6469_v45 = vand.u32 4294901760, %v228_v1 }
  0xd5   : > { %1470 = vmatpush.msra.mxu0 %v9209_v37  ;;  %1517 = vmatpush.msra.mxu1 %v6101_v61  ;;  %v1655_v7 = vsub.f32 %v6423_v52, %v9211_v57  ;;  %v6480_v61 = vsub.f32 %v383_v42, %v6454_v47  ;;  %v1661_v37 = vsub.f32 %v6436_v16, %v9213_v10  ;;  %v1672_v57 = vand.u32 4294901760, %v6462_v33 }
  0xd6   : > { %9210 = vst [vmem:[#allocation37_spill] sm:$0xff] %v6469_v45  ;;  %1562 = vmatpush.msra.mxu2 %v6358_v29  ;;  %1633 = vmatpush.msra.mxu3 %v1632_v60  ;;  %v1650_v60 = vand.u32 4294901760, %v1649_v63  ;;  %v232_v63 = vld [vmem:[%s5540_s30 + $0x38] sm:$0xff] }
  0xd7   : > { %1474 = vmatpush.msra.mxu0 %v9212_v22  ;;  %1519 = vmatpush.msra.mxu1 %v6115_v17  ;;  %v6493_v22 = vsub.f32 %v380_v32, %v6467_v53  ;;  %v6496_v17 = vsub.f32 %v228_v1, %v6469_v45  ;;  %v1656_v42 = vand.u32 4294901760, %v1655_v7  ;;  %v6507_v32 = vsub.f32 %v377_v8, %v6482_v59 }
  0xd8   : > { %1564 = vmatpush.msra.mxu2 %v6374_v54  ;;  %1639 = vmatpush.msra.mxu3 %v1638_v0  ;;  %v1667_v0 = vsub.f32 %v6449_v35, %v1666_v41  ;;  %v1662_v1 = vand.u32 4294901760, %v1661_v37  ;;  %v1673_v7 = vsub.f32 %v6462_v33, %v1672_v57  ;;  %v6529_v10 = vand.u32 4294901760, %v232_v63 }
  0xd9   : > { %1478 = vmatpush.msra.mxu0 %v9214_v11  ;;  %1521 = vmatpush.msra.mxu1 %v6132_v5  ;;  %9215 = vst [vmem:[#allocation38_spill] sm:$0xff] %v6496_v17  ;;  %v1678_v5 = vand.u32 4294901760, %v6480_v61  ;;  %v6519_v31 = vand.u32 4294901760, %v6496_v17  ;;  %v9221_v11 = vand.u32 4294901760, %v6273_v40 }
  0xda   : > { %1566 = vmatpush.msra.mxu2 %v6387_v24  ;;  %1645 = vmatpush.msra.mxu3 %v1644_v55  ;;  %v9217_v55 = vand.u32 4294901760, %v6235_v2  ;;  %v1668_v8 = vand.u32 4294901760, %v1667_v0  ;;  %9220 = vst [vmem:[#allocation40_spill] sm:$0xff] %v6529_v10  ;;  %v1674_v37 = vand.u32 4294901760, %v1673_v7  ;;  %v9227_v7 = vand.u32 4294901760, %v6311_v28 }
  0xdb   : > { %1482 = vmatpush.msra.mxu0 %v9216_v6  ;;  %1523 = vmatpush.msra.mxu1 %v6139_v26  ;;  %v1684_v26 = vand.u32 4294901760, %v6493_v22  ;;  %9218 = vst [vmem:[#allocation39_spill] sm:$0xff] %v6519_v31  ;;  %v1679_v2 = vsub.f32 %v6480_v61, %v1678_v5 }
  0xdc   : > { %1568 = vmatpush.msra.mxu2 %v6398_v21  ;;  %1651 = vmatpush.msra.mxu3 %v1650_v60  ;;  %v9219_v60 = vand.u32 4294901760, %v6247_v12  ;;  %v1584_v12 = vsub.f32 %v6496_v17, %v6519_v31 }
  0xdd   : > { %1486 = vmatpush.msra.mxu0 %v9217_v55  ;;  %1525 = vmatpush.msra.mxu1 %v6155_v9  ;;  %v1690_v9 = vand.u32 4294901760, %v6507_v32  ;;  %v1680_v0 = vand.u32 4294901760, %v1679_v2 }
  0xde   : > { %1570 = vmatpush.msra.mxu2 %v6412_v19  ;;  %1657 = vmatpush.msra.mxu3 %v1656_v42  ;;  %v9222_v42 = vand.u32 4294901760, %v6292_v58  ;;  %v6553_v58 = vand.u32 4294901760, %v1584_v12 }
  0xdf   : > { %1490 = vmatpush.msra.mxu0 %v9219_v60  ;;  %1527 = vmatpush.msra.mxu1 %v6170_v56  ;;  %v1685_v56 = vsub.f32 %v6493_v22, %v1684_v26  ;;  %v1691_v40 = vsub.f32 %v6507_v32, %v1690_v9 }
  0xe0   : > { %1572 = vmatpush.msra.mxu2 %v6425_v18  ;;  %1663 = vmatpush.msra.mxu3 %v1662_v1  ;;  %9224 = vst [vmem:[#allocation42_spill] sm:$0xff] %v6553_v58 }
  0xe1   : > { %1494 = vmatpush.msra.mxu0 %v9221_v11  ;;  %1529 = vmatpush.msra.mxu1 %v6179_v27  ;;  %v6548_v27 = vsub.f32 %v232_v63, %v6529_v10  ;;  %v1686_v6 = vand.u32 4294901760, %v1685_v56 }
  0xe2   : > { %1574 = vmatpush.msra.mxu2 %v6438_v48  ;;  %1669 = vmatpush.msra.mxu3 %v1668_v8 }
  0xe3   : > { %1498 = vmatpush.msra.mxu0 %v9222_v42  ;;  %1531 = vmatpush.msra.mxu1 %v6193_v23  ;;  %9223 = vst [vmem:[#allocation41_spill] sm:$0xff] %v6548_v27  ;;  %v1692_v23 = vand.u32 4294901760, %v1691_v40  ;;  %v6559_v1 = vand.u32 4294901760, %v6548_v27  ;;  %v249_v40 = vld [vmem:[#allocation5 + $0x80] sm:$0xff] }
  0xe4   : > { %1576 = vmatpush.msra.mxu2 %v6454_v47  ;;  %1675 = vmatpush.msra.mxu3 %v1674_v37 }
  0xe5   : > { %1500 = vmatmul.f32.vlgmr.msra.gmra.mxu0 %v6199_v4  ;;  %1533 = vmatpush.msra.mxu1 %v6206_v62  ;;  %9225 = vst [vmem:[#allocation43_spill] sm:$0xff] %v6559_v1  ;;  %v9226_v62 = vand.u32 4294901760, %v6285_v13 }
  0xe6   : > { %1705 = vmatpush.msrb.mxu0 %v6285_v13  ;;  %1578 = vmatpush.msra.mxu2 %v6467_v53  ;;  %v9229_v13 = vand.u32 4294901760, %v6326_v38 }
  0xe7   : > { %1681 = vmatpush.msra.mxu3 %v1680_v0  ;;  %1535 = vmatpush.msra.mxu1 %v6218_v44  ;;  %v1592_v44 = vsub.f32 %v6548_v27, %v6559_v1 }
  0xe8   : > { %1708 = vmatpush.msrb.mxu0 %v6311_v28  ;;  %1580 = vmatpush.msra.mxu2 %v6482_v59  ;;  %v9230_v28 = vand.u32 4294901760, %v6338_v30 }
  0xe9   : > { %1687 = vmatpush.msra.mxu3 %v1686_v6  ;;  %1586 = vmatmul.f32.vlgmr.msra.gmra.mxu2 %v6553_v58 }
  0xea   : > { %1711 = vmatpush.msrb.mxu0 %v6326_v38  ;;  %1810 = vmatpush.msrb.mxu2 %v9226_v62  ;;  %v9234_v38 = vand.u32 4294901760, %v6385_v25 }
  0xeb   : > { %1537 = vmatpush.msra.mxu1 %v6243_v3  ;;  %1693 = vmatpush.msra.mxu3 %v1692_v23  ;;  %v6579_v3 = vand.u32 4294901760, %v1592_v44 }
  0xec   : > { %1695 = vmatmul.f32.vlgmr.msra.gmra.mxu3 %v6469_v45  ;;  %1714 = vmatpush.msrb.mxu0 %v6338_v30  ;;  %v9237_v30 = vand.u32 4294901760, %v6423_v52 }
  0xed   : > { %1814 = vmatpush.msrb.mxu2 %v9227_v7  ;;  %1881 = vmatpush.msrb.mxu3 %v6260_v39  ;;  %9228 = vst [vmem:[#allocation44_spill] sm:$0xff] %v6579_v3  ;;  %v246_v7 = vld [vmem:[#allocation5 + $0x68] sm:$0xff] }
  0xee   : > { %1539 = vmatpush.msra.mxu1 %v6264_v43  ;;  %1504 = vmatmul.f32.gmra.mxu0 %v6266_v51  ;;  %v9231_v43 = vld [vmem:[#allocation33_spill] sm:$0xff] }
  0xef   : > { %1541 = vmatmul.f32.vlgmr.msra.gmra.mxu1 %v6199_v4  ;;  %1717 = vmatpush.msrb.mxu0 %v6353_v15 }
  0xf0   : > { %1763 = vmatpush.msrb.mxu1 %v6260_v39  ;;  %1818 = vmatpush.msrb.mxu2 %v9229_v13  ;;  %v9232_v39 = vand.u32 4294901760, %v6353_v15  ;;  %v6735_v13 = vand.u32 4294901760, %v249_v40 }
  0xf1   : > { %1883 = vmatpush.msrb.mxu3 %v6287_v46  ;;  %1720 = vmatpush.msrb.mxu0 %v6372_v36 }
  0xf2   : > { %1765 = vmatpush.msrb.mxu1 %v6287_v46  ;;  %1822 = vmatpush.msrb.mxu2 %v9230_v28  ;;  %v9233_v46 = vand.u32 4294901760, %v6372_v36  ;;  %v9235_v36 = vand.u32 4294901760, %v6396_v50 }
  0xf3   : > { %1885 = vmatpush.msrb.mxu3 %v9231_v43  ;;  %1594 = vmatmul.f32.gmra.mxu2 %v6579_v3 }
  0xf4   : > { %1723 = vmatpush.msrb.mxu0 %v6385_v25  ;;  %1767 = vmatpush.msrb.mxu1 %v9231_v43  ;;  %v9238_v25 = vand.u32 4294901760, %v6436_v16 }
  0xf5   : > { %1826 = vmatpush.msrb.mxu2 %v9232_v39  ;;  %1887 = vmatpush.msrb.mxu3 %v6313_v14 }
  0xf6   : > { %1699 = vmatmul.f32.gmra.mxu3 %v6529_v10  ;;  %1726 = vmatpush.msrb.mxu0 %v6396_v50  ;;  %v270_v50 = vld [vmem:[#allocation5 + $0x128] sm:$0xff] }
  0xf7   : > { %1769 = vmatpush.msrb.mxu1 %v6313_v14  ;;  %1830 = vmatpush.msrb.mxu2 %v9233_v46  ;;  %v279_v14 = vld [vmem:[#allocation5 + $0x170] sm:$0xff] }
  0xf8   : > { %1889 = vmatpush.msrb.mxu3 %v6328_v20  ;;  %1545 = vmatmul.f32.gmra.mxu1 %v6266_v51  ;;  %v6623_v15 = vand.u32 4294901760, %v279_v14  ;;  %v243_v46 = vld [vmem:[#allocation5 + $0x50] sm:$0xff]  ;;  %v294_v51 = vld [vmem:[#allocation5 + $0x1e8] sm:$0xff] }
  0xf9   : > { %1729 = vmatpush.msrb.mxu0 %v6410_v34  ;;  %1771 = vmatpush.msrb.mxu1 %v6328_v20  ;;  %v9236_v20 = vand.u32 4294901760, %v6410_v34 }
  0xfa   : > { %1834 = vmatpush.msrb.mxu2 %v9234_v38  ;;  %1891 = vmatpush.msrb.mxu3 %v6348_v49 }
  0xfb   : > { %1732 = vmatpush.msrb.mxu0 %v6423_v52  ;;  %1773 = vmatpush.msrb.mxu1 %v6348_v49  ;;  %v276_v49 = vld [vmem:[#allocation5 + $0x158] sm:$0xff]  ;;  %v267_v52 = vld [vmem:[#allocation5 + $0x110] sm:$0xff] }
  0xfc   : > { %1838 = vmatpush.msrb.mxu2 %v9235_v36  ;;  %1893 = vmatpush.msrb.mxu3 %v6358_v29  ;;  %v6630_v34 = vand.u32 4294901760, %v276_v49 }
  0xfd   : > { %1735 = vmatpush.msrb.mxu0 %v6436_v16  ;;  %1775 = vmatpush.msrb.mxu1 %v6358_v29  ;;  %v273_v29 = vld [vmem:[#allocation5 + $0x140] sm:$0xff]  ;;  %v6652_v16 = vand.u32 4294901760, %v270_v50 }
  0xfe   : > { %1842 = vmatpush.msrb.mxu2 %v9236_v20  ;;  %1895 = vmatpush.msrb.mxu3 %v6374_v54 }
  0xff   : > { %1738 = vmatpush.msrb.mxu0 %v6449_v35  ;;  %1777 = vmatpush.msrb.mxu1 %v6374_v54  ;;  %v6637_v54 = vand.u32 4294901760, %v273_v29 }
 0x100   : > { %1846 = vmatpush.msrb.mxu2 %v9237_v30  ;;  %1897 = vmatpush.msrb.mxu3 %v6387_v24  ;;  %v240_v30 = vld [vmem:[#allocation5 + $0x38] sm:$0xff] }
 0x101   : > { %1741 = vmatpush.msrb.mxu0 %v6462_v33  ;;  %1779 = vmatpush.msrb.mxu1 %v6387_v24  ;;  %v6640_v24 = vsub.f32 %v279_v14, %v6623_v15  ;;  %v6661_v33 = vsub.f32 %v273_v29, %v6637_v54  ;;  %v6750_v14 = vand.u32 4294901760, %v246_v7 }
 0x102   : > { %1850 = vmatpush.msrb.mxu2 %v9238_v25  ;;  %1899 = vmatpush.msrb.mxu3 %v6398_v21  ;;  %v6759_v25 = vand.u32 4294901760, %v243_v46 }
 0x103   : > { %1744 = vmatpush.msrb.mxu0 %v6480_v61  ;;  %1781 = vmatpush.msrb.mxu1 %v6398_v21  ;;  %v6648_v21 = vsub.f32 %v276_v49, %v6630_v34  ;;  %v9055_v35 = vand.u32 4294901760, %v6640_v24  ;;  %v261_v61 = vld [vmem:[#allocation5 + $0xe0] sm:$0xff] }
 0x104   : > { %1854 = vmatpush.msrb.mxu2 %v1666_v41  ;;  %1901 = vmatpush.msrb.mxu3 %v6412_v19  ;;  %v264_v41 = vld [vmem:[#allocation5 + $0xf8] sm:$0xff]  ;;  %v6688_v55 = vand.u32 4294901760, %v261_v61 }
 0x105   : > { %1747 = vmatpush.msrb.mxu0 %v6493_v22  ;;  %1783 = vmatpush.msrb.mxu1 %v6412_v19  ;;  %v6657_v19 = vand.u32 4294901760, %v267_v52  ;;  %v9053_v22 = vand.u32 4294901760, %v6661_v33 }
 0x106   : > { %1858 = vmatpush.msrb.mxu2 %v1672_v57  ;;  %1903 = vmatpush.msrb.mxu3 %v6425_v18  ;;  %v6671_v57 = vand.u32 4294901760, %v264_v41  ;;  %v6714_v12 = vsub.f32 %v261_v61, %v6688_v55 }
 0x107   : > { %1750 = vmatpush.msrb.mxu0 %v6507_v32  ;;  %1785 = vmatpush.msrb.mxu1 %v6425_v18  ;;  %v9054_v18 = vand.u32 4294901760, %v6648_v21  ;;  %v6684_v63 = vsub.f32 %v267_v52, %v6657_v19  ;;  %v1985_v11 = vsub.f32 %v6661_v33, %v9053_v22  ;;  %v6763_v52 = vsub.f32 %v249_v40, %v6735_v13  ;;  %v312_v22 = vld [vmem:[#allocation5 + $0x278] sm:$0xff] }
 0x108   : > { %1862 = vmatpush.msrb.mxu2 %v1678_v5  ;;  %1905 = vmatpush.msrb.mxu3 %v6438_v48  ;;  %v6674_v5 = vsub.f32 %v270_v50, %v6652_v16  ;;  %v6701_v2 = vsub.f32 %v264_v41, %v6671_v57  ;;  %v9046_v28 = vand.u32 4294901760, %v6714_v12  ;;  %v6785_v40 = vsub.f32 %v243_v46, %v6759_v25 }
 0x109   : > { %1753 = vmatmul.f32.vlgmr.msrb.gmra.mxu0 %v6496_v17  ;;  %1787 = vmatpush.msrb.mxu1 %v6438_v48  ;;  %v1973_v48 = vsub.f32 %v6640_v24, %v9055_v35  ;;  %v1979_v32 = vsub.f32 %v6648_v21, %v9054_v18  ;;  %v6867_v18 = vand.u32 4294901760, %v312_v22  ;;  %v303_v17 = vld [vmem:[#allocation5 + $0x230] sm:$0xff] }
 0x10a   : > { %1922 = vmatpush.msra.mxu0 %v6623_v15  ;;  %1866 = vmatpush.msrb.mxu2 %v1684_v26  ;;  %v255_v26 = vld [vmem:[#allocation5 + $0xb0] sm:$0xff]  ;;  %v9051_v60 = vand.u32 4294901760, %v6674_v5  ;;  %v9048_v23 = vand.u32 4294901760, %v6701_v2  ;;  %v2009_v29 = vsub.f32 %v6714_v12, %v9046_v28  ;;  %v6908_v58 = vand.u32 4294901760, %v303_v17 }
 0x10b   : > { %1907 = vmatpush.msrb.mxu3 %v6454_v47  ;;  %1789 = vmatpush.msrb.mxu1 %v6454_v47  ;;  %v258_v47 = vld [vmem:[#allocation5 + $0xc8] sm:$0xff]  ;;  %v1974_v37 = vand.u32 4294901760, %v1973_v48  ;;  %v6711_v56 = vand.u32 4294901760, %v255_v26  ;;  %v1980_v42 = vand.u32 4294901760, %v1979_v32  ;;  %v6775_v32 = vsub.f32 %v246_v7, %v6750_v14  ;;  %v324_v7 = vld [vmem:[#allocation5 + $0x2d8] sm:$0xff] }
 0x10c   : > { %1924 = vmatpush.msra.mxu0 %v6630_v34  ;;  %1870 = vmatpush.msrb.mxu2 %v1690_v9  ;;  %v6697_v8 = vand.u32 4294901760, %v258_v47  ;;  %v252_v9 = vld [vmem:[#allocation5 + $0x98] sm:$0xff]  ;;  %v1991_v6 = vsub.f32 %v6674_v5, %v9051_v60  ;;  %v2003_v36 = vsub.f32 %v6701_v2, %v9048_v23 }
 0x10d   : > { %1909 = vmatpush.msrb.mxu3 %v6467_v53  ;;  %1872 = vmatmul.f32.vlgmr.msrb.gmra.mxu2 %v6469_v45  ;;  %v6718_v0 = vand.u32 4294901760, %v252_v9  ;;  %v6739_v43 = vsub.f32 %v255_v26, %v6711_v56  ;;  %v237_v26 = vld [vmem:[#allocation5 + $0x20] sm:$0xff] }
 0x10e   : > { %1926 = vmatpush.msra.mxu0 %v6637_v54  ;;  %2077 = vmatpush.msra.mxu2 %v6640_v24  ;;  %v6727_v62 = vsub.f32 %v258_v47, %v6697_v8  ;;  %v1992_v38 = vand.u32 4294901760, %v1991_v6  ;;  %v2004_v61 = vand.u32 4294901760, %v2003_v36  ;;  %v6772_v47 = vand.u32 4294901760, %v240_v30  ;;  %v234_v6 = vld [vmem:[#allocation5 + $0x8] sm:$0xff] }
 0x10f   : > { %1791 = vmatpush.msrb.mxu1 %v6467_v53  ;;  %1911 = vmatpush.msrb.mxu3 %v6482_v59  ;;  %v9049_v53 = vand.u32 4294901760, %v6684_v63  ;;  %v6743_v39 = vsub.f32 %v252_v9, %v6718_v0  ;;  %v9044_v50 = vand.u32 4294901760, %v6739_v43  ;;  %v327_v9 = vld [vmem:[#allocation5 + $0x2f0] sm:$0xff]  ;;  %v9050_v36 = vand.u32 4294901760, %v6775_v32 }
 0x110   : > { %1913 = vmatmul.f32.vlgmr.msrb.gmra.mxu3 %v6469_v45  ;;  %1928 = vmatpush.msra.mxu0 %v6652_v16  ;;  %v9045_v20 = vand.u32 4294901760, %v6727_v62  ;;  %v6797_v46 = vsub.f32 %v240_v30, %v6772_v47  ;;  %v9052_v30 = vand.u32 4294901760, %v6785_v40  ;;  %v300_v45 = vld [vmem:[#allocation5 + $0x218] sm:$0xff] }
 0x111   : > { %2080 = vmatpush.msra.mxu2 %v6648_v21  ;;  %2135 = vmatpush.msra.mxu3 %v6623_v15  ;;  %v1997_v44 = vsub.f32 %v6684_v63, %v9049_v53  ;;  %v9043_v41 = vand.u32 4294901760, %v6743_v39  ;;  %v318_v53 = vld [vmem:[#allocation5 + $0x2a8] sm:$0xff] }
 0x112   : > { %1793 = vmatpush.msrb.mxu1 %v6482_v59  ;;  %1758 = vmatmul.f32.gmra.mxu0 %v6548_v27  ;;  %v1986_v59 = vand.u32 4294901760, %v1985_v11  ;;  %v2015_v48 = vsub.f32 %v6727_v62, %v9045_v20  ;;  %v2021_v11 = vsub.f32 %v6739_v43, %v9044_v50 }
 0x113   : > { %1797 = vmatmul.f32.vlgmr.msrb.gmra.mxu1 %v6519_v31  ;;  %1930 = vmatpush.msra.mxu0 %v6657_v19  ;;  %v1998_v49 = vand.u32 4294901760, %v1997_v44  ;;  %v6792_v44 = vand.u32 4294901760, %v237_v26  ;;  %v306_v31 = vld [vmem:[#allocation5 + $0x248] sm:$0xff] }
 0x114   : > { %1975 = vmatpush.msra.mxu1 %v1974_v37  ;;  %2083 = vmatpush.msra.mxu2 %v6661_v33  ;;  %v2010_v37 = vand.u32 4294901760, %v2009_v29  ;;  %v6803_v29 = vand.u32 4294901760, %v234_v6  ;;  %v2022_v50 = vand.u32 4294901760, %v2021_v11  ;;  %v9056_v11 = vand.u32 4294901760, %v6797_v46 }
 0x115   : > { %2137 = vmatpush.msra.mxu3 %v6630_v34  ;;  %1932 = vmatpush.msra.mxu0 %v6671_v57  ;;  %v6815_v28 = vsub.f32 %v237_v26, %v6792_v44  ;;  %v6895_v3 = vand.u32 4294901760, %v306_v31 }
 0x116   : > { %1981 = vmatpush.msra.mxu1 %v1980_v42  ;;  %2086 = vmatpush.msra.mxu2 %v6674_v5  ;;  %v9047_v42 = vand.u32 4294901760, %v6763_v52  ;;  %v6830_v26 = vsub.f32 %v234_v6, %v6803_v29  ;;  %v6842_v6 = vand.u32 4294901760, %v318_v53 }
 0x117   : > { %2139 = vmatpush.msra.mxu3 %v6637_v54  ;;  %1876 = vmatmul.f32.gmra.mxu2 %v6529_v10  ;;  %v9061_v60 = vand.u32 4294901760, %v6815_v28 }
 0x118   : > { %1934 = vmatpush.msra.mxu0 %v6688_v55  ;;  %1987 = vmatpush.msra.mxu1 %v1986_v59  ;;  %v2027_v59 = vsub.f32 %v6743_v39, %v9043_v41  ;;  %v321_v41 = vld [vmem:[#allocation5 + $0x2c0] sm:$0xff] }
 0x119   : > { %2089 = vmatpush.msra.mxu2 %v6684_v63  ;;  %2141 = vmatpush.msra.mxu3 %v6652_v16  ;;  %v6825_v23 = vand.u32 4294901760, %v321_v41 }
 0x11a   : > { %1917 = vmatmul.f32.gmra.mxu3 %v6529_v10  ;;  %1936 = vmatpush.msra.mxu0 %v6697_v8  ;;  %v2028_v20 = vand.u32 4294901760, %v2027_v59 }
 0x11b   : > { %1993 = vmatpush.msra.mxu1 %v1992_v38  ;;  %2092 = vmatpush.msra.mxu2 %v6701_v2  ;;  %v2016_v38 = vand.u32 4294901760, %v2015_v48  ;;  %v6810_v48 = vand.u32 4294901760, %v324_v7 }
 0x11c   : > { %2143 = vmatpush.msra.mxu3 %v6657_v19  ;;  %1803 = vmatmul.f32.gmra.mxu1 %v6559_v1 }
 0x11d   : > { %1938 = vmatpush.msra.mxu0 %v6711_v56  ;;  %1999 = vmatpush.msra.mxu1 %v1998_v49  ;;  %v6799_v49 = vand.u32 4294901760, %v327_v9 }
 0x11e   : > { %2095 = vmatpush.msra.mxu2 %v6714_v12  ;;  %2145 = vmatpush.msra.mxu3 %v6671_v57 }
 0x11f   : > { %1940 = vmatpush.msra.mxu0 %v6718_v0  ;;  %2005 = vmatpush.msra.mxu1 %v2004_v61  ;;  %v2033_v61 = vsub.f32 %v6763_v52, %v9047_v42  ;;  %v6823_v42 = vsub.f32 %v327_v9, %v6799_v49  ;;  %v6837_v9 = vsub.f32 %v324_v7, %v6810_v48 }
 0x120   : > { %2098 = vmatpush.msra.mxu2 %v6727_v62  ;;  %2147 = vmatpush.msra.mxu3 %v6688_v55  ;;  %v6865_v7 = vsub.f32 %v318_v53, %v6842_v6  ;;  %v9240_v53 = vand.u32 4294901760, %v6830_v26 }
 0x121   : > { %1942 = vmatpush.msra.mxu0 %v6735_v13  ;;  %2011 = vmatpush.msra.mxu1 %v2010_v37  ;;  %v2039_v37 = vsub.f32 %v6775_v32, %v9050_v36  ;;  %v2034_v59 = vand.u32 4294901760, %v2033_v61  ;;  %v315_v36 = vld [vmem:[#allocation5 + $0x290] sm:$0xff]  ;;  %v2051_v61 = vsub.f32 %v6797_v46, %v9056_v11  ;;  %v309_v11 = vld [vmem:[#allocation5 + $0x260] sm:$0xff] }
 0x122   : > { %2101 = vmatpush.msra.mxu2 %v6739_v43  ;;  %2149 = vmatpush.msra.mxu3 %v6697_v8  ;;  %v6855_v35 = vand.u32 4294901760, %v315_v36 }
 0x123   : > { %1944 = vmatpush.msra.mxu0 %v6750_v14  ;;  %2017 = vmatpush.msra.mxu1 %v2016_v38  ;;  %v2045_v38 = vsub.f32 %v6785_v40, %v9052_v30  ;;  %v6850_v30 = vsub.f32 %v321_v41, %v6825_v23  ;;  %v2057_v41 = vsub.f32 %v6815_v28, %v9061_v60 }
 0x124   : > { %2104 = vmatpush.msra.mxu2 %v6743_v39  ;;  %2151 = vmatpush.msra.mxu3 %v6711_v56  ;;  %v2063_v60 = vsub.f32 %v6830_v26, %v9240_v53  ;;  %v6880_v27 = vsub.f32 %v315_v36, %v6855_v35  ;;  %v6893_v36 = vsub.f32 %v312_v22, %v6867_v18  ;;  %v6921_v22 = vand.u32 4294901760, %v300_v45 }
 0x125   : > { %1946 = vmatpush.msra.mxu0 %v6759_v25  ;;  %2023 = vmatpush.msra.mxu1 %v2022_v50  ;;  %v2040_v50 = vand.u32 4294901760, %v2039_v37  ;;  %v2058_v10 = vand.u32 4294901760, %v2057_v41 }
 0x126   : > { %2107 = vmatpush.msra.mxu2 %v6763_v52  ;;  %2153 = vmatpush.msra.mxu3 %v6718_v0  ;;  %v2064_v41 = vand.u32 4294901760, %v2063_v60 }
 0x127   : > { %1948 = vmatpush.msra.mxu0 %v6772_v47  ;;  %2029 = vmatpush.msra.mxu1 %v2028_v20  ;;  %v2046_v20 = vand.u32 4294901760, %v2045_v38  ;;  %v9239_v38 = vand.u32 4294901760, %v6823_v42 }
 0x128   : > { %2110 = vmatpush.msra.mxu2 %v6775_v32  ;;  %2155 = vmatpush.msra.mxu3 %v6735_v13 }
 0x129   : > { %1950 = vmatpush.msra.mxu0 %v6792_v44  ;;  %2035 = vmatpush.msra.mxu1 %v2034_v59  ;;  %v2052_v59 = vand.u32 4294901760, %v2051_v61  ;;  %v2345_v37 = vsub.f32 %v6823_v42, %v9239_v38  ;;  %v9241_v61 = vand.u32 4294901760, %v6640_v24  ;;  %v9242_v38 = vand.u32 4294901760, %v6837_v9 }
 0x12a   : > { %2113 = vmatpush.msra.mxu2 %v6785_v40  ;;  %2157 = vmatpush.msra.mxu3 %v6750_v14  ;;  %v9243_v24 = vand.u32 4294901760, %v6648_v21  ;;  %v9245_v21 = vand.u32 4294901760, %v6661_v33  ;;  %v9247_v33 = vand.u32 4294901760, %v6674_v5  ;;  %v9249_v5 = vand.u32 4294901760, %v6684_v63 }
 0x12b   : > { %1952 = vmatpush.msra.mxu0 %v6803_v29  ;;  %2041 = vmatpush.msra.mxu1 %v2040_v50  ;;  %v6882_v50 = vand.u32 4294901760, %v309_v11  ;;  %v2351_v1 = vsub.f32 %v6837_v9, %v9242_v38  ;;  %v6949_v63 = vand.u32 4294901760, %v294_v51 }
 0x12c   : > { %2116 = vmatpush.msra.mxu2 %v6797_v46  ;;  %2159 = vmatpush.msra.mxu3 %v6759_v25 }
 0x12d   : > { %2182 = vmatpush.msrb.mxu0 %v9241_v61  ;;  %2047 = vmatpush.msra.mxu1 %v2046_v20  ;;  %v2346_v20 = vand.u32 4294901760, %v2345_v37  ;;  %v9244_v61 = vand.u32 4294901760, %v6850_v30  ;;  %v6906_v53 = vsub.f32 %v309_v11, %v6882_v50  ;;  %v2352_v37 = vand.u32 4294901760, %v2351_v1 }
 0x12e   : > { %2119 = vmatpush.msra.mxu2 %v6815_v28  ;;  %2161 = vmatpush.msra.mxu3 %v6772_v47  ;;  %v6919_v11 = vsub.f32 %v306_v31, %v6895_v3 }
 0x12f   : > { %2186 = vmatpush.msrb.mxu0 %v9243_v24  ;;  %2053 = vmatpush.msra.mxu1 %v2052_v59  ;;  %v2357_v38 = vsub.f32 %v6850_v30, %v9244_v61  ;;  %v297_v59 = vld [vmem:[#allocation5 + $0x200] sm:$0xff]  ;;  %v9246_v24 = vand.u32 4294901760, %v6865_v7  ;;  %v6931_v61 = vsub.f32 %v303_v17, %v6908_v58  ;;  %v6944_v17 = vsub.f32 %v300_v45, %v6921_v22 }
 0x130   : > { %2122 = vmatpush.msra.mxu2 %v6830_v26  ;;  %2163 = vmatpush.msra.mxu3 %v6792_v44  ;;  %v6933_v31 = vand.u32 4294901760, %v297_v59 }
 0x131   : > { %2190 = vmatpush.msrb.mxu0 %v9245_v21  ;;  %2059 = vmatpush.msra.mxu1 %v2058_v10  ;;  %v2363_v60 = vsub.f32 %v6865_v7, %v9246_v24  ;;  %v2358_v1 = vand.u32 4294901760, %v2357_v38  ;;  %v9248_v10 = vand.u32 4294901760, %v6880_v27  ;;  %v2380_v24 = vand.u32 4294901760, %v6906_v53 }
 0x132   : > { %2294 = vmatpush.msrb.mxu2 %v6799_v49  ;;  %2165 = vmatpush.msra.mxu3 %v6803_v29  ;;  %v9250_v38 = vand.u32 4294901760, %v6893_v36  ;;  %v6957_v45 = vsub.f32 %v297_v59, %v6933_v31  ;;  %v9253_v59 = vand.u32 4294901760, %v6727_v62  ;;  %v9254_v62 = vand.u32 4294901760, %v6739_v43 }
 0x133   : > { %2194 = vmatpush.msrb.mxu0 %v9247_v33  ;;  %2065 = vmatpush.msra.mxu1 %v2064_v41  ;;  %v2369_v21 = vsub.f32 %v6880_v27, %v9248_v10  ;;  %v9076_v33 = vand.u32 4294901760, %v6919_v11  ;;  %v9251_v10 = vand.u32 4294901760, %v6701_v2  ;;  %v9252_v2 = vand.u32 4294901760, %v6714_v12  ;;  %v285_v12 = vld [vmem:[#allocation5 + $0x1a0] sm:$0xff] }
 0x134   : > { %2296 = vmatpush.msrb.mxu2 %v6810_v48  ;;  %2347 = vmatpush.msrb.mxu3 %v2346_v20  ;;  %v2364_v20 = vand.u32 4294901760, %v2363_v60  ;;  %v2375_v41 = vsub.f32 %v6893_v36, %v9250_v38  ;;  %v2381_v60 = vsub.f32 %v6906_v53, %v2380_v24  ;;  %v2398_v38 = vand.u32 4294901760, %v6944_v17 }
 0x135   : > { %2198 = vmatpush.msrb.mxu0 %v9249_v5  ;;  %2253 = vmatpush.msrb.mxu1 %v6623_v15  ;;  %v291_v15 = vld [vmem:[#allocation5 + $0x1d0] sm:$0xff]  ;;  %v9077_v5 = vand.u32 4294901760, %v6931_v61 }
 0x136   : > { %2298 = vmatpush.msrb.mxu2 %v6825_v23  ;;  %2353 = vmatpush.msrb.mxu3 %v2352_v37  ;;  %v2370_v37 = vand.u32 4294901760, %v2369_v21  ;;  %v2387_v21 = vsub.f32 %v6919_v11, %v9076_v33 }
 0x137   : > { %2202 = vmatpush.msrb.mxu0 %v9251_v10  ;;  %2255 = vmatpush.msrb.mxu1 %v6630_v34  ;;  %v288_v34 = vld [vmem:[#allocation5 + $0x1b8] sm:$0xff]  ;;  %v6967_v10 = vand.u32 4294901760, %v291_v15 }
 0x138   : > { %2300 = vmatpush.msrb.mxu2 %v6842_v6  ;;  %2359 = vmatpush.msrb.mxu3 %v2358_v1  ;;  %v2376_v1 = vand.u32 4294901760, %v2375_v41  ;;  %v2393_v41 = vsub.f32 %v6931_v61, %v9077_v5  ;;  %v6980_v33 = vand.u32 4294901760, %v288_v34  ;;  %v9255_v5 = vand.u32 4294901760, %v6743_v39 }
 0x139   : > { %2206 = vmatpush.msrb.mxu0 %v9252_v2  ;;  %2257 = vmatpush.msrb.mxu1 %v6637_v54  ;;  %v6973_v54 = vsub.f32 %v294_v51, %v6949_v63  ;;  %v2404_v2 = vand.u32 4294901760, %v6957_v45  ;;  %v2388_v51 = vand.u32 4294901760, %v2387_v21  ;;  %v9256_v21 = vand.u32 4294901760, %v6763_v52 }
 0x13a   : > { %2302 = vmatpush.msrb.mxu2 %v6855_v35  ;;  %2365 = vmatpush.msrb.mxu3 %v2364_v20  ;;  %v2382_v20 = vand.u32 4294901760, %v2381_v60  ;;  %v6992_v60 = vand.u32 4294901760, %v285_v12  ;;  %v2394_v43 = vand.u32 4294901760, %v2393_v41  ;;  %v9257_v41 = vand.u32 4294901760, %v6775_v32 }
 0x13b   : > { %2210 = vmatpush.msrb.mxu0 %v9253_v59  ;;  %2259 = vmatpush.msrb.mxu1 %v6652_v16  ;;  %v2399_v16 = vsub.f32 %v6944_v17, %v2398_v38  ;;  %v282_v59 = vld [vmem:[#allocation5 + $0x188] sm:$0xff] }
 0x13c   : > { %2304 = vmatpush.msrb.mxu2 %v6867_v18  ;;  %2371 = vmatpush.msrb.mxu3 %v2370_v37  ;;  %v6990_v37 = vsub.f32 %v291_v15, %v6967_v10  ;;  %v7003_v15 = vsub.f32 %v288_v34, %v6980_v33  ;;  %v7008_v39 = vand.u32 4294901760, %v282_v59 }
 0x13d   : > { %2214 = vmatpush.msrb.mxu0 %v9254_v62  ;;  %2261 = vmatpush.msrb.mxu1 %v6657_v19  ;;  %v2410_v19 = vand.u32 4294901760, %v6973_v54  ;;  %v9258_v62 = vand.u32 4294901760, %v6785_v40 }
 0x13e   : > { %2306 = vmatpush.msrb.mxu2 %v6882_v50  ;;  %2377 = vmatpush.msrb.mxu3 %v2376_v1  ;;  %v2405_v1 = vsub.f32 %v6957_v45, %v2404_v2  ;;  %v2422_v34 = vand.u32 4294901760, %v7003_v15  ;;  %v7027_v32 = vsub.f32 %v282_v59, %v7008_v39  ;;  %v9261_v59 = vand.u32 4294901760, %v6815_v28 }
 0x13f   : > { %2218 = vmatpush.msrb.mxu0 %v9255_v5  ;;  %2263 = vmatpush.msrb.mxu1 %v6671_v57  ;;  %v2400_v57 = vand.u32 4294901760, %v2399_v16  ;;  %v2416_v5 = vand.u32 4294901760, %v6990_v37  ;;  %v9260_v16 = vld [vmem:[#allocation14_spill] sm:$0xff] }
 0x140   : > { %2308 = vmatpush.msrb.mxu2 %v6895_v3  ;;  %2383 = vmatpush.msrb.mxu3 %v2382_v20  ;;  %v7013_v20 = vsub.f32 %v285_v12, %v6992_v60  ;;  %v2406_v52 = vand.u32 4294901760, %v2405_v1  ;;  %v9262_v1 = vld [vmem:[#allocation18_spill] sm:$0xff] }
 0x141   : > { %2222 = vmatpush.msrb.mxu0 %v9256_v21  ;;  %2265 = vmatpush.msrb.mxu1 %v6688_v55  ;;  %v2411_v55 = vsub.f32 %v6973_v54, %v2410_v19  ;;  %v9263_v21 = vld [vmem:[#allocation15_spill] sm:$0xff] }
 0x142   : > { %2310 = vmatpush.msrb.mxu2 %v6908_v58  ;;  %2389 = vmatpush.msrb.mxu3 %v2388_v51  ;;  %v2428_v12 = vand.u32 4294901760, %v7013_v20  ;;  %v9259_v51 = vand.u32 4294901760, %v6797_v46 }
 0x143   : > { %2226 = vmatpush.msrb.mxu0 %v9257_v41  ;;  %2267 = vmatpush.msrb.mxu1 %v6697_v8  ;;  %v2417_v8 = vsub.f32 %v6990_v37, %v2416_v5  ;;  %v2412_v40 = vand.u32 4294901760, %v2411_v55  ;;  %v9265_v41 = vld [vmem:[#allocation13_spill] sm:$0xff] }
 0x144   : > { %2312 = vmatpush.msrb.mxu2 %v6921_v22  ;;  %2395 = vmatpush.msrb.mxu3 %v2394_v43  ;;  %v2434_v43 = vand.u32 4294901760, %v7027_v32  ;;  %v2429_v46 = vsub.f32 %v7013_v20, %v2428_v12 }
 0x145   : > { %2230 = vmatpush.msrb.mxu0 %v9258_v62  ;;  %2269 = vmatpush.msrb.mxu1 %v6711_v56  ;;  %v2423_v56 = vsub.f32 %v7003_v15, %v2422_v34  ;;  %v9269_v62 = vld [vmem:[#allocation19_spill] sm:$0xff] }
 0x146   : > { %2314 = vmatpush.msrb.mxu2 %v6933_v31  ;;  %2401 = vmatpush.msrb.mxu3 %v2400_v57  ;;  %v9264_v57 = vand.u32 4294901760, %v6830_v26  ;;  %v2430_v55 = vand.u32 4294901760, %v2429_v46  ;;  %v9266_v26 = vld [vmem:[#allocation17_spill] sm:$0xff] }
 0x147   : > { %2234 = vmatpush.msrb.mxu0 %v9259_v51  ;;  %2271 = vmatpush.msrb.mxu1 %v6718_v0  ;;  %v2418_v0 = vand.u32 4294901760, %v2417_v8  ;;  %v2424_v28 = vand.u32 4294901760, %v2423_v56  ;;  %v7082_v8 = vpop.f32.mrf.mxu0  ;;  %v9276_v51 = vld [vmem:[#allocation12_spill] sm:$0xff] }
 0x148   : > { %2316 = vmatpush.msrb.mxu2 %v6949_v63  ;;  %2407 = vmatpush.msrb.mxu3 %v2406_v52  ;;  %v9267_v52 = vand.u32 4294901760, %v6823_v42  ;;  %9273 = vst [vmem:[#allocation33_spill] sm:$0xff] %v7082_v8 }
 0x149   : > { %2125 = vmatmul.f32.vlgmr.msra.gmra.mxu2 %v9260_v16  ;;  %2238 = vmatpush.msrb.mxu0 %v9261_v59 }
 0x14a   : > { %2273 = vmatpush.msrb.mxu1 %v6735_v13  ;;  %2318 = vmatpush.msrb.mxu2 %v6967_v10  ;;  %v2435_v13 = vsub.f32 %v7027_v32, %v2434_v43 }
 0x14b   : > { %2413 = vmatpush.msrb.mxu3 %v2412_v40  ;;  %1958 = vmatmul.f32.vlgmr.msra.gmra.mxu0 %v9262_v1  ;;  %v9281_v40 = vand.u32 4294901760, %v6893_v36 }
 0x14c   : > { %2169 = vmatmul.f32.vlgmr.msra.gmra.mxu3 %v9263_v21  ;;  %2242 = vmatpush.msrb.mxu0 %v9264_v57 }
 0x14d   : > { %2275 = vmatpush.msrb.mxu1 %v6750_v14  ;;  %2320 = vmatpush.msrb.mxu2 %v6980_v33  ;;  %v2436_v14 = vand.u32 4294901760, %v2435_v13  ;;  %v354_v13 = vld [vmem:[#allocation5 + $0x3c8] sm:$0xff] }
 0x14e   : > { %2419 = vmatpush.msrb.mxu3 %v2418_v0  ;;  %2067 = vmatmul.f32.vlgmr.msra.gmra.mxu1 %v9265_v41  ;;  %v360_v0 = vld [vmem:[#allocation5 + $0x3f8] sm:$0xff] }
 0x14f   : > { %2449 = vmatpush.msra.mxu0 %v6823_v42  ;;  %2277 = vmatpush.msrb.mxu1 %v6759_v25  ;;  %v9268_v25 = vld [vmem:[#allocation22_spill] sm:$0xff]  ;;  %v9271_v42 = vld [vmem:[#allocation16_spill] sm:$0xff]  ;;  %v7199_v57 = vand.u32 4294901760, %v360_v0 }
 0x150   : > { %2322 = vmatpush.msrb.mxu2 %v6992_v60  ;;  %2425 = vmatpush.msrb.mxu3 %v2424_v28 }
 0x151   : > { %2452 = vmatpush.msra.mxu0 %v6837_v9  ;;  %2279 = vmatpush.msrb.mxu1 %v6772_v47  ;;  %v9270_v47 = vand.u32 4294901760, %v6837_v9  ;;  %v9274_v9 = vand.u32 4294901760, %v6865_v7 }
 0x152   : > { %2324 = vmatpush.msrb.mxu2 %v7008_v39  ;;  %2431 = vmatpush.msrb.mxu3 %v2430_v55 }
 0x153   : > { %2130 = vmatmul.f32.gmra.mxu2 %v9266_v26  ;;  %2455 = vmatpush.msra.mxu0 %v6850_v30 }
 0x154   : > { %2554 = vmatpush.msra.mxu2 %v9267_v52  ;;  %2281 = vmatpush.msrb.mxu1 %v6792_v44  ;;  %v9272_v44 = vand.u32 4294901760, %v6850_v30  ;;  %v7095_v30 = vpop.f32.mrf.mxu2 }
 0x155   : > { %2437 = vmatpush.msrb.mxu3 %v2436_v14  ;;  %1966 = vmatmul.f32.gmra.mxu0 %v9268_v25  ;;  %9277 = vst [vmem:[#allocation46_spill] sm:$0xff] %v7095_v30 }
 0x156   : > { %2175 = vmatmul.f32.gmra.mxu3 %v9269_v62  ;;  %2458 = vmatpush.msra.mxu0 %v6865_v7  ;;  %v7104_v7 = vpop.f32.mrf.mxu3  ;;  %v399_v62 = vld [vmem:[#allocation5 + $0x530] sm:$0xff] }
 0x157   : > { %2558 = vmatpush.msra.mxu2 %v9270_v47  ;;  %2625 = vmatpush.msra.mxu3 %v6799_v49  ;;  %9280 = vst [vmem:[#allocation47_spill] sm:$0xff] %v7104_v7  ;;  %v351_v47 = vld [vmem:[#allocation5 + $0x3b0] sm:$0xff] }
 0x158   : > { %2283 = vmatpush.msrb.mxu1 %v6803_v29  ;;  %2461 = vmatpush.msra.mxu0 %v6880_v27  ;;  %v7091_v29 = vpop.f32.mrf.mxu1  ;;  %v423_v7 = vld [vmem:[#allocation5 + $0x5f0] sm:$0xff] }
 0x159   : > { %2071 = vmatmul.f32.gmra.mxu1 %v9271_v42  ;;  %2562 = vmatpush.msra.mxu2 %v9272_v44  ;;  %9275 = vst [vmem:[#allocation45_spill] sm:$0xff] %v7091_v29  ;;  %v417_v29 = vld [vmem:[#allocation5 + $0x5c0] sm:$0xff] }
 0x15a   : > { %2507 = vmatpush.msra.mxu1 %v6799_v49  ;;  %2627 = vmatpush.msra.mxu3 %v6810_v48  ;;  %v9278_v49 = vand.u32 4294901760, %v6880_v27  ;;  %v7113_v27 = vpop.f32.mrf.mxu0 }
 0x15b   : > { %2464 = vmatpush.msra.mxu0 %v6893_v36  ;;  %2566 = vmatpush.msra.mxu2 %v9274_v9  ;;  %9282 = vst [vmem:[#allocation48_spill] sm:$0xff] %v7113_v27  ;;  %v7235_v9 = vsub.f32 %v360_v0, %v7199_v57  ;;  %v9299_v0 = vld [vmem:[#allocation23_spill] sm:$0xff] }
 0x15c   : > { %2509 = vmatpush.msra.mxu1 %v6810_v48  ;;  %2629 = vmatpush.msra.mxu3 %v6825_v23  ;;  %v9279_v48 = vld [vmem:[#allocation20_spill] sm:$0xff] }
 0x15d   : > { %2330 = vmatmul.f32.vlgmr.msrb.gmra.mxu2 %v9276_v51  ;;  %2467 = vmatpush.msra.mxu0 %v6906_v53  ;;  %v9286_v53 = vand.u32 4294901760, %v6931_v61  ;;  %v402_v51 = vld [vmem:[#allocation5 + $0x548] sm:$0xff] }
 0x15e   : > { %2511 = vmatpush.msra.mxu1 %v6825_v23  ;;  %2570 = vmatpush.msra.mxu2 %v9278_v49  ;;  %v9283_v23 = vand.u32 4294901760, %v6919_v11  ;;  %v7137_v36 = vpop.f32.mrf.mxu3  ;;  %v7466_v25 = vand.u32 4294901760, %v402_v51 }
 0x15f   : > { %2631 = vmatpush.msra.mxu3 %v6842_v6  ;;  %2244 = vmatmul.f32.vlgmr.msrb.gmra.mxu0 %v9265_v41  ;;  %9287 = vst [vmem:[#allocation51_spill] sm:$0xff] %v7137_v36 }
 0x160   : > { %2439 = vmatmul.f32.vlgmr.msrb.gmra.mxu3 %v9279_v48  ;;  %2470 = vmatpush.msra.mxu0 %v6919_v11 }
 0x161   : > { %2513 = vmatpush.msra.mxu1 %v6842_v6  ;;  %2574 = vmatpush.msra.mxu2 %v9281_v40  ;;  %v7123_v6 = vpop.f32.mrf.mxu1 }
 0x162   : > { %2633 = vmatpush.msra.mxu3 %v6855_v35  ;;  %2285 = vmatmul.f32.vlgmr.msrb.gmra.mxu1 %v9265_v41  ;;  %9284 = vst [vmem:[#allocation49_spill] sm:$0xff] %v7123_v6  ;;  %v7148_v11 = vpop.f32.mrf.mxu0  ;;  %v393_v41 = vld [vmem:[#allocation5 + $0x500] sm:$0xff] }
 0x163   : > { %2473 = vmatpush.msra.mxu0 %v6931_v61  ;;  %2515 = vmatpush.msra.mxu1 %v6855_v35  ;;  %v7127_v35 = vpop.f32.mrf.mxu2  ;;  %9288 = vst [vmem:[#allocation52_spill] sm:$0xff] %v7148_v11  ;;  %v333_v11 = vld [vmem:[#allocation5 + $0x320] sm:$0xff] }
 0x164   : > { %2578 = vmatpush.msra.mxu2 %v2380_v24  ;;  %2635 = vmatpush.msra.mxu3 %v6867_v18  ;;  %9285 = vst [vmem:[#allocation50_spill] sm:$0xff] %v7127_v35  ;;  %v9289_v24 = vld [vmem:[#allocation27_spill] sm:$0xff] }
 0x165   : > { %2476 = vmatpush.msra.mxu0 %v6944_v17  ;;  %2517 = vmatpush.msra.mxu1 %v6867_v18  ;;  %v375_v18 = vld [vmem:[#allocation5 + $0x470] sm:$0xff] }
 0x166   : > { %2582 = vmatpush.msra.mxu2 %v9283_v23  ;;  %2637 = vmatpush.msra.mxu3 %v6882_v50  ;;  %v7144_v61 = vand.u32 4294901760, %v375_v18  ;;  %v7189_v46 = vpop.f32.mrf.mxu3 }
 0x167   : > { %2479 = vmatpush.msra.mxu0 %v6957_v45  ;;  %2519 = vmatpush.msra.mxu1 %v6882_v50  ;;  %v372_v50 = vld [vmem:[#allocation5 + $0x458] sm:$0xff]  ;;  %v366_v45 = vld [vmem:[#allocation5 + $0x428] sm:$0xff]  ;;  %9293 = vst [vmem:[#allocation55_spill] sm:$0xff] %v7189_v46 }
 0x168   : > { %2586 = vmatpush.msra.mxu2 %v9286_v53  ;;  %2639 = vmatpush.msra.mxu3 %v6895_v3  ;;  %v7179_v56 = vand.u32 4294901760, %v366_v45  ;;  %v348_v53 = vld [vmem:[#allocation5 + $0x398] sm:$0xff] }
 0x169   : > { %2482 = vmatpush.msra.mxu0 %v6973_v54  ;;  %2521 = vmatpush.msra.mxu1 %v6895_v3  ;;  %v369_v3 = vld [vmem:[#allocation5 + $0x440] sm:$0xff]  ;;  %v363_v54 = vld [vmem:[#allocation5 + $0x410] sm:$0xff] }
 0x16a   : > { %2590 = vmatpush.msra.mxu2 %v2398_v38  ;;  %2641 = vmatpush.msra.mxu3 %v6908_v58  ;;  %v7159_v17 = vand.u32 4294901760, %v369_v3  ;;  %v7164_v38 = vpop.f32.mrf.mxu1  ;;  %v7202_v28 = vsub.f32 %v366_v45, %v7179_v56  ;;  %v7204_v55 = vpop.f32.mrf.mxu0 }
 0x16b   : > { %2248 = vmatmul.f32.gmra.mxu0 %v9271_v42  ;;  %2523 = vmatpush.msra.mxu1 %v6908_v58  ;;  %v7153_v58 = vand.u32 4294901760, %v372_v50  ;;  %9290 = vst [vmem:[#allocation53_spill] sm:$0xff] %v7164_v38 }
 0x16c   : > { %2485 = vmatpush.msra.mxu0 %v6990_v37  ;;  %2594 = vmatpush.msra.mxu2 %v2404_v2  ;;  %v7169_v2 = vpop.f32.mrf.mxu2  ;;  %v7183_v37 = vand.u32 4294901760, %v363_v54  ;;  %v7187_v59 = vsub.f32 %v369_v3, %v7159_v17  ;;  %9295 = vst [vmem:[#allocation56_spill] sm:$0xff] %v7204_v55  ;;  %v9080_v44 = vand.u32 4294901760, %v7202_v28  ;;  %v9308_v55 = vld [vmem:[#allocation26_spill] sm:$0xff] }
 0x16d   : > { %2643 = vmatpush.msra.mxu3 %v6921_v22  ;;  %2525 = vmatpush.msra.mxu1 %v6921_v22  ;;  %v7162_v22 = vsub.f32 %v375_v18, %v7144_v61  ;;  %9291 = vst [vmem:[#allocation54_spill] sm:$0xff] %v7169_v2  ;;  %v7247_v18 = vand.u32 4294901760, %v351_v47 }
 0x16e   : > { %2488 = vmatpush.msra.mxu0 %v7003_v15  ;;  %2598 = vmatpush.msra.mxu2 %v2410_v19  ;;  %v9292_v19 = vld [vmem:[#allocation24_spill] sm:$0xff] }
 0x16f   : > { %2645 = vmatpush.msra.mxu3 %v6933_v31  ;;  %2338 = vmatmul.f32.gmra.mxu2 %v9289_v24  ;;  %v405_v24 = vld [vmem:[#allocation5 + $0x560] sm:$0xff] }
 0x170   : > { %2491 = vmatpush.msra.mxu0 %v7013_v20  ;;  %2527 = vmatpush.msra.mxu1 %v6933_v31  ;;  %v7174_v31 = vsub.f32 %v372_v50, %v7153_v58  ;;  %v9078_v20 = vand.u32 4294901760, %v7187_v59 }
 0x171   : > { %2602 = vmatpush.msra.mxu2 %v2416_v5  ;;  %2647 = vmatpush.msra.mxu3 %v6949_v63  ;;  %v9081_v5 = vand.u32 4294901760, %v7162_v22 }
 0x172   : > { %2443 = vmatmul.f32.gmra.mxu3 %v9292_v19  ;;  %2494 = vmatpush.msra.mxu0 %v7027_v32  ;;  %v9079_v15 = vand.u32 4294901760, %v7174_v31  ;;  %v2729_v40 = vsub.f32 %v7187_v59, %v9078_v20  ;;  %v7262_v20 = vand.u32 4294901760, %v348_v53 }
 0x173   : > { %2529 = vmatpush.msra.mxu1 %v6949_v63  ;;  %2606 = vmatpush.msra.mxu2 %v2422_v34  ;;  %v9294_v63 = vld [vmem:[#allocation21_spill] sm:$0xff]  ;;  %v357_v34 = vld [vmem:[#allocation5 + $0x3e0] sm:$0xff] }
 0x174   : > { %2649 = vmatpush.msra.mxu3 %v6967_v10  ;;  %2289 = vmatmul.f32.gmra.mxu1 %v9271_v42  ;;  %v7220_v14 = vand.u32 4294901760, %v357_v34  ;;  %v7222_v52 = vpop.f32.mrf.mxu2  ;;  %v2723_v32 = vsub.f32 %v7174_v31, %v9079_v15  ;;  %v9330_v42 = vld [vmem:[#allocation29_spill] sm:$0xff] }
 0x175   : > { %2497 = vmatmul.f32.vlgmr.msra.gmra.mxu0 %v9294_v63  ;;  %2531 = vmatpush.msra.mxu1 %v6967_v10  ;;  %v2717_v10 = vsub.f32 %v7162_v22, %v9081_v5  ;;  %9297 = vst [vmem:[#allocation58_spill] sm:$0xff] %v7222_v52  ;;  %v7275_v5 = vsub.f32 %v351_v47, %v7247_v18  ;;  %v9304_v52 = vld [vmem:[#allocation25_spill] sm:$0xff]  ;;  %v9324_v63 = vld [vmem:[#allocation34_spill] sm:$0xff] }
 0x176   : > { %2666 = vmatpush.msrb.mxu0 %v7144_v61  ;;  %2610 = vmatpush.msra.mxu2 %v2428_v12  ;;  %v7216_v12 = vpop.f32.mrf.mxu1  ;;  %v7250_v50 = vsub.f32 %v357_v34, %v7220_v14  ;;  %v2724_v3 = vand.u32 4294901760, %v2723_v32  ;;  %v342_v32 = vld [vmem:[#allocation5 + $0x368] sm:$0xff] }
 0x177   : > { %2651 = vmatpush.msra.mxu3 %v6980_v33  ;;  %2533 = vmatpush.msra.mxu1 %v6980_v33  ;;  %v7214_v33 = vsub.f32 %v363_v54, %v7183_v37  ;;  %9296 = vst [vmem:[#allocation57_spill] sm:$0xff] %v7216_v12  ;;  %v2718_v49 = vand.u32 4294901760, %v2717_v10  ;;  %v345_v54 = vld [vmem:[#allocation5 + $0x380] sm:$0xff]  ;;  %v2735_v10 = vsub.f32 %v7202_v28, %v9080_v44  ;;  %v9302_v44 = vand.u32 4294901760, %v7235_v9 }
 0x178   : > { %2668 = vmatpush.msrb.mxu0 %v7153_v58  ;;  %2614 = vmatpush.msra.mxu2 %v2434_v43  ;;  %v7229_v43 = vand.u32 4294901760, %v354_v13  ;;  %v7271_v15 = vand.u32 4294901760, %v345_v54  ;;  %v7288_v46 = vand.u32 4294901760, %v342_v32 }
 0x179   : > { %2653 = vmatpush.msra.mxu3 %v6992_v60  ;;  %2616 = vmatmul.f32.vlgmr.msra.gmra.mxu2 %v9279_v48  ;;  %v9082_v23 = vand.u32 4294901760, %v7214_v33  ;;  %v2747_v47 = vsub.f32 %v7235_v9, %v9302_v44 }
 0x17a   : > { %2670 = vmatpush.msrb.mxu0 %v7159_v17  ;;  %2821 = vmatpush.msrb.mxu2 %v7162_v22  ;;  %v7255_v45 = vsub.f32 %v354_v13, %v7229_v43  ;;  %v7305_v12 = vsub.f32 %v345_v54, %v7271_v15  ;;  %v7319_v54 = vsub.f32 %v342_v32, %v7288_v46 }
 0x17b   : > { %2535 = vmatpush.msra.mxu1 %v6992_v60  ;;  %2655 = vmatpush.msra.mxu3 %v7008_v39  ;;  %v7243_v60 = vpop.f32.mrf.mxu3  ;;  %v2741_v13 = vsub.f32 %v7214_v33, %v9082_v23  ;;  %v339_v23 = vld [vmem:[#allocation5 + $0x350] sm:$0xff] }
 0x17c   : > { %2657 = vmatmul.f32.vlgmr.msra.gmra.mxu3 %v9279_v48  ;;  %2672 = vmatpush.msrb.mxu0 %v7179_v56  ;;  %9298 = vst [vmem:[#allocation59_spill] sm:$0xff] %v7243_v60  ;;  %v2736_v60 = vand.u32 4294901760, %v2735_v10  ;;  %v9305_v10 = vand.u32 4294901760, %v7250_v50  ;;  %v7301_v2 = vand.u32 4294901760, %v339_v23  ;;  %v9326_v48 = vand.u32 4294901760, %v7162_v22 }
 0x17d   : > { %2824 = vmatpush.msrb.mxu2 %v7174_v31  ;;  %2879 = vmatpush.msrb.mxu3 %v7144_v61 }
 0x17e   : > { %2537 = vmatpush.msra.mxu1 %v7008_v39  ;;  %2674 = vmatpush.msrb.mxu0 %v7183_v37  ;;  %v2730_v39 = vand.u32 4294901760, %v2729_v40  ;;  %v7281_v34 = vpop.f32.mrf.mxu1  ;;  %v2742_v40 = vand.u32 4294901760, %v2741_v13  ;;  %v2753_v44 = vsub.f32 %v7250_v50, %v9305_v10  ;;  %v2748_v10 = vand.u32 4294901760, %v2747_v47 }
 0x17f   : > { %2541 = vmatmul.f32.vlgmr.msra.gmra.mxu1 %v9299_v0  ;;  %2827 = vmatpush.msrb.mxu2 %v7187_v59  ;;  %9301 = vst [vmem:[#allocation61_spill] sm:$0xff] %v7281_v34  ;;  %v336_v34 = vld [vmem:[#allocation5 + $0x338] sm:$0xff] }
 0x180   : > { %2719 = vmatpush.msrb.mxu1 %v2718_v49  ;;  %2881 = vmatpush.msrb.mxu3 %v7153_v58  ;;  %v7277_v49 = vpop.f32.mrf.mxu0  ;;  %v7315_v38 = vand.u32 4294901760, %v336_v34 }
 0x181   : > { %2676 = vmatpush.msrb.mxu0 %v7199_v57  ;;  %2830 = vmatpush.msrb.mxu2 %v7202_v28  ;;  %9300 = vst [vmem:[#allocation60_spill] sm:$0xff] %v7277_v49  ;;  %v7293_v49 = vpop.f32.mrf.mxu2 }
 0x182   : > { %2725 = vmatpush.msrb.mxu1 %v2724_v3  ;;  %2883 = vmatpush.msrb.mxu3 %v7159_v17  ;;  %v7291_v3 = vsub.f32 %v348_v53, %v7262_v20  ;;  %9303 = vst [vmem:[#allocation62_spill] sm:$0xff] %v7293_v49  ;;  %v7329_v53 = vsub.f32 %v339_v23, %v7301_v2  ;;  %v7354_v23 = vand.u32 4294901760, %v423_v7 }
 0x183   : > { %2620 = vmatmul.f32.gmra.mxu2 %v9292_v19  ;;  %2678 = vmatpush.msrb.mxu0 %v7220_v14  ;;  %v7312_v49 = vpop.f32.mrf.mxu3 }
 0x184   : > { %2731 = vmatpush.msrb.mxu1 %v2730_v39  ;;  %2833 = vmatpush.msrb.mxu2 %v7214_v33  ;;  %v9306_v39 = vand.u32 4294901760, %v7255_v45  ;;  %9307 = vst [vmem:[#allocation63_spill] sm:$0xff] %v7312_v49  ;;  %v330_v49 = vld [vmem:[#allocation5 + $0x308] sm:$0xff]  ;;  %v9360_v16 = vand.u32 4294901760, %v7291_v3 }
 0x185   : > { %2885 = vmatpush.msrb.mxu3 %v7179_v56  ;;  %2502 = vmatmul.f32.gmra.mxu0 %v9304_v52  ;;  %v7360_v6 = vand.u32 4294901760, %v330_v49  ;;  %v7395_v52 = vand.u32 4294901760, %v417_v29 }
 0x186   : > { %2661 = vmatmul.f32.gmra.mxu3 %v9292_v19  ;;  %2680 = vmatpush.msrb.mxu0 %v7229_v43  ;;  %v2759_v13 = vsub.f32 %v7255_v45, %v9306_v39  ;;  %v2754_v39 = vand.u32 4294901760, %v2753_v44 }
 0x187   : > { %2737 = vmatpush.msrb.mxu1 %v2736_v60  ;;  %2836 = vmatpush.msrb.mxu2 %v7235_v9  ;;  %v9309_v60 = vand.u32 4294901760, %v7275_v5 }
 0x188   : > { %2887 = vmatpush.msrb.mxu3 %v7183_v37  ;;  %2547 = vmatmul.f32.gmra.mxu1 %v9308_v55  ;;  %v7331_v32 = vpop.f32.mrf.mxu0  ;;  %v2760_v36 = vand.u32 4294901760, %v2759_v13  ;;  %v7347_v13 = vpop.f32.mrf.mxu1 }
 0x189   : > { %2682 = vmatpush.msrb.mxu0 %v7247_v18  ;;  %2743 = vmatpush.msrb.mxu1 %v2742_v40  ;;  %v2765_v47 = vsub.f32 %v7275_v5, %v9309_v60  ;;  %9310 = vst [vmem:[#allocation64_spill] sm:$0xff] %v7331_v32  ;;  %v9311_v40 = vand.u32 4294901760, %v7291_v3  ;;  %v7339_v60 = vand.u32 4294901760, %v333_v11  ;;  %v7343_v32 = vsub.f32 %v336_v34, %v7315_v38  ;;  %v7356_v34 = vpop.f32.mrf.mxu2 }
 0x18a   : > { %2839 = vmatpush.msrb.mxu2 %v7250_v50  ;;  %2889 = vmatpush.msrb.mxu3 %v7199_v57  ;;  %9312 = vst [vmem:[#allocation65_spill] sm:$0xff] %v7347_v13  ;;  %v420_v13 = vld [vmem:[#allocation5 + $0x5d8] sm:$0xff] }
 0x18b   : > { %2684 = vmatpush.msrb.mxu0 %v7262_v20  ;;  %2749 = vmatpush.msrb.mxu1 %v2748_v10  ;;  %v2771_v44 = vsub.f32 %v7291_v3, %v9311_v40  ;;  %v2766_v10 = vand.u32 4294901760, %v2765_v47  ;;  %v9313_v40 = vand.u32 4294901760, %v7305_v12  ;;  %9314 = vst [vmem:[#allocation66_spill] sm:$0xff] %v7356_v34  ;;  %v9315_v47 = vand.u32 4294901760, %v7319_v54  ;;  %v7372_v27 = vpop.f32.mrf.mxu3 }
 0x18c   : > { %2842 = vmatpush.msrb.mxu2 %v7255_v45  ;;  %2891 = vmatpush.msrb.mxu3 %v7220_v14  ;;  %v7367_v30 = vsub.f32 %v333_v11, %v7339_v60  ;;  %9316 = vst [vmem:[#allocation67_spill] sm:$0xff] %v7372_v27  ;;  %v7379_v11 = vsub.f32 %v423_v7, %v7354_v23  ;;  %v7381_v8 = vand.u32 4294901760, %v420_v13 }
 0x18d   : > { %2686 = vmatpush.msrb.mxu0 %v7271_v15  ;;  %2755 = vmatpush.msrb.mxu1 %v2754_v39  ;;  %v2777_v35 = vsub.f32 %v7305_v12, %v9313_v40  ;;  %v2772_v39 = vand.u32 4294901760, %v2771_v44  ;;  %v2783_v40 = vsub.f32 %v7319_v54, %v9315_v47  ;;  %v9317_v44 = vand.u32 4294901760, %v7329_v53 }
 0x18e   : > { %2845 = vmatpush.msrb.mxu2 %v7275_v5  ;;  %2893 = vmatpush.msrb.mxu3 %v7229_v43  ;;  %v7388_v27 = vsub.f32 %v330_v49, %v7360_v6  ;;  %v7404_v0 = vsub.f32 %v420_v13, %v7381_v8  ;;  %v7418_v13 = vsub.f32 %v417_v29, %v7395_v52 }
 0x18f   : > { %2688 = vmatpush.msrb.mxu0 %v7288_v46  ;;  %2761 = vmatpush.msrb.mxu1 %v2760_v36  ;;  %v2778_v36 = vand.u32 4294901760, %v2777_v35  ;;  %v2789_v47 = vsub.f32 %v7329_v53, %v9317_v44  ;;  %v2784_v35 = vand.u32 4294901760, %v2783_v40  ;;  %v9319_v44 = vand.u32 4294901760, %v7343_v32 }
 0x190   : > { %2848 = vmatpush.msrb.mxu2 %v7291_v3  ;;  %2895 = vmatpush.msrb.mxu3 %v7247_v18  ;;  %v7383_v34 = vpop.f32.mrf.mxu0  ;;  %v7399_v49 = vpop.f32.mrf.mxu1 }
 0x191   : > { %2690 = vmatpush.msrb.mxu0 %v7301_v2  ;;  %2767 = vmatpush.msrb.mxu1 %v2766_v10  ;;  %9318 = vst [vmem:[#allocation68_spill] sm:$0xff] %v7383_v34  ;;  %v414_v10 = vld [vmem:[#allocation5 + $0x5a8] sm:$0xff]  ;;  %v2795_v7 = vsub.f32 %v7343_v32, %v9319_v44  ;;  %v411_v34 = vld [vmem:[#allocation5 + $0x590] sm:$0xff]  ;;  %v7408_v55 = vpop.f32.mrf.mxu2 }
 0x192   : > { %2851 = vmatpush.msrb.mxu2 %v7305_v12  ;;  %2897 = vmatpush.msrb.mxu3 %v7262_v20  ;;  %9320 = vst [vmem:[#allocation69_spill] sm:$0xff] %v7399_v49  ;;  %v7406_v44 = vand.u32 4294901760, %v414_v10  ;;  %v7420_v49 = vand.u32 4294901760, %v411_v34 }
 0x193   : > { %2692 = vmatpush.msrb.mxu0 %v7315_v38  ;;  %2773 = vmatpush.msrb.mxu1 %v2772_v39  ;;  %v2790_v39 = vand.u32 4294901760, %v2789_v47  ;;  %9321 = vst [vmem:[#allocation70_spill] sm:$0xff] %v7408_v55  ;;  %v9322_v47 = vand.u32 4294901760, %v7367_v30  ;;  %v408_v55 = vld [vmem:[#allocation5 + $0x578] sm:$0xff]  ;;  %v7424_v19 = vpop.f32.mrf.mxu3 }
 0x194   : > { %2854 = vmatpush.msrb.mxu2 %v7319_v54  ;;  %2899 = vmatpush.msrb.mxu3 %v7271_v15  ;;  %9323 = vst [vmem:[#allocation71_spill] sm:$0xff] %v7424_v19  ;;  %v7432_v29 = vsub.f32 %v414_v10, %v7406_v44  ;;  %v9327_v19 = vand.u32 4294901760, %v7388_v27  ;;  %v7445_v10 = vsub.f32 %v411_v34, %v7420_v49 }
 0x195   : > { %2694 = vmatpush.msrb.mxu0 %v7339_v60  ;;  %2779 = vmatpush.msrb.mxu1 %v2778_v36  ;;  %v2796_v36 = vand.u32 4294901760, %v2795_v7  ;;  %v2801_v40 = vsub.f32 %v7367_v30, %v9322_v47 }
 0x196   : > { %2857 = vmatpush.msrb.mxu2 %v7329_v53  ;;  %2901 = vmatpush.msrb.mxu3 %v7288_v46 }
 0x197   : > { %2696 = vmatpush.msrb.mxu0 %v7360_v6  ;;  %2785 = vmatpush.msrb.mxu1 %v2784_v35  ;;  %v9325_v35 = vand.u32 4294901760, %v7379_v11 }
 0x198   : > { %2860 = vmatpush.msrb.mxu2 %v7343_v32  ;;  %2903 = vmatpush.msrb.mxu3 %v7301_v2  ;;  %v7447_v22 = vpop.f32.mrf.mxu0 }
 0x199   : > { %2702 = vmatmul.f32.vlgmr.msrb.gmra.mxu0 %v9324_v63  ;;  %2791 = vmatpush.msrb.mxu1 %v2790_v39  ;;  %v3089_v7 = vsub.f32 %v7379_v11, %v9325_v35  ;;  %v2807_v63 = vsub.f32 %v7388_v27, %v9327_v19  ;;  %v7440_v39 = vand.u32 4294901760, %v408_v55  ;;  %v2802_v35 = vand.u32 4294901760, %v2801_v40  ;;  %9328 = vst [vmem:[#allocation72_spill] sm:$0xff] %v7447_v22  ;;  %v7475_v47 = vpop.f32.mrf.mxu2 }
 0x19a   : > { %2926 = vmatpush.msra.mxu0 %v9326_v48  ;;  %2863 = vmatpush.msrb.mxu2 %v7367_v30  ;;  %v9329_v48 = vand.u32 4294901760, %v7174_v31  ;;  %v7452_v19 = vand.u32 4294901760, %v405_v24  ;;  %v9332_v22 = vand.u32 4294901760, %v7187_v59  ;;  %9335 = vst [vmem:[#allocation74_spill] sm:$0xff] %v7475_v47  ;;  %v9339_v47 = vld [vmem:[#allocation36_spill] sm:$0xff] }
 0x19b   : > { %2905 = vmatpush.msrb.mxu3 %v7315_v38  ;;  %2797 = vmatpush.msrb.mxu1 %v2796_v36  ;;  %v3090_v40 = vand.u32 4294901760, %v3089_v7  ;;  %v9331_v36 = vand.u32 4294901760, %v7404_v0  ;;  %v2808_v31 = vand.u32 4294901760, %v2807_v63  ;;  %v9334_v7 = vand.u32 4294901760, %v7418_v13  ;;  %v9336_v63 = vld [vmem:[#allocation30_spill] sm:$0xff] }
 0x19c   : > { %2930 = vmatpush.msra.mxu0 %v9329_v48  ;;  %2866 = vmatpush.msrb.mxu2 %v7388_v27  ;;  %v7464_v48 = vsub.f32 %v408_v55, %v7440_v39  ;;  %v9337_v55 = vand.u32 4294901760, %v7202_v28  ;;  %v7481_v26 = vsub.f32 %v405_v24, %v7452_v19 }
 0x19d   : > { %2907 = vmatpush.msrb.mxu3 %v7339_v60  ;;  %2869 = vmatmul.f32.vlgmr.msrb.gmra.mxu2 %v9330_v42  ;;  %v3095_v34 = vsub.f32 %v7404_v0, %v9331_v36  ;;  %v7468_v42 = vpop.f32.mrf.mxu1  ;;  %v3101_v36 = vsub.f32 %v7418_v13, %v9334_v7  ;;  %v9338_v7 = vand.u32 4294901760, %v7432_v29 }
 0x19e   : > { %2934 = vmatpush.msra.mxu0 %v9332_v22  ;;  %3038 = vmatpush.msra.mxu2 %v7354_v23  ;;  %9333 = vst [vmem:[#allocation73_spill] sm:$0xff] %v7468_v42  ;;  %v396_v22 = vld [vmem:[#allocation5 + $0x518] sm:$0xff] }
 0x19f   : > { %2803 = vmatpush.msrb.mxu1 %v2802_v35  ;;  %2909 = vmatpush.msrb.mxu3 %v7360_v6  ;;  %v7483_v35 = vand.u32 4294901760, %v399_v62  ;;  %v3096_v42 = vand.u32 4294901760, %v3095_v34  ;;  %v3107_v59 = vsub.f32 %v7432_v29, %v9338_v7  ;;  %v7494_v24 = vand.u32 4294901760, %v396_v22 }
 0x1a0   : > { %2913 = vmatmul.f32.vlgmr.msrb.gmra.mxu3 %v9336_v63  ;;  %2938 = vmatpush.msra.mxu0 %v9337_v55  ;;  %v7492_v55 = vsub.f32 %v402_v51, %v7466_v25  ;;  %v7496_v63 = vpop.f32.mrf.mxu3  ;;  %v3102_v34 = vand.u32 4294901760, %v3101_v36  ;;  %v9342_v7 = vand.u32 4294901760, %v7445_v10  ;;  %v7504_v21 = vpop.f32.mrf.mxu0 }
 0x1a1   : > { %3040 = vmatpush.msra.mxu2 %v7381_v8  ;;  %3091 = vmatpush.msra.mxu3 %v3090_v40  ;;  %9340 = vst [vmem:[#allocation75_spill] sm:$0xff] %v7496_v63  ;;  %v9341_v40 = vand.u32 4294901760, %v7214_v33  ;;  %v7510_v28 = vsub.f32 %v399_v62, %v7483_v35  ;;  %v7512_v63 = vand.u32 4294901760, %v393_v41  ;;  %v9344_v33 = vand.u32 4294901760, %v7235_v9  ;;  %v9347_v9 = vld [vmem:[#allocation32_spill] sm:$0xff] }
 0x1a2   : > { %2809 = vmatpush.msrb.mxu1 %v2808_v31  ;;  %2710 = vmatmul.f32.gmra.mxu0 %v9339_v47  ;;  %v3113_v31 = vsub.f32 %v7445_v10, %v9342_v7  ;;  %v390_v47 = vld [vmem:[#allocation5 + $0x4e8] sm:$0xff]  ;;  %9343 = vst [vmem:[#allocation76_spill] sm:$0xff] %v7504_v21  ;;  %v3108_v36 = vand.u32 4294901760, %v3107_v59  ;;  %v7523_v62 = vsub.f32 %v396_v22, %v7494_v24 }
 0x1a3   : > { %2811 = vmatmul.f32.vlgmr.msrb.gmra.mxu1 %v6199_v4  ;;  %2942 = vmatpush.msra.mxu0 %v9341_v40  ;;  %v387_v40 = vld [vmem:[#allocation5 + $0x4d0] sm:$0xff]  ;;  %v7525_v21 = vand.u32 4294901760, %v390_v47  ;;  %v7540_v1 = vsub.f32 %v393_v41, %v7512_v63 }
 0x1a4   : > { %2997 = vmatpush.msra.mxu1 %v7144_v61  ;;  %3042 = vmatpush.msra.mxu2 %v7395_v52  ;;  %v9345_v61 = vand.u32 4294901760, %v7464_v48  ;;  %v3114_v59 = vand.u32 4294901760, %v3113_v31  ;;  %v9351_v31 = vld [vmem:[#allocation35_spill] sm:$0xff] }
 0x1a5   : > { %3097 = vmatpush.msra.mxu3 %v3096_v42  ;;  %2946 = vmatpush.msra.mxu0 %v9344_v33  ;;  %v7527_v42 = vpop.f32.mrf.mxu1  ;;  %v9349_v33 = vand.u32 4294901760, %v7250_v50  ;;  %v9352_v50 = vand.u32 4294901760, %v7255_v45  ;;  %v7553_v41 = vsub.f32 %v390_v47, %v7525_v21  ;;  %v9355_v45 = vld [vmem:[#allocation31_spill] sm:$0xff] }
 0x1a6   : > { %2999 = vmatpush.msra.mxu1 %v7153_v58  ;;  %3044 = vmatpush.msra.mxu2 %v7406_v44  ;;  %v3119_v7 = vsub.f32 %v7464_v48, %v9345_v61  ;;  %9346 = vst [vmem:[#allocation77_spill] sm:$0xff] %v7527_v42  ;;  %v7530_v58 = vpop.f32.mrf.mxu2  ;;  %v9350_v61 = vand.u32 4294901760, %v7481_v26  ;;  %v384_v42 = vld [vmem:[#allocation5 + $0x4b8] sm:$0xff] }
 0x1a7   : > { %3103 = vmatpush.msra.mxu3 %v3102_v34  ;;  %2874 = vmatmul.f32.gmra.mxu2 %v9347_v9  ;;  %9348 = vst [vmem:[#allocation78_spill] sm:$0xff] %v7530_v58  ;;  %v7542_v34 = vand.u32 4294901760, %v387_v40  ;;  %v381_v58 = vld [vmem:[#allocation5 + $0x4a0] sm:$0xff] }
 0x1a8   : > { %2950 = vmatpush.msra.mxu0 %v9349_v33  ;;  %3001 = vmatpush.msra.mxu1 %v7159_v17  ;;  %v3125_v22 = vsub.f32 %v7481_v26, %v9350_v61  ;;  %v3120_v17 = vand.u32 4294901760, %v3119_v7  ;;  %v9353_v33 = vand.u32 4294901760, %v7492_v55  ;;  %v7555_v9 = vpop.f32.mrf.mxu3 }
 0x1a9   : > { %3046 = vmatpush.msra.mxu2 %v7420_v49  ;;  %3109 = vmatpush.msra.mxu3 %v3108_v36  ;;  %9354 = vst [vmem:[#allocation79_spill] sm:$0xff] %v7555_v9  ;;  %v7559_v36 = vand.u32 4294901760, %v384_v42  ;;  %v7567_v51 = vsub.f32 %v387_v40, %v7542_v34  ;;  %v378_v9 = vld [vmem:[#allocation5 + $0x488] sm:$0xff] }
 0x1aa   : > { %2919 = vmatmul.f32.gmra.mxu3 %v9351_v31  ;;  %2954 = vmatpush.msra.mxu0 %v9352_v50  ;;  %v3131_v61 = vsub.f32 %v7492_v55, %v9353_v33  ;;  %v3126_v7 = vand.u32 4294901760, %v3125_v22  ;;  %v9356_v50 = vand.u32 4294901760, %v7510_v28  ;;  %v7572_v31 = vand.u32 4294901760, %v381_v58 }
 0x1ab   : > { %3003 = vmatpush.msra.mxu1 %v7179_v56  ;;  %3048 = vmatpush.msra.mxu2 %v7440_v39  ;;  %v9357_v56 = vand.u32 4294901760, %v7275_v5  ;;  %v7587_v5 = vand.u32 4294901760, %v378_v9 }
 0x1ac   : > { %3115 = vmatpush.msra.mxu3 %v3114_v59  ;;  %2815 = vmatmul.f32.gmra.mxu1 %v9355_v45  ;;  %v3137_v33 = vsub.f32 %v7510_v28, %v9356_v50  ;;  %v7574_v59 = vpop.f32.mrf.mxu0  ;;  %v3132_v22 = vand.u32 4294901760, %v3131_v61  ;;  %v9359_v50 = vand.u32 4294901760, %v7523_v62  ;;  %v9361_v61 = vand.u32 4294901760, %v7540_v1 }
 0x1ad   : > { %2958 = vmatpush.msra.mxu0 %v9357_v56  ;;  %3005 = vmatpush.msra.mxu1 %v7183_v37  ;;  %9358 = vst [vmem:[#allocation80_spill] sm:$0xff] %v7574_v59  ;;  %v7585_v37 = vsub.f32 %v384_v42, %v7559_v36  ;;  %v7594_v40 = vpop.f32.mrf.mxu1  ;;  %v316_v59 = vld [vmem:[#allocation5 + $0x298] sm:$0xff] }
 0x1ae   : > { %3050 = vmatpush.msra.mxu2 %v7452_v19  ;;  %3121 = vmatpush.msra.mxu3 %v3120_v17  ;;  %v3143_v47 = vsub.f32 %v7523_v62, %v9359_v50  ;;  %v3138_v17 = vand.u32 4294901760, %v3137_v33  ;;  %v3149_v56 = vsub.f32 %v7540_v1, %v9361_v61  ;;  %v3160_v50 = vand.u32 4294901760, %v7567_v51  ;;  %9362 = vst [vmem:[#allocation81_spill] sm:$0xff] %v7594_v40  ;;  %v7602_v3 = vpop.f32.mrf.mxu2 }
 0x1af   : > { %2962 = vmatpush.msra.mxu0 %v9360_v16  ;;  %3007 = vmatpush.msra.mxu1 %v7199_v57  ;;  %v9363_v16 = vand.u32 4294901760, %v7305_v12  ;;  %v7600_v57 = vsub.f32 %v381_v58, %v7572_v31  ;;  %9364 = vst [vmem:[#allocation82_spill] sm:$0xff] %v7602_v3  ;;  %v9366_v61 = vand.u32 4294901760, %v7319_v54  ;;  %v3166_v12 = vand.u32 4294901760, %v7585_v37  ;;  %v319_v3 = vld [vmem:[#allocation5 + $0x2b0] sm:$0xff] }
 0x1b0   : > { %3052 = vmatpush.msra.mxu2 %v7466_v25  ;;  %3127 = vmatpush.msra.mxu3 %v3126_v7  ;;  %v3144_v42 = vand.u32 4294901760, %v3143_v47  ;;  %v9365_v7 = vand.u32 4294901760, %v7553_v41  ;;  %v3150_v58 = vand.u32 4294901760, %v3149_v56  ;;  %v3161_v47 = vsub.f32 %v7567_v51, %v3160_v50 }
 0x1b1   : > { %2966 = vmatpush.msra.mxu0 %v9363_v16  ;;  %3009 = vmatpush.msra.mxu1 %v7220_v14  ;;  %v7613_v14 = vsub.f32 %v378_v9, %v7587_v5  ;;  %v9368_v54 = vand.u32 4294901760, %v7329_v53  ;;  %v3167_v53 = vsub.f32 %v7585_v37, %v3166_v12  ;;  %v7951_v40 = vand.u32 4294901760, %v319_v3 }
 0x1b2   : > { %3054 = vmatpush.msra.mxu2 %v7483_v35  ;;  %3133 = vmatpush.msra.mxu3 %v3132_v22  ;;  %v3155_v33 = vsub.f32 %v7553_v41, %v9365_v7  ;;  %v7619_v22 = vpop.f32.mrf.mxu3 }
 0x1b3   : > { %2970 = vmatpush.msra.mxu0 %v9366_v61  ;;  %3011 = vmatpush.msra.mxu1 %v7229_v43  ;;  %9367 = vst [vmem:[#allocation83_spill] sm:$0xff] %v7619_v22  ;;  %v3172_v43 = vand.u32 4294901760, %v7600_v57  ;;  %v3178_v56 = vand.u32 4294901760, %v7613_v14  ;;  %v3168_v61 = vand.u32 4294901760, %v3167_v53  ;;  %v9382_v53 = vand.u32 4294901760, %v7404_v0 }
 0x1b4   : > { %3056 = vmatpush.msra.mxu2 %v7494_v24  ;;  %3139 = vmatpush.msra.mxu3 %v3138_v17  ;;  %v7625_v16 = vpop.f32.mrf.mxu0  ;;  %v3156_v9 = vand.u32 4294901760, %v3155_v33  ;;  %v9370_v17 = vand.u32 4294901760, %v7343_v32  ;;  %v9374_v33 = vand.u32 4294901760, %v7388_v27 }
 0x1b5   : > { %2974 = vmatpush.msra.mxu0 %v9368_v54  ;;  %3013 = vmatpush.msra.mxu1 %v7247_v18  ;;  %9369 = vst [vmem:[#allocation84_spill] sm:$0xff] %v7625_v16  ;;  %v3162_v18 = vand.u32 4294901760, %v3161_v47  ;;  %v7636_v7 = vpop.f32.mrf.mxu1  ;;  %v9377_v47 = vld [vmem:[#allocation42_spill] sm:$0xff] }
 0x1b6   : > { %3058 = vmatpush.msra.mxu2 %v7512_v63  ;;  %3145 = vmatpush.msra.mxu3 %v3144_v42  ;;  %9371 = vst [vmem:[#allocation85_spill] sm:$0xff] %v7636_v7  ;;  %v9372_v42 = vand.u32 4294901760, %v7367_v30  ;;  %v7644_v32 = vpop.f32.mrf.mxu2  ;;  %v3179_v30 = vsub.f32 %v7613_v14, %v3178_v56 }
 0x1b7   : > { %2978 = vmatpush.msra.mxu0 %v9370_v17  ;;  %3015 = vmatpush.msra.mxu1 %v7262_v20  ;;  %v3173_v20 = vsub.f32 %v7600_v57, %v3172_v43  ;;  %9373 = vst [vmem:[#allocation86_spill] sm:$0xff] %v7644_v32  ;;  %v9381_v17 = vld [vmem:[#allocation37_spill] sm:$0xff] }
 0x1b8   : > { %3060 = vmatpush.msra.mxu2 %v7525_v21  ;;  %3151 = vmatpush.msra.mxu3 %v3150_v58  ;;  %v3180_v27 = vand.u32 4294901760, %v3179_v30  ;;  %v9389_v30 = vand.u32 4294901760, %v7464_v48 }
 0x1b9   : > { %2982 = vmatpush.msra.mxu0 %v9372_v42  ;;  %3017 = vmatpush.msra.mxu1 %v7271_v15  ;;  %v3174_v58 = vand.u32 4294901760, %v3173_v20  ;;  %v9386_v20 = vld [vmem:[#allocation44_spill] sm:$0xff] }
 0x1ba   : > { %3062 = vmatpush.msra.mxu2 %v7542_v34  ;;  %3157 = vmatpush.msra.mxu3 %v3156_v9  ;;  %v7654_v15 = vpop.f32.mrf.mxu3 }
 0x1bb   : > { %2986 = vmatpush.msra.mxu0 %v9374_v33  ;;  %3019 = vmatpush.msra.mxu1 %v7288_v46  ;;  %9375 = vst [vmem:[#allocation87_spill] sm:$0xff] %v7654_v15  ;;  %v328_v15 = vld [vmem:[#allocation5 + $0x2f8] sm:$0xff] }
 0x1bc   : > { %3064 = vmatpush.msra.mxu2 %v7559_v36  ;;  %3163 = vmatpush.msra.mxu3 %v3162_v18  ;;  %v7661_v46 = vpop.f32.mrf.mxu0  ;;  %v7913_v32 = vand.u32 4294901760, %v328_v15 }
 0x1bd   : > { %2988 = vmatmul.f32.vlgmr.msra.gmra.mxu0 %v6199_v4  ;;  %3021 = vmatpush.msra.mxu1 %v7301_v2  ;;  %9376 = vst [vmem:[#allocation88_spill] sm:$0xff] %v7661_v46  ;;  %v9378_v2 = vand.u32 4294901760, %v7379_v11  ;;  %v7669_v54 = vpop.f32.mrf.mxu1 }
 0x1be   : > { %3193 = vmatpush.msrb.mxu0 %v7379_v11  ;;  %3066 = vmatpush.msra.mxu2 %v7572_v31  ;;  %9379 = vst [vmem:[#allocation89_spill] sm:$0xff] %v7669_v54  ;;  %v7672_v9 = vpop.f32.mrf.mxu2 }
 0x1bf   : > { %3169 = vmatpush.msra.mxu3 %v3168_v61  ;;  %3023 = vmatpush.msra.mxu1 %v7315_v38  ;;  %v425_v38 = vld [vmem:[#allocation7] sm:$0x7]  ;;  %9380 = vst [vmem:[#allocation90_spill] sm:$0xff] %v7672_v9  ;;  %v9387_v61 = vand.u32 4294901760, %v7445_v10 }
 0x1c0   : > { %3196 = vmatpush.msrb.mxu0 %v7404_v0  ;;  %3068 = vmatpush.msra.mxu2 %v7587_v5  ;;  %v428_v18 = vperm.slane %v425_v38, 1 }
 0x1c1   : > { %3175 = vmatpush.msra.mxu3 %v3174_v58  ;;  %3074 = vmatmul.f32.vlgmr.msra.gmra.mxu2 %v9377_v47 }
 0x1c2   : > { %3199 = vmatpush.msrb.mxu0 %v7418_v13  ;;  %3298 = vmatpush.msrb.mxu2 %v9378_v2  ;;  %v7681_v11 = vpop.f32.mrf.mxu3 }
 0x1c3   : > { %3025 = vmatpush.msra.mxu1 %v7339_v60  ;;  %3181 = vmatpush.msra.mxu3 %v3180_v27  ;;  %9383 = vst [vmem:[#allocation91_spill] sm:$0xff] %v7681_v11  ;;  %v9384_v60 = vand.u32 4294901760, %v7418_v13  ;;  %v238_v11 = vld [vmem:[#allocation5 + $0x28] sm:$0xff] }
 0x1c4   : > { %3183 = vmatmul.f32.vlgmr.msra.gmra.mxu3 %v9381_v17  ;;  %3202 = vmatpush.msrb.mxu0 %v7432_v29 }
 0x1c5   : > { %3302 = vmatpush.msrb.mxu2 %v9382_v53  ;;  %3369 = vmatpush.msrb.mxu3 %v7354_v23  ;;  %v9393_v53 = vand.u32 4294901760, %v7523_v62 }
 0x1c6   : > { %3027 = vmatpush.msra.mxu1 %v7360_v6  ;;  %2992 = vmatmul.f32.gmra.mxu0 %v9355_v45  ;;  %v9385_v6 = vand.u32 4294901760, %v7432_v29 }
 0x1c7   : > { %3029 = vmatmul.f32.vlgmr.msra.gmra.mxu1 %v6199_v4  ;;  %3205 = vmatpush.msrb.mxu0 %v7445_v10  ;;  %v9390_v10 = vand.u32 4294901760, %v7481_v26 }
 0x1c8   : > { %3251 = vmatpush.msrb.mxu1 %v7354_v23  ;;  %3306 = vmatpush.msrb.mxu2 %v9384_v60  ;;  %v1959_v0 = vpop.f32.mrf.mxu0 }
 0x1c9   : > { %3371 = vmatpush.msrb.mxu3 %v7381_v8  ;;  %3208 = vmatpush.msrb.mxu0 %v7464_v48  ;;  %v1960_v42 = vadd.f32 %v1959_v0, %v428_v18  ;;  %v9391_v48 = vand.u32 4294901760, %v7492_v55  ;;  %v9394_v0 = vand.u32 4294901760, %v7540_v1 }
 0x1ca   : > { %3253 = vmatpush.msrb.mxu1 %v7381_v8  ;;  %3310 = vmatpush.msrb.mxu2 %v9385_v6  ;;  %v9388_v8 = vld [vmem:[#allocation40_spill] sm:$0xff]  ;;  %v271_v6 = vld [vmem:[#allocation5 + $0x130] sm:$0xff] }
 0x1cb   : > { %3373 = vmatpush.msrb.mxu3 %v7395_v52  ;;  %3082 = vmatmul.f32.gmra.mxu2 %v9386_v20  ;;  %v2068_v33 = vpop.f32.mrf.mxu1  ;;  %v307_v20 = vld [vmem:[#allocation5 + $0x250] sm:$0xff] }
 0x1cc   : > { %3211 = vmatpush.msrb.mxu0 %v7481_v26  ;;  %3255 = vmatpush.msrb.mxu1 %v7395_v52  ;;  %v2069_v23 = vadd.f32 %v2068_v33, %v1960_v42  ;;  %v2126_v13 = vpop.f32.mrf.mxu2  ;;  %v9392_v26 = vand.u32 4294901760, %v7510_v28  ;;  %v9395_v42 = vand.u32 4294901760, %v7553_v41 }
 0x1cd   : > { %3314 = vmatpush.msrb.mxu2 %v9387_v61  ;;  %3375 = vmatpush.msrb.mxu3 %v7406_v44 }
 0x1ce   : > { %3187 = vmatmul.f32.gmra.mxu3 %v9388_v8  ;;  %3214 = vmatpush.msrb.mxu0 %v7492_v55  ;;  %v2127_v29 = vadd.f32 %v2126_v13, %v2069_v23  ;;  %v7758_v13 = vand.u32 4294901760, %v271_v6 }
 0x1cf   : > { %3257 = vmatpush.msrb.mxu1 %v7406_v44  ;;  %3318 = vmatpush.msrb.mxu2 %v9389_v30  ;;  %v2170_v58 = vpop.f32.mrf.mxu3 }
 0x1d0   : > { %3377 = vmatpush.msrb.mxu3 %v7420_v49  ;;  %3033 = vmatmul.f32.gmra.mxu1 %v9355_v45  ;;  %v2171_v52 = vadd.f32 %v2170_v58, %v2127_v29  ;;  %v9396_v58 = vld [vmem:[#allocation38_spill] sm:$0xff] }
 0x1d1   : > { %3217 = vmatpush.msrb.mxu0 %v7510_v28  ;;  %3259 = vmatpush.msrb.mxu1 %v7420_v49  ;;  %v280_v49 = vld [vmem:[#allocation5 + $0x178] sm:$0xff]  ;;  %v274_v28 = vld [vmem:[#allocation5 + $0x148] sm:$0xff] }
 0x1d2   : > { %3322 = vmatpush.msrb.mxu2 %v9390_v10  ;;  %3379 = vmatpush.msrb.mxu3 %v7440_v39  ;;  %v1967_v27 = vpop.f32.mrf.mxu0 }
 0x1d3   : > { %3220 = vmatpush.msrb.mxu0 %v7523_v62  ;;  %3261 = vmatpush.msrb.mxu1 %v7440_v39  ;;  %v1968_v44 = vadd.f32 %v1967_v27, %v428_v18  ;;  %v277_v39 = vld [vmem:[#allocation5 + $0x160] sm:$0xff]  ;;  %v7780_v27 = vsub.f32 %v271_v6, %v7758_v13  ;;  %v9397_v6 = vld [vmem:[#allocation41_spill] sm:$0xff] }
 0x1d4   : > { %3326 = vmatpush.msrb.mxu2 %v9391_v48  ;;  %3381 = vmatpush.msrb.mxu3 %v7452_v19 }
 0x1d5   : > { %3223 = vmatpush.msrb.mxu0 %v7540_v1  ;;  %3263 = vmatpush.msrb.mxu1 %v7452_v19  ;;  %v7727_v19 = vand.u32 4294901760, %v280_v49 }
 0x1d6   : > { %3330 = vmatpush.msrb.mxu2 %v9392_v26  ;;  %3383 = vmatpush.msrb.mxu3 %v7466_v25  ;;  %v2072_v2 = vpop.f32.mrf.mxu1  ;;  %v2131_v38 = vpop.f32.mrf.mxu2 }
 0x1d7   : > { %3226 = vmatpush.msrb.mxu0 %v7553_v41  ;;  %3265 = vmatpush.msrb.mxu1 %v7466_v25  ;;  %v2073_v55 = vadd.f32 %v2072_v2, %v1968_v44  ;;  %v7734_v25 = vand.u32 4294901760, %v277_v39  ;;  %v7746_v1 = vsub.f32 %v280_v49, %v7727_v19  ;;  %v268_v41 = vld [vmem:[#allocation5 + $0x118] sm:$0xff]  ;;  %v259_v44 = vld [vmem:[#allocation5 + $0xd0] sm:$0xff]  ;;  %v9089_v2 = vand.u32 4294901760, %v7780_v27 }
 0x1d8   : > { %3334 = vmatpush.msrb.mxu2 %v9393_v53  ;;  %3385 = vmatpush.msrb.mxu3 %v7483_v35  ;;  %v7805_v26 = vand.u32 4294901760, %v259_v44  ;;  %v253_v53 = vld [vmem:[#allocation5 + $0xa0] sm:$0xff] }
 0x1d9   : > { %3229 = vmatpush.msrb.mxu0 %v7567_v51  ;;  %3267 = vmatpush.msrb.mxu1 %v7483_v35  ;;  %v2132_v18 = vadd.f32 %v2131_v38, %v2073_v55  ;;  %v2176_v60 = vpop.f32.mrf.mxu3  ;;  %v7743_v35 = vand.u32 4294901760, %v274_v28 }
 0x1da   : > { %3338 = vmatpush.msrb.mxu2 %v9394_v0  ;;  %3387 = vmatpush.msrb.mxu3 %v7494_v24  ;;  %v250_v0 = vld [vmem:[#allocation5 + $0x88] sm:$0xff] }
 0x1db   : > { %3232 = vmatpush.msrb.mxu0 %v7585_v37  ;;  %3269 = vmatpush.msrb.mxu1 %v7494_v24  ;;  %v7738_v62 = vadd.f32 %v2176_v60, %v2132_v18  ;;  %v7754_v24 = vsub.f32 %v277_v39, %v7734_v25  ;;  %v7765_v51 = vsub.f32 %v274_v28, %v7743_v35 }
 0x1dc   : > { %3342 = vmatpush.msrb.mxu2 %v9395_v42  ;;  %3389 = vmatpush.msrb.mxu3 %v7512_v63  ;;  %v2245_v33 = vpop.f32.mrf.mxu0 }
 0x1dd   : > { %3235 = vmatpush.msrb.mxu0 %v7600_v57  ;;  %3271 = vmatpush.msrb.mxu1 %v7512_v63  ;;  %v2246_v23 = vadd.f32 %v2245_v33, %v2171_v52  ;;  %v9093_v63 = vand.u32 4294901760, %v7746_v1  ;;  %v9091_v37 = vand.u32 4294901760, %v7754_v24 }
 0x1de   : > { %3346 = vmatpush.msrb.mxu2 %v3160_v50  ;;  %3391 = vmatpush.msrb.mxu3 %v7525_v21  ;;  %v265_v50 = vld [vmem:[#allocation5 + $0x100] sm:$0xff] }
 0x1df   : > { %3238 = vmatpush.msrb.mxu0 %v7613_v14  ;;  %3273 = vmatpush.msrb.mxu1 %v7525_v21  ;;  %v2286_v61 = vpop.f32.mrf.mxu1  ;;  %v7769_v21 = vand.u32 4294901760, %v268_v41  ;;  %v7777_v10 = vand.u32 4294901760, %v265_v50  ;;  %v3461_v57 = vsub.f32 %v7746_v1, %v9093_v63  ;;  %v3467_v14 = vsub.f32 %v7754_v24, %v9091_v37 }
 0x1e0   : > { %3350 = vmatpush.msrb.mxu2 %v3166_v12  ;;  %3393 = vmatpush.msrb.mxu3 %v7542_v34  ;;  %v2287_v29 = vadd.f32 %v2286_v61, %v2246_v23  ;;  %v2331_v30 = vpop.f32.mrf.mxu2  ;;  %v262_v12 = vld [vmem:[#allocation5 + $0xe8] sm:$0xff]  ;;  %v9398_v23 = vld [vmem:[#allocation39_spill] sm:$0xff]  ;;  %v7832_v61 = vand.u32 4294901760, %v253_v53 }
 0x1e1   : > { %3241 = vmatmul.f32.vlgmr.msrb.gmra.mxu0 %v9396_v58  ;;  %3275 = vmatpush.msrb.mxu1 %v7542_v34  ;;  %v7796_v49 = vsub.f32 %v268_v41, %v7769_v21  ;;  %v7809_v38 = vsub.f32 %v265_v50, %v7777_v10  ;;  %v3462_v39 = vand.u32 4294901760, %v3461_v57  ;;  %v3468_v33 = vand.u32 4294901760, %v3467_v14  ;;  %v313_v58 = vld [vmem:[#allocation5 + $0x280] sm:$0xff] }
 0x1e2   : > { %3410 = vmatpush.msra.mxu0 %v7727_v19  ;;  %3354 = vmatpush.msrb.mxu2 %v3172_v43  ;;  %v2332_v52 = vadd.f32 %v2331_v30, %v2287_v29  ;;  %v9090_v43 = vand.u32 4294901760, %v7765_v51  ;;  %v3479_v41 = vsub.f32 %v7780_v27, %v9089_v2  ;;  %v7836_v29 = vsub.f32 %v259_v44, %v7805_v26  ;;  %v244_v44 = vld [vmem:[#allocation5 + $0x58] sm:$0xff] }
 0x1e3   : > { %3395 = vmatpush.msrb.mxu3 %v7559_v36  ;;  %3277 = vmatpush.msrb.mxu1 %v7559_v36  ;;  %v2440_v34 = vpop.f32.mrf.mxu3  ;;  %v7793_v36 = vand.u32 4294901760, %v262_v12  ;;  %v9088_v18 = vand.u32 4294901760, %v7796_v49  ;;  %v9087_v50 = vand.u32 4294901760, %v7809_v38  ;;  %v7839_v30 = vand.u32 4294901760, %v250_v0 }
 0x1e4   : > { %3412 = vmatpush.msra.mxu0 %v7734_v25  ;;  %3358 = vmatpush.msrb.mxu2 %v3178_v56  ;;  %v7789_v48 = vadd.f32 %v2440_v34, %v2332_v52  ;;  %v256_v56 = vld [vmem:[#allocation5 + $0xb8] sm:$0xff]  ;;  %v3473_v55 = vsub.f32 %v7765_v51, %v9090_v43  ;;  %v3480_v14 = vand.u32 4294901760, %v3479_v41 }
 0x1e5   : > { %3397 = vmatpush.msrb.mxu3 %v7572_v31  ;;  %3360 = vmatmul.f32.vlgmr.msrb.gmra.mxu2 %v9381_v17  ;;  %v7818_v28 = vand.u32 4294901760, %v256_v56  ;;  %v7822_v60 = vsub.f32 %v262_v12, %v7793_v36  ;;  %v3485_v12 = vsub.f32 %v7796_v49, %v9088_v18  ;;  %v7871_v18 = vand.u32 4294901760, %v244_v44 }
 0x1e6   : > { %3414 = vmatpush.msra.mxu0 %v7743_v35  ;;  %3565 = vmatpush.msra.mxu2 %v7746_v1 }
 0x1e7   : > { %3279 = vmatpush.msrb.mxu1 %v7572_v31  ;;  %3399 = vmatpush.msrb.mxu3 %v7587_v5  ;;  %v9092_v52 = vand.u32 4294901760, %v7822_v60  ;;  %v7848_v34 = vsub.f32 %v256_v56, %v7818_v28  ;;  %v7860_v56 = vsub.f32 %v253_v53, %v7832_v61  ;;  %v3486_v41 = vand.u32 4294901760, %v3485_v12  ;;  %9399 = vst [vmem:[#allocation92_spill] sm:$0xff] %v7871_v18 }
 0x1e8   : > { %3401 = vmatmul.f32.vlgmr.msrb.gmra.mxu3 %v9381_v17  ;;  %3416 = vmatpush.msra.mxu0 %v7758_v13  ;;  %v2249_v31 = vpop.f32.mrf.mxu0  ;;  %v7895_v54 = vsub.f32 %v244_v44, %v7871_v18  ;;  %v304_v17 = vld [vmem:[#allocation5 + $0x238] sm:$0xff] }
 0x1e9   : > { %3568 = vmatpush.msra.mxu2 %v7754_v24  ;;  %3623 = vmatpush.msra.mxu3 %v7727_v19  ;;  %v2250_v42 = vadd.f32 %v2249_v31, %v7738_v62  ;;  %v247_v62 = vld [vmem:[#allocation5 + $0x70] sm:$0xff]  ;;  %v241_v31 = vld [vmem:[#allocation5 + $0x40] sm:$0xff] }
 0x1ea   : > { %3281 = vmatpush.msrb.mxu1 %v7587_v5  ;;  %3246 = vmatmul.f32.gmra.mxu0 %v9397_v6  ;;  %v3474_v5 = vand.u32 4294901760, %v3473_v55  ;;  %v7851_v57 = vand.u32 4294901760, %v247_v62  ;;  %v9094_v55 = vand.u32 4294901760, %v7836_v29 }
 0x1eb   : > { %3285 = vmatmul.f32.vlgmr.msrb.gmra.mxu1 %v9398_v23  ;;  %3418 = vmatpush.msra.mxu0 %v7769_v21 }
 0x1ec   : > { %3463 = vmatpush.msra.mxu1 %v3462_v39  ;;  %3571 = vmatpush.msra.mxu2 %v7765_v51  ;;  %v3491_v39 = vsub.f32 %v7809_v38, %v9087_v50  ;;  %v3497_v50 = vsub.f32 %v7822_v60, %v9092_v52  ;;  %v3503_v63 = vsub.f32 %v7836_v29, %v9094_v55  ;;  %v9401_v55 = vand.u32 4294901760, %v7848_v34 }
 0x1ed   : > { %3625 = vmatpush.msra.mxu3 %v7734_v25  ;;  %3420 = vmatpush.msra.mxu0 %v7777_v10 }
 0x1ee   : > { %3469 = vmatpush.msra.mxu1 %v3468_v33  ;;  %3574 = vmatpush.msra.mxu2 %v7780_v27  ;;  %v7864_v33 = vsub.f32 %v250_v0, %v7839_v30  ;;  %v7876_v0 = vand.u32 4294901760, %v241_v31  ;;  %v3492_v52 = vand.u32 4294901760, %v3491_v39  ;;  %v3498_v39 = vand.u32 4294901760, %v3497_v50 }
 0x1ef   : > { %3627 = vmatpush.msra.mxu3 %v7743_v35  ;;  %3364 = vmatmul.f32.gmra.mxu2 %v9388_v8  ;;  %v3509_v53 = vsub.f32 %v7848_v34, %v9401_v55  ;;  %v3504_v44 = vand.u32 4294901760, %v3503_v63  ;;  %v9402_v55 = vand.u32 4294901760, %v7860_v56 }
 0x1f0   : > { %3422 = vmatpush.msra.mxu0 %v7793_v36  ;;  %3475 = vmatpush.msra.mxu1 %v3474_v5  ;;  %v7879_v5 = vsub.f32 %v247_v62, %v7851_v57  ;;  %v9400_v62 = vld [vmem:[#allocation43_spill] sm:$0xff] }
 0x1f1   : > { %3577 = vmatpush.msra.mxu2 %v7796_v49  ;;  %3629 = vmatpush.msra.mxu3 %v7758_v13  ;;  %v2290_v2 = vpop.f32.mrf.mxu1  ;;  %v3510_v63 = vand.u32 4294901760, %v3509_v53 }
 0x1f2   : > { %3405 = vmatmul.f32.gmra.mxu3 %v9388_v8  ;;  %3424 = vmatpush.msra.mxu0 %v7805_v26  ;;  %v2291_v43 = vadd.f32 %v2290_v2, %v2250_v42  ;;  %v2498_v12 = vpop.f32.mrf.mxu0  ;;  %v2339_v37 = vpop.f32.mrf.mxu2  ;;  %v235_v42 = vld [vmem:[#allocation5 + $0x10] sm:$0xff]  ;;  %v3515_v2 = vsub.f32 %v7860_v56, %v9402_v55  ;;  %v7981_v8 = vand.u32 4294901760, %v313_v58 }
 0x1f3   : > { %3481 = vmatpush.msra.mxu1 %v3480_v14  ;;  %3580 = vmatpush.msra.mxu2 %v7809_v38  ;;  %v2499_v9 = vadd.f32 %v2498_v12, %v7789_v48  ;;  %v7899_v12 = vand.u32 4294901760, %v238_v11  ;;  %v7911_v46 = vand.u32 4294901760, %v235_v42 }
 0x1f4   : > { %3631 = vmatpush.msra.mxu3 %v7769_v21  ;;  %3291 = vmatmul.f32.gmra.mxu1 %v9400_v62  ;;  %v2340_v14 = vadd.f32 %v2339_v37, %v2291_v43  ;;  %v9095_v37 = vand.u32 4294901760, %v7879_v5  ;;  %v7903_v43 = vsub.f32 %v241_v31, %v7876_v0  ;;  %v9403_v31 = vand.u32 4294901760, %v7864_v33 }
 0x1f5   : > { %3426 = vmatpush.msra.mxu0 %v7818_v28  ;;  %3487 = vmatpush.msra.mxu1 %v3486_v41  ;;  %v2444_v48 = vpop.f32.mrf.mxu3  ;;  %v325_v41 = vld [vmem:[#allocation5 + $0x2e0] sm:$0xff]  ;;  %v7930_v7 = vsub.f32 %v238_v11, %v7899_v12  ;;  %v3516_v53 = vand.u32 4294901760, %v3515_v2  ;;  %v9404_v2 = vand.u32 4294901760, %v7895_v54  ;;  %v8008_v47 = vsub.f32 %v313_v58, %v7981_v8 }
 0x1f6   : > { %3583 = vmatpush.msra.mxu2 %v7822_v60  ;;  %3633 = vmatpush.msra.mxu3 %v7777_v10  ;;  %v7905_v50 = vadd.f32 %v2444_v48, %v2340_v14  ;;  %v3521_v14 = vsub.f32 %v7864_v33, %v9403_v31  ;;  %v322_v48 = vld [vmem:[#allocation5 + $0x2c8] sm:$0xff]  ;;  %v7922_v55 = vand.u32 4294901760, %v325_v41  ;;  %v3527_v22 = vsub.f32 %v7879_v5, %v9095_v37 }
 0x1f7   : > { %3428 = vmatpush.msra.mxu0 %v7832_v61  ;;  %3493 = vmatpush.msra.mxu1 %v3492_v52  ;;  %v7938_v52 = vsub.f32 %v328_v15, %v7913_v32  ;;  %v7940_v16 = vand.u32 4294901760, %v322_v48  ;;  %v9406_v62 = vand.u32 4294901760, %v7903_v43  ;;  %v9097_v6 = vand.u32 4294901760, %v7930_v7 }
 0x1f8   : > { %3586 = vmatpush.msra.mxu2 %v7836_v29  ;;  %3635 = vmatpush.msra.mxu3 %v7793_v36  ;;  %v3522_v11 = vand.u32 4294901760, %v3521_v14  ;;  %v3528_v14 = vand.u32 4294901760, %v3527_v22  ;;  %v7967_v22 = vand.u32 4294901760, %v316_v59 }
 0x1f9   : > { %3430 = vmatpush.msra.mxu0 %v7839_v30  ;;  %3499 = vmatpush.msra.mxu1 %v3498_v39  ;;  %v7935_v39 = vsub.f32 %v235_v42, %v7911_v46  ;;  %v3533_v42 = vsub.f32 %v7895_v54, %v9404_v2 }
 0x1fa   : > { %3589 = vmatpush.msra.mxu2 %v7848_v34  ;;  %3637 = vmatpush.msra.mxu3 %v7805_v26 }
 0x1fb   : > { %3432 = vmatpush.msra.mxu0 %v7851_v57  ;;  %3505 = vmatpush.msra.mxu1 %v3504_v44  ;;  %v7949_v44 = vsub.f32 %v325_v41, %v7922_v55  ;;  %v3545_v41 = vsub.f32 %v7930_v7, %v9097_v6  ;;  %v7995_v6 = vsub.f32 %v316_v59, %v7967_v22 }
 0x1fc   : > { %3592 = vmatpush.msra.mxu2 %v7860_v56  ;;  %3639 = vmatpush.msra.mxu3 %v7818_v28  ;;  %v2542_v37 = vpop.f32.mrf.mxu1  ;;  %v2617_v31 = vpop.f32.mrf.mxu2 }
 0x1fd   : > { %3434 = vmatpush.msra.mxu0 %v7871_v18  ;;  %3511 = vmatpush.msra.mxu1 %v3510_v63  ;;  %9405 = vst [vmem:[#allocation93_spill] sm:$0xff] %v7949_v44  ;;  %v2543_v15 = vadd.f32 %v2542_v37, %v2499_v9  ;;  %v3539_v63 = vsub.f32 %v7903_v43, %v9406_v62  ;;  %v3534_v62 = vand.u32 4294901760, %v3533_v42  ;;  %v9408_v42 = vand.u32 4294901760, %v7935_v39 }
 0x1fe   : > { %3595 = vmatpush.msra.mxu2 %v7864_v33  ;;  %3641 = vmatpush.msra.mxu3 %v7832_v61  ;;  %v7963_v37 = vsub.f32 %v322_v48, %v7940_v16  ;;  %v7972_v9 = vsub.f32 %v319_v3, %v7951_v40  ;;  %v9407_v3 = vand.u32 4294901760, %v7938_v52  ;;  %v3546_v59 = vand.u32 4294901760, %v3545_v41 }
 0x1ff   : > { %3436 = vmatpush.msra.mxu0 %v7876_v0  ;;  %3517 = vmatpush.msra.mxu1 %v3516_v53  ;;  %v2618_v2 = vadd.f32 %v2617_v31, %v2543_v15  ;;  %v2658_v23 = vpop.f32.mrf.mxu3  ;;  %v310_v31 = vld [vmem:[#allocation5 + $0x268] sm:$0xff]  ;;  %v3540_v15 = vand.u32 4294901760, %v3539_v63  ;;  %v3856_v58 = vand.u32 4294901760, %v7995_v6 }
 0x200   : > { %3598 = vmatpush.msra.mxu2 %v7879_v5  ;;  %3643 = vmatpush.msra.mxu3 %v7839_v30  ;;  %v9412_v4 = vand.u32 4294901760, %v7963_v37 }
 0x201   : > { %3438 = vmatpush.msra.mxu0 %v7899_v12  ;;  %3523 = vmatpush.msra.mxu1 %v3522_v11  ;;  %v7974_v48 = vadd.f32 %v2658_v23, %v2618_v2  ;;  %v3833_v23 = vsub.f32 %v7938_v52, %v9407_v3  ;;  %v3551_v2 = vsub.f32 %v7935_v39, %v9408_v42  ;;  %v9409_v3 = vand.u32 4294901760, %v7746_v1 }
 0x202   : > { %3601 = vmatpush.msra.mxu2 %v7895_v54  ;;  %3645 = vmatpush.msra.mxu3 %v7851_v57  ;;  %v2503_v11 = vpop.f32.mrf.mxu0  ;;  %v9410_v42 = vand.u32 4294901760, %v7949_v44  ;;  %v8010_v1 = vand.u32 4294901760, %v307_v20 }
 0x203   : > { %3440 = vmatpush.msra.mxu0 %v7911_v46  ;;  %3529 = vmatpush.msra.mxu1 %v3528_v14  ;;  %v2504_v53 = vadd.f32 %v2503_v11, %v7905_v50  ;;  %v7997_v14 = vand.u32 4294901760, %v310_v31  ;;  %v3552_v50 = vand.u32 4294901760, %v3551_v2 }
 0x204   : > { %3604 = vmatpush.msra.mxu2 %v7903_v43  ;;  %3647 = vmatpush.msra.mxu3 %v7871_v18  ;;  %v3839_v63 = vsub.f32 %v7949_v44, %v9410_v42  ;;  %v3834_v42 = vand.u32 4294901760, %v3833_v23  ;;  %v3845_v44 = vsub.f32 %v7963_v37, %v9412_v4  ;;  %v301_v18 = vld [vmem:[#allocation5 + $0x220] sm:$0xff]  ;;  %v9414_v4 = vand.u32 4294901760, %v7972_v9 }
 0x205   : > { %3670 = vmatpush.msrb.mxu0 %v9409_v3  ;;  %3535 = vmatpush.msra.mxu1 %v3534_v62  ;;  %v2548_v11 = vpop.f32.mrf.mxu1  ;;  %v9411_v3 = vand.u32 4294901760, %v7754_v24  ;;  %v8021_v41 = vsub.f32 %v310_v31, %v7997_v14  ;;  %v8023_v24 = vand.u32 4294901760, %v304_v17  ;;  %v3862_v31 = vand.u32 4294901760, %v8008_v47 }
 0x206   : > { %3607 = vmatpush.msra.mxu2 %v7930_v7  ;;  %3649 = vmatpush.msra.mxu3 %v7876_v0  ;;  %v2549_v45 = vadd.f32 %v2548_v11, %v2504_v53  ;;  %v2621_v62 = vpop.f32.mrf.mxu2  ;;  %v3840_v23 = vand.u32 4294901760, %v3839_v63  ;;  %v3851_v2 = vsub.f32 %v7972_v9, %v9414_v4  ;;  %v9415_v63 = vand.u32 4294901760, %v7780_v27 }
 0x207   : > { %3674 = vmatpush.msrb.mxu0 %v9411_v3  ;;  %3541 = vmatpush.msra.mxu1 %v3540_v15  ;;  %v9413_v15 = vand.u32 4294901760, %v7765_v51  ;;  %v298_v3 = vld [vmem:[#allocation5 + $0x208] sm:$0xff]  ;;  %v8038_v51 = vand.u32 4294901760, %v301_v18  ;;  %v9105_v4 = vand.u32 4294901760, %v8021_v41  ;;  %v9416_v27 = vand.u32 4294901760, %v7796_v49 }
 0x208   : > { %3610 = vmatpush.msra.mxu2 %v7935_v39  ;;  %3651 = vmatpush.msra.mxu3 %v7899_v12  ;;  %v2622_v53 = vadd.f32 %v2621_v62, %v2549_v45  ;;  %v8034_v45 = vsub.f32 %v307_v20, %v8010_v1  ;;  %v8048_v20 = vsub.f32 %v304_v17, %v8023_v24 }
 0x209   : > { %3678 = vmatpush.msrb.mxu0 %v9413_v15  ;;  %v2662_v11 = vpop.f32.mrf.mxu3  ;;  %3547 = vmatpush.msra.mxu1 %v3546_v59  ;;  %v3846_v15 = vand.u32 4294901760, %v3845_v44  ;;  %v3857_v59 = vsub.f32 %v7995_v6, %v3856_v58  ;;  %v3852_v44 = vand.u32 4294901760, %v3851_v2  ;;  %v8061_v17 = vsub.f32 %v301_v18, %v8038_v51 }
 0x20a   : > { %3782 = vmatpush.msrb.mxu2 %v7913_v32  ;;  %3653 = vmatpush.msra.mxu3 %v7911_v46  ;;  %v8036_v62 = vadd.f32 %v2662_v11, %v2622_v53  ;;  %v8050_v53 = vand.u32 4294901760, %v298_v3  ;;  %v295_v11 = vld [vmem:[#allocation5 + $0x1f0] sm:$0xff]  ;;  %v3869_v2 = vsub.f32 %v8021_v41, %v9105_v4 }
 0x20b   : > { %3682 = vmatpush.msrb.mxu0 %v9415_v63  ;;  %3553 = vmatpush.msra.mxu1 %v3552_v50  ;;  %v3863_v50 = vsub.f32 %v8008_v47, %v3862_v31  ;;  %v9417_v63 = vand.u32 4294901760, %v7809_v38  ;;  %v8066_v49 = vand.u32 4294901760, %v295_v11  ;;  %v9418_v38 = vand.u32 4294901760, %v7822_v60  ;;  %v286_v60 = vld [vmem:[#allocation5 + $0x1a8] sm:$0xff] }
 0x20c   : > { %3784 = vmatpush.msrb.mxu2 %v7922_v55  ;;  %3835 = vmatpush.msrb.mxu3 %v3834_v42  ;;  %v9106_v42 = vand.u32 4294901760, %v8034_v45  ;;  %v8074_v18 = vsub.f32 %v298_v3, %v8050_v53  ;;  %v9419_v3 = vand.u32 4294901760, %v7836_v29  ;;  %v9420_v29 = vand.u32 4294901760, %v7848_v34 }
 0x20d   : > { %3686 = vmatpush.msrb.mxu0 %v9416_v27  ;;  %3741 = vmatpush.msrb.mxu1 %v7727_v19  ;;  %v292_v19 = vld [vmem:[#allocation5 + $0x1d8] sm:$0xff]  ;;  %v9107_v27 = vand.u32 4294901760, %v8048_v20  ;;  %v9421_v34 = vand.u32 4294901760, %v7860_v56  ;;  %v9422_v56 = vand.u32 4294901760, %v7864_v33 }
 0x20e   : > { %3786 = vmatpush.msrb.mxu2 %v7940_v16  ;;  %3841 = vmatpush.msrb.mxu3 %v3840_v23  ;;  %v3858_v23 = vand.u32 4294901760, %v3857_v59  ;;  %v3875_v59 = vsub.f32 %v8034_v45, %v9106_v42  ;;  %v8084_v4 = vand.u32 4294901760, %v292_v19 }
 0x20f   : > { %3690 = vmatpush.msrb.mxu0 %v9417_v63  ;;  %3743 = vmatpush.msrb.mxu1 %v7734_v25  ;;  %v289_v25 = vld [vmem:[#allocation5 + $0x1c0] sm:$0xff]  ;;  %v3886_v63 = vand.u32 4294901760, %v8061_v17 }
 0x210   : > { %3788 = vmatpush.msrb.mxu2 %v7951_v40  ;;  %3847 = vmatpush.msrb.mxu3 %v3846_v15  ;;  %v3864_v15 = vand.u32 4294901760, %v3863_v50  ;;  %v3881_v50 = vsub.f32 %v8048_v20, %v9107_v27  ;;  %v8097_v42 = vand.u32 4294901760, %v289_v25  ;;  %v283_v27 = vld [vmem:[#allocation5 + $0x190] sm:$0xff] }
 0x211   : > { %3694 = vmatpush.msrb.mxu0 %v9418_v38  ;;  %3745 = vmatpush.msrb.mxu1 %v7743_v35  ;;  %v8090_v35 = vsub.f32 %v295_v11, %v8066_v49  ;;  %v3892_v38 = vand.u32 4294901760, %v8074_v18  ;;  %v3887_v11 = vsub.f32 %v8061_v17, %v3886_v63 }
 0x212   : > { %3790 = vmatpush.msrb.mxu2 %v7967_v22  ;;  %3853 = vmatpush.msrb.mxu3 %v3852_v44  ;;  %v3870_v44 = vand.u32 4294901760, %v3869_v2 }
 0x213   : > { %3698 = vmatpush.msrb.mxu0 %v9419_v3  ;;  %3747 = vmatpush.msrb.mxu1 %v7758_v13  ;;  %v3876_v13 = vand.u32 4294901760, %v3875_v59  ;;  %v8109_v3 = vand.u32 4294901760, %v286_v60  ;;  %v3882_v59 = vand.u32 4294901760, %v3881_v50 }
 0x214   : > { %3792 = vmatpush.msrb.mxu2 %v7981_v8  ;;  %3859 = vmatpush.msrb.mxu3 %v3858_v23  ;;  %v8107_v23 = vsub.f32 %v292_v19, %v8084_v4  ;;  %v3893_v19 = vsub.f32 %v8074_v18, %v3892_v38 }
 0x215   : > { %3702 = vmatpush.msrb.mxu0 %v9420_v29  ;;  %3749 = vmatpush.msrb.mxu1 %v7769_v21  ;;  %v3898_v21 = vand.u32 4294901760, %v8090_v35  ;;  %v8121_v29 = vsub.f32 %v289_v25, %v8097_v42  ;;  %v8131_v50 = vsub.f32 %v286_v60, %v8109_v3 }
 0x216   : > { %3794 = vmatpush.msrb.mxu2 %v7997_v14  ;;  %3865 = vmatpush.msrb.mxu3 %v3864_v15  ;;  %v2703_v2 = vpop.f32.mrf.mxu0  ;;  %v3894_v33 = vand.u32 4294901760, %v3893_v19 }
 0x217   : > { %3706 = vmatpush.msrb.mxu0 %v9421_v34  ;;  %3751 = vmatpush.msrb.mxu1 %v7777_v10  ;;  %v2704_v15 = vadd.f32 %v2703_v2, %v7974_v48  ;;  %v8126_v10 = vand.u32 4294901760, %v283_v27  ;;  %v3888_v48 = vand.u32 4294901760, %v3887_v11  ;;  %v9423_v2 = vand.u32 4294901760, %v7879_v5 }
 0x218   : > { %3796 = vmatpush.msrb.mxu2 %v8010_v1  ;;  %3871 = vmatpush.msrb.mxu3 %v3870_v44  ;;  %v3904_v44 = vand.u32 4294901760, %v8107_v23  ;;  %v3910_v25 = vand.u32 4294901760, %v8121_v29  ;;  %v3916_v60 = vand.u32 4294901760, %v8131_v50  ;;  %v9425_v11 = vand.u32 4294901760, %v7903_v43 }
 0x219   : > { %3710 = vmatpush.msrb.mxu0 %v9422_v56  ;;  %3753 = vmatpush.msrb.mxu1 %v7793_v36  ;;  %v3899_v36 = vsub.f32 %v8090_v35, %v3898_v21  ;;  %v8145_v5 = vsub.f32 %v283_v27, %v8126_v10  ;;  %v9426_v56 = vld [vmem:[#allocation14_spill] sm:$0xff]  ;;  %v9427_v43 = vand.u32 4294901760, %v7930_v7  ;;  %v9430_v7 = vand.u32 4294901760, %v7935_v39  ;;  %v9433_v39 = vld [vmem:[#allocation93_spill] sm:$0xff] }
 0x21a   : > { %3798 = vmatpush.msrb.mxu2 %v8023_v24  ;;  %3877 = vmatpush.msrb.mxu3 %v3876_v13  ;;  %v9424_v13 = vand.u32 4294901760, %v7895_v54 }
 0x21b   : > { %3714 = vmatpush.msrb.mxu0 %v9423_v2  ;;  %3755 = vmatpush.msrb.mxu1 %v7805_v26  ;;  %v3905_v26 = vsub.f32 %v8107_v23, %v3904_v44  ;;  %v3900_v54 = vand.u32 4294901760, %v3899_v36  ;;  %v3917_v36 = vsub.f32 %v8131_v50, %v3916_v60 }
 0x21c   : > { %3800 = vmatpush.msrb.mxu2 %v8038_v51  ;;  %3883 = vmatpush.msrb.mxu3 %v3882_v59 }
 0x21d   : > { %3718 = vmatpush.msrb.mxu0 %v9424_v13  ;;  %3757 = vmatpush.msrb.mxu1 %v7818_v28  ;;  %v3911_v28 = vsub.f32 %v8121_v29, %v3910_v25  ;;  %v3906_v2 = vand.u32 4294901760, %v3905_v26 }
 0x21e   : > { %3802 = vmatpush.msrb.mxu2 %v8050_v53  ;;  %3889 = vmatpush.msrb.mxu3 %v3888_v48 }
 0x21f   : > { %3722 = vmatpush.msrb.mxu0 %v9425_v11  ;;  %3759 = vmatpush.msrb.mxu1 %v7832_v61  ;;  %v2711_v34 = vpop.f32.mrf.mxu0  ;;  %v3922_v61 = vand.u32 4294901760, %v8145_v5  ;;  %v9429_v11 = vld [vmem:[#allocation15_spill] sm:$0xff] }
 0x220   : > { %3804 = vmatpush.msrb.mxu2 %v8066_v49  ;;  %3895 = vmatpush.msrb.mxu3 %v3894_v33  ;;  %v2712_v27 = vadd.f32 %v2711_v34, %v8036_v62  ;;  %v2812_v59 = vpop.f32.mrf.mxu1  ;;  %v2870_v19 = vpop.f32.mrf.mxu2  ;;  %v9428_v62 = vld [vmem:[#allocation18_spill] sm:$0xff]  ;;  %v3918_v34 = vand.u32 4294901760, %v3917_v36 }
 0x221   : > { %3613 = vmatmul.f32.vlgmr.msra.gmra.mxu2 %v9426_v56  ;;  %3726 = vmatpush.msrb.mxu0 %v9427_v43  ;;  %v2813_v48 = vadd.f32 %v2812_v59, %v2704_v15  ;;  %v3912_v15 = vand.u32 4294901760, %v3911_v28  ;;  %v9432_v59 = vld [vmem:[#allocation92_spill] sm:$0xff]  ;;  %v9434_v43 = vld [vmem:[#allocation17_spill] sm:$0xff]  ;;  %v9436_v36 = vld [vmem:[#allocation22_spill] sm:$0xff] }
 0x222   : > { %3761 = vmatpush.msrb.mxu1 %v7839_v30  ;;  %3806 = vmatpush.msrb.mxu2 %v8084_v4  ;;  %v3923_v30 = vsub.f32 %v8145_v5, %v3922_v61 }
 0x223   : > { %3901 = vmatpush.msrb.mxu3 %v3900_v54  ;;  %3446 = vmatmul.f32.vlgmr.msra.gmra.mxu0 %v9428_v62  ;;  %v2871_v33 = vadd.f32 %v2870_v19, %v2813_v48  ;;  %v2914_v13 = vpop.f32.mrf.mxu3  ;;  %v9431_v54 = vld [vmem:[#allocation13_spill] sm:$0xff]  ;;  %v9435_v48 = vand.u32 4294901760, %v7938_v52  ;;  %v9437_v62 = vld [vmem:[#allocation19_spill] sm:$0xff] }
 0x224   : > { %3657 = vmatmul.f32.vlgmr.msra.gmra.mxu3 %v9429_v11  ;;  %3730 = vmatpush.msrb.mxu0 %v9430_v7 }
 0x225   : > { %3763 = vmatpush.msrb.mxu1 %v7851_v57  ;;  %3808 = vmatpush.msrb.mxu2 %v8097_v42  ;;  %v2915_v26 = vadd.f32 %v2914_v13, %v2871_v33  ;;  %v3924_v57 = vand.u32 4294901760, %v3923_v30  ;;  %v9438_v33 = vand.u32 4294901760, %v9433_v39  ;;  %v9441_v13 = vand.u32 4294901760, %v7972_v9 }
 0x226   : > { %3907 = vmatpush.msrb.mxu3 %v3906_v2  ;;  %3555 = vmatmul.f32.vlgmr.msra.gmra.mxu1 %v9431_v54 }
 0x227   : > { %3937 = vmatpush.msra.mxu0 %v7938_v52  ;;  %3765 = vmatpush.msrb.mxu1 %v9432_v59  ;;  %v9440_v52 = vand.u32 4294901760, %v7963_v37  ;;  %v355_v59 = vld [vmem:[#allocation5 + $0x3d0] sm:$0xff] }
 0x228   : > { %3810 = vmatpush.msrb.mxu2 %v8109_v3  ;;  %3913 = vmatpush.msrb.mxu3 %v3912_v15  ;;  %v9449_v15 = vld [vmem:[#allocation21_spill] sm:$0xff] }
 0x229   : > { %3940 = vmatpush.msra.mxu0 %v9433_v39  ;;  %3767 = vmatpush.msrb.mxu1 %v7876_v0  ;;  %v2816_v28 = vpop.f32.mrf.mxu1 }
 0x22a   : > { %3812 = vmatpush.msrb.mxu2 %v8126_v10  ;;  %3919 = vmatpush.msrb.mxu3 %v3918_v34  ;;  %v2817_v19 = vadd.f32 %v2816_v28, %v2712_v27  ;;  %v2875_v56 = vpop.f32.mrf.mxu2 }
 0x22b   : > { %3618 = vmatmul.f32.gmra.mxu2 %v9434_v43  ;;  %3943 = vmatpush.msra.mxu0 %v7963_v37  ;;  %v8327_v43 = vand.u32 4294901760, %v355_v59 }
 0x22c   : > { %4042 = vmatpush.msra.mxu2 %v9435_v48  ;;  %3769 = vmatpush.msrb.mxu1 %v7899_v12  ;;  %v2876_v2 = vadd.f32 %v2875_v56, %v2817_v19  ;;  %v9439_v12 = vld [vmem:[#allocation16_spill] sm:$0xff]  ;;  %v352_v19 = vld [vmem:[#allocation5 + $0x3b8] sm:$0xff] }
 0x22d   : > { %3925 = vmatpush.msrb.mxu3 %v3924_v57  ;;  %3454 = vmatmul.f32.gmra.mxu0 %v9436_v36  ;;  %v2920_v0 = vpop.f32.mrf.mxu3 }
 0x22e   : > { %3663 = vmatmul.f32.gmra.mxu3 %v9437_v62  ;;  %3946 = vmatpush.msra.mxu0 %v7972_v9  ;;  %v2921_v27 = vadd.f32 %v2920_v0, %v2876_v2  ;;  %v376_v9 = vld [vmem:[#allocation5 + $0x478] sm:$0xff]  ;;  %v349_v0 = vld [vmem:[#allocation5 + $0x3a0] sm:$0xff] }
 0x22f   : > { %4046 = vmatpush.msra.mxu2 %v9438_v33  ;;  %4113 = vmatpush.msra.mxu3 %v7913_v32 }
 0x230   : > { %3771 = vmatpush.msrb.mxu1 %v7911_v46  ;;  %3949 = vmatpush.msra.mxu0 %v7995_v6  ;;  %v9442_v46 = vld [vmem:[#allocation12_spill] sm:$0xff] }
 0x231   : > { %3559 = vmatmul.f32.gmra.mxu1 %v9439_v12  ;;  %4050 = vmatpush.msra.mxu2 %v9440_v52  ;;  %v346_v52 = vld [vmem:[#allocation5 + $0x388] sm:$0xff] }
 0x232   : > { %3995 = vmatpush.msra.mxu1 %v7913_v32  ;;  %4115 = vmatpush.msra.mxu3 %v7922_v55  ;;  %v9443_v32 = vld [vmem:[#allocation20_spill] sm:$0xff] }
 0x233   : > { %3952 = vmatpush.msra.mxu0 %v8008_v47  ;;  %4054 = vmatpush.msra.mxu2 %v9441_v13  ;;  %v9446_v47 = vand.u32 4294901760, %v8048_v20  ;;  %v9450_v13 = vld [vmem:[#allocation23_spill] sm:$0xff] }
 0x234   : > { %3997 = vmatpush.msra.mxu1 %v7922_v55  ;;  %4117 = vmatpush.msra.mxu3 %v7940_v16  ;;  %v9444_v55 = vand.u32 4294901760, %v8021_v41 }
 0x235   : > { %3818 = vmatmul.f32.vlgmr.msrb.gmra.mxu2 %v9442_v46  ;;  %3955 = vmatpush.msra.mxu0 %v8021_v41  ;;  %v370_v41 = vld [vmem:[#allocation5 + $0x448] sm:$0xff] }
 0x236   : > { %3999 = vmatpush.msra.mxu1 %v7940_v16  ;;  %4058 = vmatpush.msra.mxu2 %v3856_v58 }
 0x237   : > { %4119 = vmatpush.msra.mxu3 %v7951_v40  ;;  %3732 = vmatmul.f32.vlgmr.msrb.gmra.mxu0 %v9431_v54 }
 0x238   : > { %3927 = vmatmul.f32.vlgmr.msrb.gmra.mxu3 %v9443_v32  ;;  %3958 = vmatpush.msra.mxu0 %v8034_v45 }
 0x239   : > { %4001 = vmatpush.msra.mxu1 %v7951_v40  ;;  %4062 = vmatpush.msra.mxu2 %v3862_v31  ;;  %v9445_v40 = vand.u32 4294901760, %v8034_v45  ;;  %v9447_v45 = vld [vmem:[#allocation27_spill] sm:$0xff] }
 0x23a   : > { %4121 = vmatpush.msra.mxu3 %v7967_v22  ;;  %3773 = vmatmul.f32.vlgmr.msrb.gmra.mxu1 %v9431_v54  ;;  %v2989_v16 = vpop.f32.mrf.mxu0 }
 0x23b   : > { %3961 = vmatpush.msra.mxu0 %v8048_v20  ;;  %4003 = vmatpush.msra.mxu1 %v7967_v22  ;;  %v2990_v6 = vadd.f32 %v2989_v16, %v2915_v26  ;;  %v8247_v22 = vand.u32 4294901760, %v376_v9  ;;  %v358_v26 = vld [vmem:[#allocation5 + $0x3e8] sm:$0xff]  ;;  %v8354_v16 = vsub.f32 %v355_v59, %v8327_v43  ;;  %v9452_v59 = vld [vmem:[#allocation26_spill] sm:$0xff] }
 0x23c   : > { %4066 = vmatpush.msra.mxu2 %v9444_v55  ;;  %4123 = vmatpush.msra.mxu3 %v7981_v8 }
 0x23d   : > { %3964 = vmatpush.msra.mxu0 %v8061_v17  ;;  %4005 = vmatpush.msra.mxu1 %v7981_v8  ;;  %v373_v8 = vld [vmem:[#allocation5 + $0x460] sm:$0xff] }
 0x23e   : > { %4070 = vmatpush.msra.mxu2 %v9445_v40  ;;  %4125 = vmatpush.msra.mxu3 %v7997_v14  ;;  %v8362_v40 = vand.u32 4294901760, %v346_v52 }
 0x23f   : > { %3967 = vmatpush.msra.mxu0 %v8074_v18  ;;  %4007 = vmatpush.msra.mxu1 %v7997_v14  ;;  %v8263_v18 = vsub.f32 %v376_v9, %v8247_v22 }
 0x240   : > { %4074 = vmatpush.msra.mxu2 %v9446_v47  ;;  %4127 = vmatpush.msra.mxu3 %v8010_v1 }
 0x241   : > { %3970 = vmatpush.msra.mxu0 %v8090_v35  ;;  %4009 = vmatpush.msra.mxu1 %v8010_v1 }
 0x242   : > { %4078 = vmatpush.msra.mxu2 %v3886_v63  ;;  %4129 = vmatpush.msra.mxu3 %v8023_v24  ;;  %v367_v63 = vld [vmem:[#allocation5 + $0x430] sm:$0xff] }
 0x243   : > { %3736 = vmatmul.f32.gmra.mxu0 %v9439_v12  ;;  %4011 = vmatpush.msra.mxu1 %v8023_v24  ;;  %v2993_v37 = vpop.f32.mrf.mxu0  ;;  %v8254_v24 = vand.u32 4294901760, %v373_v8  ;;  %v8278_v11 = vand.u32 4294901760, %v367_v63 }
 0x244   : > { %3973 = vmatpush.msra.mxu0 %v8107_v23  ;;  %4082 = vmatpush.msra.mxu2 %v3892_v38  ;;  %v2994_v14 = vadd.f32 %v2993_v37, %v2921_v27  ;;  %v3030_v1 = vpop.f32.mrf.mxu1  ;;  %v3075_v58 = vpop.f32.mrf.mxu2  ;;  %v9448_v38 = vld [vmem:[#allocation24_spill] sm:$0xff] }
 0x245   : > { %4131 = vmatpush.msra.mxu3 %v8038_v51  ;;  %4013 = vmatpush.msra.mxu1 %v8038_v51  ;;  %v3031_v31 = vadd.f32 %v3030_v1, %v2990_v6  ;;  %v8260_v51 = vand.u32 4294901760, %v370_v41  ;;  %v361_v23 = vld [vmem:[#allocation5 + $0x400] sm:$0xff] }
 0x246   : > { %3976 = vmatpush.msra.mxu0 %v8121_v29  ;;  %4086 = vmatpush.msra.mxu2 %v3898_v21  ;;  %v8273_v21 = vsub.f32 %v373_v8, %v8254_v24  ;;  %v340_v8 = vld [vmem:[#allocation5 + $0x358] sm:$0xff] }
 0x247   : > { %4133 = vmatpush.msra.mxu3 %v8050_v53  ;;  %3826 = vmatmul.f32.gmra.mxu2 %v9447_v45  ;;  %v3076_v20 = vadd.f32 %v3075_v58, %v3031_v31  ;;  %v3184_v17 = vpop.f32.mrf.mxu3  ;;  %v8284_v7 = vsub.f32 %v370_v41, %v8260_v51  ;;  %v9115_v58 = vand.u32 4294901760, %v8354_v16  ;;  %v8381_v31 = vand.u32 4294901760, %v340_v8  ;;  %v337_v45 = vld [vmem:[#allocation5 + $0x340] sm:$0xff] }
 0x248   : > { %3979 = vmatpush.msra.mxu0 %v8131_v50  ;;  %4015 = vmatpush.msra.mxu1 %v8050_v53  ;;  %v364_v53 = vld [vmem:[#allocation5 + $0x418] sm:$0xff]  ;;  %v4210_v30 = vand.u32 4294901760, %v8273_v21 }
 0x249   : > { %4090 = vmatpush.msra.mxu2 %v3904_v44  ;;  %4135 = vmatpush.msra.mxu3 %v8066_v49  ;;  %v8268_v35 = vadd.f32 %v3184_v17, %v3076_v20  ;;  %v4204_v44 = vand.u32 4294901760, %v8263_v18  ;;  %v9451_v20 = vld [vmem:[#allocation25_spill] sm:$0xff] }
 0x24a   : > { %3931 = vmatmul.f32.gmra.mxu3 %v9448_v38  ;;  %3982 = vmatpush.msra.mxu0 %v8145_v5  ;;  %v4211_v5 = vsub.f32 %v8273_v21, %v4210_v30 }
 0x24b   : > { %4017 = vmatpush.msra.mxu1 %v8066_v49  ;;  %4094 = vmatpush.msra.mxu2 %v3910_v25  ;;  %v8288_v49 = vand.u32 4294901760, %v364_v53  ;;  %v8293_v25 = vand.u32 4294901760, %v361_v23  ;;  %v4205_v50 = vsub.f32 %v8263_v18, %v4204_v44 }
 0x24c   : > { %4137 = vmatpush.msra.mxu3 %v8084_v4  ;;  %3777 = vmatmul.f32.gmra.mxu1 %v9439_v12  ;;  %v4212_v33 = vand.u32 4294901760, %v4211_v5 }
 0x24d   : > { %3985 = vmatmul.f32.vlgmr.msra.gmra.mxu0 %v9449_v15  ;;  %4019 = vmatpush.msra.mxu1 %v8084_v4  ;;  %v3034_v29 = vpop.f32.mrf.mxu1  ;;  %v8299_v4 = vsub.f32 %v367_v63, %v8278_v11  ;;  %v8313_v57 = vsub.f32 %v364_v53, %v8288_v49  ;;  %v4206_v2 = vand.u32 4294901760, %v4205_v50 }
 0x24e   : > { %4154 = vmatpush.msrb.mxu0 %v8247_v22  ;;  %4098 = vmatpush.msra.mxu2 %v3916_v60  ;;  %v3035_v54 = vadd.f32 %v3034_v29, %v2994_v14  ;;  %v3083_v34 = vpop.f32.mrf.mxu2  ;;  %v4216_v60 = vand.u32 4294901760, %v8284_v7 }
 0x24f   : > { %4139 = vmatpush.msra.mxu3 %v8097_v42  ;;  %4021 = vmatpush.msra.mxu1 %v8097_v42  ;;  %v8310_v42 = vand.u32 4294901760, %v358_v26  ;;  %v4222_v48 = vand.u32 4294901760, %v8299_v4  ;;  %v9120_v62 = vand.u32 4294901760, %v8313_v57 }
 0x250   : > { %4156 = vmatpush.msrb.mxu0 %v8254_v24  ;;  %4102 = vmatpush.msra.mxu2 %v3922_v61  ;;  %v3084_v39 = vadd.f32 %v3083_v34, %v3035_v54  ;;  %v8321_v61 = vsub.f32 %v361_v23, %v8293_v25  ;;  %v4217_v36 = vsub.f32 %v8284_v7, %v4216_v60  ;;  %v8401_v34 = vand.u32 4294901760, %v337_v45 }
 0x251   : > { %4141 = vmatpush.msra.mxu3 %v8109_v3  ;;  %4104 = vmatmul.f32.vlgmr.msra.gmra.mxu2 %v9443_v32  ;;  %v3188_v28 = vpop.f32.mrf.mxu3  ;;  %v8341_v27 = vsub.f32 %v358_v26, %v8310_v42  ;;  %v4223_v46 = vsub.f32 %v8299_v4, %v4222_v48  ;;  %v4229_v55 = vsub.f32 %v8313_v57, %v9120_v62 }
 0x252   : > { %4158 = vmatpush.msrb.mxu0 %v8260_v51  ;;  %4309 = vmatpush.msrb.mxu2 %v8263_v18  ;;  %v8323_v56 = vadd.f32 %v3188_v28, %v3084_v39  ;;  %v9118_v12 = vand.u32 4294901760, %v8321_v61  ;;  %v4218_v6 = vand.u32 4294901760, %v4217_v36  ;;  %v8390_v23 = vsub.f32 %v346_v52, %v8362_v40  ;;  %v334_v39 = vld [vmem:[#allocation5 + $0x328] sm:$0xff]  ;;  %v424_v36 = vld [vmem:[#allocation5 + $0x5f8] sm:$0xff]  ;;  %v403_v18 = vld [vmem:[#allocation5 + $0x550] sm:$0xff] }
 0x253   : > { %4023 = vmatpush.msra.mxu1 %v8109_v3  ;;  %4143 = vmatpush.msra.mxu3 %v8126_v10  ;;  %v8337_v3 = vand.u32 4294901760, %v352_v19  ;;  %v9117_v47 = vand.u32 4294901760, %v8341_v27  ;;  %v4224_v1 = vand.u32 4294901760, %v4223_v46  ;;  %v4230_v17 = vand.u32 4294901760, %v4229_v55 }
 0x254   : > { %4145 = vmatmul.f32.vlgmr.msra.gmra.mxu3 %v9443_v32  ;;  %4160 = vmatpush.msrb.mxu0 %v8278_v11  ;;  %v8351_v32 = vand.u32 4294901760, %v349_v0  ;;  %v4235_v37 = vsub.f32 %v8321_v61, %v9118_v12  ;;  %v4247_v54 = vsub.f32 %v8354_v16, %v9115_v58  ;;  %v8408_v28 = vsub.f32 %v340_v8, %v8381_v31 }
 0x255   : > { %4312 = vmatpush.msrb.mxu2 %v8273_v21  ;;  %4367 = vmatpush.msrb.mxu3 %v8247_v22  ;;  %v8366_v9 = vsub.f32 %v352_v19, %v8337_v3  ;;  %v4241_v63 = vsub.f32 %v8341_v27, %v9117_v47  ;;  %v8422_v52 = vand.u32 4294901760, %v334_v39  ;;  %v8425_v46 = vsub.f32 %v337_v45, %v8401_v34  ;;  %v421_v45 = vld [vmem:[#allocation5 + $0x5e0] sm:$0xff] }
 0x256   : > { %4025 = vmatpush.msra.mxu1 %v8126_v10  ;;  %4162 = vmatpush.msrb.mxu0 %v8288_v49  ;;  %v343_v10 = vld [vmem:[#allocation5 + $0x370] sm:$0xff]  ;;  %v8378_v41 = vsub.f32 %v349_v0, %v8351_v32  ;;  %v4236_v15 = vand.u32 4294901760, %v4235_v37  ;;  %v4248_v0 = vand.u32 4294901760, %v4247_v54  ;;  %v8434_v8 = vand.u32 4294901760, %v424_v36  ;;  %v418_v54 = vld [vmem:[#allocation5 + $0x5c8] sm:$0xff] }
 0x257   : > { %4029 = vmatmul.f32.vlgmr.msra.gmra.mxu1 %v9450_v13  ;;  %4315 = vmatpush.msrb.mxu2 %v8284_v7  ;;  %v8372_v14 = vand.u32 4294901760, %v343_v10  ;;  %v9114_v53 = vand.u32 4294901760, %v8366_v9  ;;  %v4242_v5 = vand.u32 4294901760, %v4241_v63  ;;  %v331_v13 = vld [vmem:[#allocation5 + $0x310] sm:$0xff]  ;;  %v9111_v63 = vand.u32 4294901760, %v8425_v46 }
 0x258   : > { %4207 = vmatpush.msrb.mxu1 %v4206_v2  ;;  %4369 = vmatpush.msrb.mxu3 %v8254_v24  ;;  %v9112_v50 = vand.u32 4294901760, %v8378_v41  ;;  %v9110_v2 = vand.u32 4294901760, %v8390_v23  ;;  %v8438_v37 = vand.u32 4294901760, %v331_v13 }
 0x259   : > { %4164 = vmatpush.msrb.mxu0 %v8293_v25  ;;  %4318 = vmatpush.msrb.mxu2 %v8299_v4  ;;  %v8395_v29 = vsub.f32 %v343_v10, %v8372_v14  ;;  %v4253_v19 = vsub.f32 %v8366_v9, %v9114_v53  ;;  %v9109_v10 = vand.u32 4294901760, %v8408_v28 }
 0x25a   : > { %4213 = vmatpush.msrb.mxu1 %v4212_v33  ;;  %4371 = vmatpush.msrb.mxu3 %v8260_v51  ;;  %v4259_v33 = vsub.f32 %v8378_v41, %v9112_v50  ;;  %v4265_v55 = vsub.f32 %v8390_v23, %v9110_v2  ;;  %v8463_v2 = vsub.f32 %v331_v13, %v8438_v37 }
 0x25b   : > { %4108 = vmatmul.f32.gmra.mxu2 %v9448_v38  ;;  %4166 = vmatpush.msrb.mxu0 %v8310_v42 }
 0x25c   : > { %4219 = vmatpush.msrb.mxu1 %v4218_v6  ;;  %4321 = vmatpush.msrb.mxu2 %v8313_v57  ;;  %v4254_v6 = vand.u32 4294901760, %v4253_v19 }
 0x25d   : > { %4373 = vmatpush.msrb.mxu3 %v8278_v11  ;;  %3990 = vmatmul.f32.gmra.mxu0 %v9451_v20  ;;  %v4260_v20 = vand.u32 4294901760, %v4259_v33  ;;  %v8458_v33 = vand.u32 4294901760, %v421_v45 }
 0x25e   : > { %4149 = vmatmul.f32.gmra.mxu3 %v9448_v38  ;;  %4168 = vmatpush.msrb.mxu0 %v8327_v43  ;;  %v3242_v26 = vpop.f32.mrf.mxu0 }
 0x25f   : > { %4225 = vmatpush.msrb.mxu1 %v4224_v1  ;;  %4324 = vmatpush.msrb.mxu2 %v8321_v61  ;;  %v3243_v38 = vadd.f32 %v3242_v26, %v8268_v35  ;;  %v9108_v35 = vand.u32 4294901760, %v8395_v29  ;;  %v4277_v26 = vsub.f32 %v8408_v28, %v9109_v10 }
 0x260   : > { %4375 = vmatpush.msrb.mxu3 %v8288_v49  ;;  %4035 = vmatmul.f32.gmra.mxu1 %v9452_v59 }
 0x261   : > { %4170 = vmatpush.msrb.mxu0 %v8337_v3  ;;  %4231 = vmatpush.msrb.mxu1 %v4230_v17  ;;  %v4271_v1 = vsub.f32 %v8395_v29, %v9108_v35  ;;  %v8445_v17 = vsub.f32 %v334_v39, %v8422_v52  ;;  %v4266_v39 = vand.u32 4294901760, %v4265_v55  ;;  %v8470_v55 = vand.u32 4294901760, %v418_v54 }
 0x262   : > { %4327 = vmatpush.msrb.mxu2 %v8341_v27  ;;  %4377 = vmatpush.msrb.mxu3 %v8293_v25  ;;  %v4278_v13 = vand.u32 4294901760, %v4277_v26 }
 0x263   : > { %4172 = vmatpush.msrb.mxu0 %v8351_v32  ;;  %4237 = vmatpush.msrb.mxu1 %v4236_v15  ;;  %v4272_v10 = vand.u32 4294901760, %v4271_v1  ;;  %v412_v1 = vld [vmem:[#allocation5 + $0x598] sm:$0xff] }
 0x264   : > { %4330 = vmatpush.msrb.mxu2 %v8354_v16  ;;  %4379 = vmatpush.msrb.mxu3 %v8310_v42 }
 0x265   : > { %4174 = vmatpush.msrb.mxu0 %v8362_v40  ;;  %4243 = vmatpush.msrb.mxu1 %v4242_v5 }
 0x266   : > { %4333 = vmatpush.msrb.mxu2 %v8366_v9  ;;  %4381 = vmatpush.msrb.mxu3 %v8327_v43 }
 0x267   : > { %4176 = vmatpush.msrb.mxu0 %v8372_v14  ;;  %4249 = vmatpush.msrb.mxu1 %v4248_v0  ;;  %v3247_v15 = vpop.f32.mrf.mxu0  ;;  %v8456_v0 = vsub.f32 %v424_v36, %v8434_v8  ;;  %v4283_v36 = vsub.f32 %v8425_v46, %v9111_v63 }
 0x268   : > { %4336 = vmatpush.msrb.mxu2 %v8378_v41  ;;  %4383 = vmatpush.msrb.mxu3 %v8337_v3  ;;  %v3248_v59 = vadd.f32 %v3247_v15, %v8323_v56  ;;  %v3286_v5 = vpop.f32.mrf.mxu1  ;;  %v3361_v19 = vpop.f32.mrf.mxu2  ;;  %v415_v56 = vld [vmem:[#allocation5 + $0x5b0] sm:$0xff] }
 0x269   : > { %4178 = vmatpush.msrb.mxu0 %v8381_v31  ;;  %4255 = vmatpush.msrb.mxu1 %v4254_v6  ;;  %v3287_v35 = vadd.f32 %v3286_v5, %v3243_v38  ;;  %v9113_v6 = vand.u32 4294901760, %v8445_v17  ;;  %v8477_v5 = vsub.f32 %v421_v45, %v8458_v33  ;;  %v8479_v63 = vand.u32 4294901760, %v415_v56 }
 0x26a   : > { %4339 = vmatpush.msrb.mxu2 %v8390_v23  ;;  %4385 = vmatpush.msrb.mxu3 %v8351_v32  ;;  %v4284_v26 = vand.u32 4294901760, %v4283_v36  ;;  %v8491_v45 = vsub.f32 %v418_v54, %v8470_v55  ;;  %v406_v54 = vld [vmem:[#allocation5 + $0x568] sm:$0xff] }
 0x26b   : > { %4180 = vmatpush.msrb.mxu0 %v8401_v34  ;;  %4261 = vmatpush.msrb.mxu1 %v4260_v20  ;;  %v3362_v38 = vadd.f32 %v3361_v19, %v3287_v35  ;;  %v3402_v15 = vpop.f32.mrf.mxu3  ;;  %v9116_v20 = vand.u32 4294901760, %v8456_v0  ;;  %v9119_v35 = vand.u32 4294901760, %v8463_v2  ;;  %v4289_v19 = vsub.f32 %v8445_v17, %v9113_v6 }
 0x26c   : > { %4342 = vmatpush.msrb.mxu2 %v8395_v29  ;;  %4387 = vmatpush.msrb.mxu3 %v8362_v40  ;;  %v9123_v36 = vand.u32 4294901760, %v8477_v5  ;;  %v8503_v6 = vsub.f32 %v415_v56, %v8479_v63  ;;  %v9121_v47 = vand.u32 4294901760, %v8491_v45 }
 0x26d   : > { %4182 = vmatpush.msrb.mxu0 %v8422_v52  ;;  %4267 = vmatpush.msrb.mxu1 %v4266_v39  ;;  %v8481_v50 = vadd.f32 %v3402_v15, %v3362_v38  ;;  %v8493_v39 = vand.u32 4294901760, %v412_v1  ;;  %v409_v38 = vld [vmem:[#allocation5 + $0x580] sm:$0xff]  ;;  %v9453_v15 = vld [vmem:[#allocation34_spill] sm:$0xff]  ;;  %v4290_v56 = vand.u32 4294901760, %v4289_v19 }
 0x26e   : > { %4345 = vmatpush.msrb.mxu2 %v8408_v28  ;;  %4389 = vmatpush.msrb.mxu3 %v8372_v14  ;;  %v400_v19 = vld [vmem:[#allocation5 + $0x538] sm:$0xff] }
 0x26f   : > { %4184 = vmatpush.msrb.mxu0 %v8438_v37  ;;  %4273 = vmatpush.msrb.mxu1 %v4272_v10  ;;  %v4577_v10 = vsub.f32 %v8456_v0, %v9116_v20  ;;  %v8516_v12 = vsub.f32 %v412_v1, %v8493_v39  ;;  %v9122_v1 = vand.u32 4294901760, %v8503_v6 }
 0x270   : > { %4348 = vmatpush.msrb.mxu2 %v8425_v46  ;;  %4391 = vmatpush.msrb.mxu3 %v8381_v31 }
 0x271   : > { %4190 = vmatmul.f32.vlgmr.msrb.gmra.mxu0 %v9453_v15  ;;  %4279 = vmatpush.msrb.mxu1 %v4278_v13  ;;  %v3292_v53 = vpop.f32.mrf.mxu1  ;;  %v4295_v13 = vsub.f32 %v8463_v2, %v9119_v35  ;;  %v8511_v15 = vand.u32 4294901760, %v409_v38  ;;  %v9124_v7 = vand.u32 4294901760, %v8516_v12 }
 0x272   : > { %4414 = vmatpush.msra.mxu0 %v4204_v44  ;;  %4351 = vmatpush.msrb.mxu2 %v8445_v17  ;;  %v3293_v58 = vadd.f32 %v3292_v53, %v3248_v59  ;;  %v3365_v20 = vpop.f32.mrf.mxu2  ;;  %v8521_v44 = vand.u32 4294901760, %v406_v54  ;;  %v9454_v53 = vld [vmem:[#allocation29_spill] sm:$0xff]  ;;  %v4578_v59 = vand.u32 4294901760, %v4577_v10  ;;  %v4589_v10 = vsub.f32 %v8491_v45, %v9121_v47  ;;  %v9457_v47 = vld [vmem:[#allocation36_spill] sm:$0xff] }
 0x273   : > { %4393 = vmatpush.msrb.mxu3 %v8401_v34  ;;  %4285 = vmatpush.msrb.mxu1 %v4284_v26  ;;  %v4583_v26 = vsub.f32 %v8477_v5, %v9123_v36  ;;  %v4296_v21 = vand.u32 4294901760, %v4295_v13  ;;  %v4595_v13 = vsub.f32 %v8503_v6, %v9122_v1  ;;  %v4601_v1 = vsub.f32 %v8516_v12, %v9124_v7 }
 0x274   : > { %4418 = vmatpush.msra.mxu0 %v4210_v30  ;;  %4354 = vmatpush.msrb.mxu2 %v8463_v2  ;;  %v3366_v35 = vadd.f32 %v3365_v20, %v3293_v58  ;;  %v8533_v30 = vsub.f32 %v409_v38, %v8511_v15  ;;  %v8535_v58 = vand.u32 4294901760, %v403_v18  ;;  %v8548_v38 = vsub.f32 %v406_v54, %v8521_v44 }
 0x275   : > { %4395 = vmatpush.msrb.mxu3 %v8422_v52  ;;  %4357 = vmatmul.f32.vlgmr.msrb.gmra.mxu2 %v9454_v53  ;;  %v3406_v62 = vpop.f32.mrf.mxu3  ;;  %v9456_v53 = vld [vmem:[#allocation30_spill] sm:$0xff] }
 0x276   : > { %4422 = vmatpush.msra.mxu0 %v4216_v60  ;;  %4526 = vmatpush.msra.mxu2 %v8434_v8  ;;  %v8537_v20 = vadd.f32 %v3406_v62, %v3366_v35  ;;  %v397_v60 = vld [vmem:[#allocation5 + $0x520] sm:$0xff]  ;;  %v8550_v62 = vand.u32 4294901760, %v400_v19  ;;  %v4584_v35 = vand.u32 4294901760, %v4583_v26  ;;  %v9125_v4 = vand.u32 4294901760, %v8533_v30 }
 0x277   : > { %4291 = vmatpush.msrb.mxu1 %v4290_v56  ;;  %4397 = vmatpush.msrb.mxu3 %v8438_v37  ;;  %v394_v56 = vld [vmem:[#allocation5 + $0x508] sm:$0xff]  ;;  %v8561_v54 = vand.u32 4294901760, %v397_v60  ;;  %v4590_v26 = vand.u32 4294901760, %v4589_v10  ;;  %v4596_v10 = vand.u32 4294901760, %v4595_v13  ;;  %v9462_v13 = vand.u32 4294901760, %v8341_v27 }
 0x278   : > { %9455 = vst [vmem:[#allocation14_spill] sm:$0xff] %v8537_v20  ;;  %4401 = vmatmul.f32.vlgmr.msrb.gmra.mxu3 %v9456_v53  ;;  %4426 = vmatpush.msra.mxu0 %v4222_v48  ;;  %v8559_v48 = vsub.f32 %v403_v18, %v8535_v58  ;;  %v9458_v53 = vld [vmem:[#allocation28_spill] sm:$0xff]  ;;  %v8573_v18 = vsub.f32 %v400_v19, %v8550_v62  ;;  %v8575_v36 = vand.u32 4294901760, %v394_v56  ;;  %v9465_v27 = vand.u32 4294901760, %v8354_v16  ;;  %v9467_v16 = vld [vmem:[#allocation31_spill] sm:$0xff] }
 0x279   : > { %4528 = vmatpush.msra.mxu2 %v8458_v33  ;;  %4579 = vmatpush.msra.mxu3 %v4578_v59  ;;  %v9459_v59 = vand.u32 4294901760, %v8313_v57  ;;  %v9460_v57 = vand.u32 4294901760, %v8321_v61  ;;  %v8586_v19 = vsub.f32 %v397_v60, %v8561_v54  ;;  %v9461_v61 = vld [vmem:[#allocation32_spill] sm:$0xff] }
 0x27a   : > { %4297 = vmatpush.msrb.mxu1 %v4296_v21  ;;  %4198 = vmatmul.f32.gmra.mxu0 %v9457_v47  ;;  %v391_v21 = vld [vmem:[#allocation5 + $0x4f0] sm:$0xff]  ;;  %v8599_v60 = vsub.f32 %v394_v56, %v8575_v36 }
 0x27b   : > { %4299 = vmatmul.f32.vlgmr.msrb.gmra.mxu1 %v9458_v53  ;;  %4430 = vmatpush.msra.mxu0 %v9459_v59  ;;  %v388_v59 = vld [vmem:[#allocation5 + $0x4d8] sm:$0xff]  ;;  %v8588_v47 = vand.u32 4294901760, %v391_v21 }
 0x27c   : > { %4485 = vmatpush.msra.mxu1 %v8247_v22  ;;  %4530 = vmatpush.msra.mxu2 %v8470_v55  ;;  %v4607_v22 = vsub.f32 %v8533_v30, %v9125_v4  ;;  %v8601_v7 = vand.u32 4294901760, %v388_v59  ;;  %v382_v4 = vld [vmem:[#allocation5 + $0x4a8] sm:$0xff] }
 0x27d   : > { %4585 = vmatpush.msra.mxu3 %v4584_v35  ;;  %4434 = vmatpush.msra.mxu0 %v9460_v57  ;;  %v4602_v35 = vand.u32 4294901760, %v4601_v1  ;;  %v9464_v1 = vld [vmem:[#allocation35_spill] sm:$0xff]  ;;  %v8612_v56 = vsub.f32 %v391_v21, %v8588_v47  ;;  %v8629_v20 = vand.u32 4294901760, %v382_v4 }
 0x27e   : > { %4487 = vmatpush.msra.mxu1 %v8254_v24  ;;  %4532 = vmatpush.msra.mxu2 %v8479_v63  ;;  %v9463_v24 = vand.u32 4294901760, %v8548_v38  ;;  %v8624_v21 = vsub.f32 %v388_v59, %v8601_v7  ;;  %v9471_v59 = vand.u32 4294901760, %v8378_v41  ;;  %v9473_v41 = vand.u32 4294901760, %v8390_v23 }
 0x27f   : > { %4591 = vmatpush.msra.mxu3 %v4590_v26  ;;  %4362 = vmatmul.f32.gmra.mxu2 %v9461_v61  ;;  %v385_v26 = vld [vmem:[#allocation5 + $0x4c0] sm:$0xff]  ;;  %v9466_v61 = vand.u32 4294901760, %v8559_v48 }
 0x280   : > { %4438 = vmatpush.msra.mxu0 %v9462_v13  ;;  %4489 = vmatpush.msra.mxu1 %v8260_v51  ;;  %v4613_v57 = vsub.f32 %v8548_v38, %v9463_v24  ;;  %v4608_v51 = vand.u32 4294901760, %v4607_v22  ;;  %v379_v24 = vld [vmem:[#allocation5 + $0x490] sm:$0xff] }
 0x281   : > { %4534 = vmatpush.msra.mxu2 %v8493_v39  ;;  %4597 = vmatpush.msra.mxu3 %v4596_v10  ;;  %v4619_v13 = vsub.f32 %v8559_v48, %v9466_v61  ;;  %v8616_v10 = vand.u32 4294901760, %v385_v26  ;;  %v4642_v61 = vand.u32 4294901760, %v8612_v56 }
 0x282   : > { %4407 = vmatmul.f32.gmra.mxu3 %v9464_v1  ;;  %4442 = vmatpush.msra.mxu0 %v9465_v27  ;;  %v4614_v22 = vand.u32 4294901760, %v4613_v57  ;;  %v9468_v1 = vand.u32 4294901760, %v8573_v18  ;;  %v9470_v57 = vand.u32 4294901760, %v8586_v19 }
 0x283   : > { %4491 = vmatpush.msra.mxu1 %v8278_v11  ;;  %4536 = vmatpush.msra.mxu2 %v8511_v15  ;;  %v9469_v11 = vand.u32 4294901760, %v8366_v9  ;;  %v8640_v9 = vsub.f32 %v385_v26, %v8616_v10 }
 0x284   : > { %4603 = vmatpush.msra.mxu3 %v4602_v35  ;;  %4303 = vmatmul.f32.gmra.mxu1 %v9467_v16  ;;  %v4625_v27 = vsub.f32 %v8573_v18, %v9468_v1  ;;  %v4620_v35 = vand.u32 4294901760, %v4619_v13  ;;  %v4631_v1 = vsub.f32 %v8586_v19, %v9470_v57  ;;  %v9472_v13 = vand.u32 4294901760, %v8599_v60 }
 0x285   : > { %4446 = vmatpush.msra.mxu0 %v9469_v11  ;;  %4493 = vmatpush.msra.mxu1 %v8288_v49  ;;  %v8642_v49 = vand.u32 4294901760, %v379_v24  ;;  %v4648_v57 = vand.u32 4294901760, %v8624_v21  ;;  %v4654_v23 = vand.u32 4294901760, %v8640_v9 }
 0x286   : > { %4538 = vmatpush.msra.mxu2 %v8521_v44  ;;  %4609 = vmatpush.msra.mxu3 %v4608_v51  ;;  %v4626_v51 = vand.u32 4294901760, %v4625_v27  ;;  %v4637_v11 = vsub.f32 %v8599_v60, %v9472_v13  ;;  %v4632_v26 = vand.u32 4294901760, %v4631_v1  ;;  %v9474_v27 = vand.u32 4294901760, %v8395_v29 }
 0x287   : > { %4450 = vmatpush.msra.mxu0 %v9471_v59  ;;  %4495 = vmatpush.msra.mxu1 %v8293_v25  ;;  %v8653_v25 = vsub.f32 %v382_v4, %v8629_v20  ;;  %v9475_v1 = vand.u32 4294901760, %v8408_v28  ;;  %v4655_v59 = vsub.f32 %v8640_v9, %v4654_v23 }
 0x288   : > { %4540 = vmatpush.msra.mxu2 %v8535_v58  ;;  %4615 = vmatpush.msra.mxu3 %v4614_v22  ;;  %v4643_v22 = vsub.f32 %v8612_v56, %v4642_v61  ;;  %v4638_v4 = vand.u32 4294901760, %v4637_v11  ;;  %v9481_v11 = vld [vmem:[#allocation37_spill] sm:$0xff] }
 0x289   : > { %4454 = vmatpush.msra.mxu0 %v9473_v41  ;;  %4497 = vmatpush.msra.mxu1 %v8310_v42  ;;  %v8664_v42 = vsub.f32 %v379_v24, %v8642_v49  ;;  %v9476_v24 = vand.u32 4294901760, %v8425_v46  ;;  %v4656_v13 = vand.u32 4294901760, %v4655_v59 }
 0x28a   : > { %4542 = vmatpush.msra.mxu2 %v8550_v62  ;;  %4621 = vmatpush.msra.mxu3 %v4620_v35  ;;  %v4649_v35 = vsub.f32 %v8624_v21, %v4648_v57  ;;  %v4644_v29 = vand.u32 4294901760, %v4643_v22  ;;  %v9506_v22 = vld [vmem:[#allocation52_spill] sm:$0xff] }
 0x28b   : > { %4458 = vmatpush.msra.mxu0 %v9474_v27  ;;  %4499 = vmatpush.msra.mxu1 %v8327_v43  ;;  %v4660_v43 = vand.u32 4294901760, %v8653_v25  ;;  %v4666_v28 = vand.u32 4294901760, %v8664_v42 }
 0x28c   : > { %4544 = vmatpush.msra.mxu2 %v8561_v54  ;;  %4627 = vmatpush.msra.mxu3 %v4626_v51  ;;  %v9477_v51 = vand.u32 4294901760, %v8445_v17 }
 0x28d   : > { %4462 = vmatpush.msra.mxu0 %v9475_v1  ;;  %4501 = vmatpush.msra.mxu1 %v8337_v3  ;;  %v4650_v3 = vand.u32 4294901760, %v4649_v35  ;;  %v4661_v46 = vsub.f32 %v8653_v25, %v4660_v43  ;;  %v4667_v17 = vsub.f32 %v8664_v42, %v4666_v28  ;;  %v9507_v35 = vld [vmem:[#allocation56_spill] sm:$0xff] }
 0x28e   : > { %4546 = vmatpush.msra.mxu2 %v8575_v36  ;;  %4633 = vmatpush.msra.mxu3 %v4632_v26 }
 0x28f   : > { %4466 = vmatpush.msra.mxu0 %v9476_v24  ;;  %4503 = vmatpush.msra.mxu1 %v8351_v32  ;;  %v9478_v32 = vand.u32 4294901760, %v8463_v2  ;;  %v9479_v2 = vld [vmem:[#allocation42_spill] sm:$0xff]  ;;  %v9509_v24 = vld [vmem:[#allocation57_spill] sm:$0xff] }
 0x290   : > { %4548 = vmatpush.msra.mxu2 %v8588_v47  ;;  %4639 = vmatpush.msra.mxu3 %v4638_v4 }
 0x291   : > { %4470 = vmatpush.msra.mxu0 %v9477_v51  ;;  %4505 = vmatpush.msra.mxu1 %v8362_v40  ;;  %v4662_v40 = vand.u32 4294901760, %v4661_v46 }
 0x292   : > { %4550 = vmatpush.msra.mxu2 %v8601_v7  ;;  %4645 = vmatpush.msra.mxu3 %v4644_v29 }
 0x293   : > { %4474 = vmatpush.msra.mxu0 %v9478_v32  ;;  %4507 = vmatpush.msra.mxu1 %v8372_v14  ;;  %v4668_v14 = vand.u32 4294901760, %v4667_v17 }
 0x294   : > { %4552 = vmatpush.msra.mxu2 %v8616_v10  ;;  %4651 = vmatpush.msra.mxu3 %v4650_v3  ;;  %v9510_v3 = vld [vmem:[#allocation54_spill] sm:$0xff] }
 0x295   : > { %4476 = vmatmul.f32.vlgmr.msra.gmra.mxu0 %v9458_v53  ;;  %4509 = vmatpush.msra.mxu1 %v8381_v31  ;;  %v9480_v31 = vand.u32 4294901760, %v8456_v0 }
 0x296   : > { %4681 = vmatpush.msrb.mxu0 %v8456_v0  ;;  %4554 = vmatpush.msra.mxu2 %v8629_v20  ;;  %v9484_v0 = vand.u32 4294901760, %v8503_v6 }
 0x297   : > { %4657 = vmatpush.msra.mxu3 %v4656_v13  ;;  %4511 = vmatpush.msra.mxu1 %v8401_v34  ;;  %v9482_v34 = vand.u32 4294901760, %v8477_v5  ;;  %v9511_v13 = vld [vmem:[#allocation58_spill] sm:$0xff] }
 0x298   : > { %4684 = vmatpush.msrb.mxu0 %v8477_v5  ;;  %4556 = vmatpush.msra.mxu2 %v8642_v49  ;;  %v9487_v5 = vld [vmem:[#allocation40_spill] sm:$0xff] }
 0x299   : > { %4663 = vmatpush.msra.mxu3 %v4662_v40  ;;  %4562 = vmatmul.f32.vlgmr.msra.gmra.mxu2 %v9479_v2 }
 0x29a   : > { %4687 = vmatpush.msrb.mxu0 %v8491_v45  ;;  %4786 = vmatpush.msrb.mxu2 %v9480_v31 }
 0x29b   : > { %4513 = vmatpush.msra.mxu1 %v8422_v52  ;;  %4669 = vmatpush.msra.mxu3 %v4668_v14  ;;  %v9483_v52 = vand.u32 4294901760, %v8491_v45  ;;  %v9493_v45 = vand.u32 4294901760, %v8599_v60  ;;  %v9512_v14 = vld [vmem:[#allocation55_spill] sm:$0xff] }
 0x29c   : > { %4671 = vmatmul.f32.vlgmr.msra.gmra.mxu3 %v9481_v11  ;;  %4690 = vmatpush.msrb.mxu0 %v8503_v6  ;;  %v9491_v6 = vand.u32 4294901760, %v8573_v18 }
 0x29d   : > { %4790 = vmatpush.msrb.mxu2 %v9482_v34  ;;  %4857 = vmatpush.msrb.mxu3 %v8434_v8  ;;  %v9513_v34 = vld [vmem:[#allocation60_spill] sm:$0xff] }
 0x29e   : > { %4515 = vmatpush.msra.mxu1 %v8438_v37  ;;  %4480 = vmatmul.f32.gmra.mxu0 %v9467_v16  ;;  %v9485_v37 = vld [vmem:[#allocation44_spill] sm:$0xff] }
 0x29f   : > { %4517 = vmatmul.f32.vlgmr.msra.gmra.mxu1 %v9458_v53  ;;  %4693 = vmatpush.msrb.mxu0 %v8516_v12  ;;  %v9500_v53 = vld [vmem:[#allocation45_spill] sm:$0xff] }
 0x2a0   : > { %4739 = vmatpush.msrb.mxu1 %v8434_v8  ;;  %4794 = vmatpush.msrb.mxu2 %v9483_v52  ;;  %v9486_v8 = vand.u32 4294901760, %v8516_v12  ;;  %v9489_v12 = vand.u32 4294901760, %v8548_v38 }
 0x2a1   : > { %4859 = vmatpush.msrb.mxu3 %v8458_v33  ;;  %4696 = vmatpush.msrb.mxu0 %v8533_v30 }
 0x2a2   : > { %4741 = vmatpush.msrb.mxu1 %v8458_v33  ;;  %4798 = vmatpush.msrb.mxu2 %v9484_v0  ;;  %v9488_v33 = vand.u32 4294901760, %v8533_v30  ;;  %v5250_v30 = vld [vmem:[#allocation7] sm:$0x7] }
 0x2a3   : > { %4861 = vmatpush.msrb.mxu3 %v8470_v55  ;;  %4570 = vmatmul.f32.gmra.mxu2 %v9485_v37  ;;  %v429_v46 = vperm.slane %v5250_v30, 2  ;;  %v9514_v0 = vld [vmem:[#allocation59_spill] sm:$0xff] }
 0x2a4   : > { %4699 = vmatpush.msrb.mxu0 %v8548_v38  ;;  %4743 = vmatpush.msrb.mxu1 %v8470_v55  ;;  %v9492_v55 = vand.u32 4294901760, %v8586_v19 }
 0x2a5   : > { %4802 = vmatpush.msrb.mxu2 %v9486_v8  ;;  %4863 = vmatpush.msrb.mxu3 %v8479_v63 }
 0x2a6   : > { %4675 = vmatmul.f32.gmra.mxu3 %v9487_v5  ;;  %4702 = vmatpush.msrb.mxu0 %v8559_v48 }
 0x2a7   : > { %4745 = vmatpush.msrb.mxu1 %v8479_v63  ;;  %4806 = vmatpush.msrb.mxu2 %v9488_v33  ;;  %v9490_v63 = vand.u32 4294901760, %v8559_v48 }
 0x2a8   : > { %4865 = vmatpush.msrb.mxu3 %v8493_v39  ;;  %4521 = vmatmul.f32.gmra.mxu1 %v9467_v16 }
 0x2a9   : > { %4705 = vmatpush.msrb.mxu0 %v8573_v18  ;;  %4747 = vmatpush.msrb.mxu1 %v8493_v39  ;;  %v9494_v39 = vld [vmem:[#allocation38_spill] sm:$0xff]  ;;  %v3614_v18 = vpop.f32.mrf.mxu2 }
 0x2aa   : > { %4810 = vmatpush.msrb.mxu2 %v9489_v12  ;;  %4867 = vmatpush.msrb.mxu3 %v8511_v15 }
 0x2ab   : > { %4708 = vmatpush.msrb.mxu0 %v8586_v19  ;;  %4749 = vmatpush.msrb.mxu1 %v8511_v15  ;;  %v9496_v15 = vld [vmem:[#allocation41_spill] sm:$0xff] }
 0x2ac   : > { %4814 = vmatpush.msrb.mxu2 %v9490_v63  ;;  %4869 = vmatpush.msrb.mxu3 %v8521_v44  ;;  %v9501_v19 = vld [vmem:[#allocation49_spill] sm:$0xff] }
 0x2ad   : > { %4711 = vmatpush.msrb.mxu0 %v8599_v60  ;;  %4751 = vmatpush.msrb.mxu1 %v8521_v44  ;;  %v9497_v44 = vld [vmem:[#allocation43_spill] sm:$0xff] }
 0x2ae   : > { %4818 = vmatpush.msrb.mxu2 %v9491_v6  ;;  %4871 = vmatpush.msrb.mxu3 %v8535_v58 }
 0x2af   : > { %4714 = vmatpush.msrb.mxu0 %v8612_v56  ;;  %4753 = vmatpush.msrb.mxu1 %v8535_v58  ;;  %v427_v58 = vperm.slane %v5250_v30, 0 }
 0x2b0   : > { %4822 = vmatpush.msrb.mxu2 %v9492_v55  ;;  %4873 = vmatpush.msrb.mxu3 %v8550_v62  ;;  %v9516_v55 = vld [vmem:[#allocation64_spill] sm:$0xff] }
 0x2b1   : > { %4717 = vmatpush.msrb.mxu0 %v8624_v21  ;;  %4755 = vmatpush.msrb.mxu1 %v8550_v62  ;;  %v9499_v62 = vld [vmem:[#allocation48_spill] sm:$0xff]  ;;  %v9503_v21 = vld [vmem:[#allocation50_spill] sm:$0xff] }
 0x2b2   : > { %4826 = vmatpush.msrb.mxu2 %v9493_v45  ;;  %4875 = vmatpush.msrb.mxu3 %v8561_v54  ;;  %v480_v48 = vadd.f32 %v9499_v62, %v427_v58 }
 0x2b3   : > { %4720 = vmatpush.msrb.mxu0 %v8640_v9  ;;  %4757 = vmatpush.msrb.mxu1 %v8561_v54  ;;  %v3556_v54 = vpop.f32.mrf.mxu1 }
 0x2b4   : > { %4830 = vmatpush.msrb.mxu2 %v4642_v61  ;;  %4877 = vmatpush.msrb.mxu3 %v8575_v36  ;;  %v585_v60 = vadd.f32 %v9501_v19, %v480_v48  ;;  %v3658_v61 = vpop.f32.mrf.mxu3  ;;  %v9520_v19 = vld [vmem:[#allocation68_spill] sm:$0xff] }
 0x2b5   : > { %4723 = vmatpush.msrb.mxu0 %v8653_v25  ;;  %4759 = vmatpush.msrb.mxu1 %v8575_v36  ;;  %v9495_v36 = vld [vmem:[#allocation39_spill] sm:$0xff] }
 0x2b6   : > { %4834 = vmatpush.msrb.mxu2 %v4648_v57  ;;  %4879 = vmatpush.msrb.mxu3 %v8588_v47  ;;  %v644_v9 = vadd.f32 %v9503_v21, %v585_v60  ;;  %v9505_v25 = vld [vmem:[#allocation51_spill] sm:$0xff] }
 0x2b7   : > { %4726 = vmatpush.msrb.mxu0 %v8664_v42  ;;  %4761 = vmatpush.msrb.mxu1 %v8588_v47 }
 0x2b8   : > { %4838 = vmatpush.msrb.mxu2 %v4654_v23  ;;  %4881 = vmatpush.msrb.mxu3 %v8601_v7  ;;  %v689_v26 = vadd.f32 %v9505_v25, %v644_v9  ;;  %v3619_v23 = vpop.f32.mrf.mxu2 }
 0x2b9   : > { %4729 = vmatmul.f32.vlgmr.msrb.gmra.mxu0 %v9494_v39  ;;  %4763 = vmatpush.msrb.mxu1 %v8601_v7  ;;  %v3447_v7 = vpop.f32.mrf.mxu0  ;;  %v9517_v39 = vld [vmem:[#allocation62_spill] sm:$0xff] }
 0x2ba   : > { %4842 = vmatpush.msrb.mxu2 %v4660_v43  ;;  %4883 = vmatpush.msrb.mxu3 %v8616_v10  ;;  %v762_v1 = vadd.f32 %v9507_v35, %v689_v26  ;;  %v9508_v43 = vld [vmem:[#allocation53_spill] sm:$0xff]  ;;  %v3448_v31 = vadd.f32 %v3447_v7, %v429_v46  ;;  %v9524_v26 = vld [vmem:[#allocation70_spill] sm:$0xff] }
 0x2bb   : > { %4765 = vmatpush.msrb.mxu1 %v8616_v10  ;;  %v9502_v10 = vld [vmem:[#allocation46_spill] sm:$0xff]  ;;  %v3560_v41 = vpop.f32.mrf.mxu1  ;;  %v9518_v7 = vld [vmem:[#allocation65_spill] sm:$0xff] }
 0x2bc   : > { %4846 = vmatpush.msrb.mxu2 %v4666_v28  ;;  %4885 = vmatpush.msrb.mxu3 %v8629_v20  ;;  %v3664_v4 = vpop.f32.mrf.mxu3  ;;  %v803_v59 = vadd.f32 %v9509_v24, %v762_v1  ;;  %v3557_v12 = vadd.f32 %v3556_v54, %v3448_v31  ;;  %v9521_v54 = vld [vmem:[#allocation66_spill] sm:$0xff]  ;;  %v9526_v1 = vld [vmem:[#allocation73_spill] sm:$0xff]  ;;  %v9527_v24 = vld [vmem:[#allocation71_spill] sm:$0xff] }
 0x2bd   : > { %4848 = vmatmul.f32.vlgmr.msrb.gmra.mxu2 %v9481_v11  ;;  %4767 = vmatpush.msrb.mxu1 %v8629_v20  ;;  %v9498_v20 = vld [vmem:[#allocation33_spill] sm:$0xff] }
 0x2be   : > { %4887 = vmatpush.msrb.mxu3 %v8642_v49  ;;  %v472_v38 = vadd.f32 %v9498_v20, %v427_v58  ;;  %v852_v17 = vadd.f32 %v9511_v13, %v803_v59 }
 0x2bf   : > { %4889 = vmatmul.f32.vlgmr.msrb.gmra.mxu3 %v9481_v11  ;;  %4769 = vmatpush.msrb.mxu1 %v8642_v49  ;;  %v9504_v49 = vld [vmem:[#allocation47_spill] sm:$0xff] }
 0x2c0   : > { %4773 = vmatmul.f32.vlgmr.msrb.gmra.mxu1 %v9495_v36  ;;  %v581_v47 = vadd.f32 %v9500_v53, %v472_v38  ;;  %v3819_v32 = vpop.f32.mrf.mxu2  ;;  %v957_v37 = vadd.f32 %v9514_v0, %v852_v17  ;;  %v9519_v38 = vld [vmem:[#allocation63_spill] sm:$0xff]  ;;  %v9529_v17 = vld [vmem:[#allocation74_spill] sm:$0xff] }
 0x2c1   : > { %4734 = vmatmul.f32.gmra.mxu0 %v9496_v15  ;;  %v3455_v56 = vpop.f32.mrf.mxu0  ;;  %v3615_v15 = vadd.f32 %v3614_v18, %v3557_v12  ;;  %v9531_v0 = vld [vmem:[#allocation75_spill] sm:$0xff] }
 0x2c2   : > { %v639_v16 = vadd.f32 %v9502_v10, %v581_v47  ;;  %v3456_v63 = vadd.f32 %v3455_v56, %v429_v46  ;;  %v1016_v45 = vadd.f32 %v9516_v55, %v957_v37  ;;  %v9522_v10 = vld [vmem:[#allocation69_spill] sm:$0xff] }
 0x2c3   : > { %v3774_v28 = vpop.f32.mrf.mxu1  ;;  %v3659_v48 = vadd.f32 %v3658_v61, %v3615_v15  ;;  %v9525_v61 = vld [vmem:[#allocation72_spill] sm:$0xff] }
 0x2c4   : > { %v683_v57 = vadd.f32 %v9504_v49, %v639_v16  ;;  %v3928_v11 = vpop.f32.mrf.mxu3  ;;  %v1061_v20 = vadd.f32 %v9518_v7, %v1016_v45 }
 0x2c5   : > { %4852 = vmatmul.f32.gmra.mxu2 %v9487_v5 }
 0x2c6   : > { %v758_v27 = vadd.f32 %v9506_v22, %v683_v57  ;;  %v1134_v56 = vadd.f32 %v9521_v54, %v1061_v20 }
 0x2c7   : > { %4893 = vmatmul.f32.gmra.mxu3 %v9487_v5  ;;  %v9515_v5 = vld [vmem:[#allocation61_spill] sm:$0xff] }
 0x2c8   : > { %4779 = vmatmul.f32.gmra.mxu1 %v9497_v44  ;;  %v799_v29 = vadd.f32 %v9508_v43, %v758_v27  ;;  %v3561_v44 = vadd.f32 %v3560_v41, %v3456_v63  ;;  %v9523_v41 = vld [vmem:[#allocation67_spill] sm:$0xff] }
 0x2c9   : > { %v3733_v42 = vpop.f32.mrf.mxu0  ;;  %v1175_v25 = vadd.f32 %v9523_v41, %v1134_v56  ;;  %v9539_v56 = vld [vmem:[#allocation83_spill] sm:$0xff] }
 0x2ca   : > { %v844_v51 = vadd.f32 %v9510_v3, %v799_v29  ;;  %v3827_v6 = vpop.f32.mrf.mxu2  ;;  %v3620_v53 = vadd.f32 %v3619_v23, %v3561_v44  ;;  %v3734_v9 = vadd.f32 %v3733_v42, %v3659_v48  ;;  %v9528_v42 = vld [vmem:[#allocation76_spill] sm:$0xff]  ;;  %v9535_v44 = vld [vmem:[#allocation79_spill] sm:$0xff] }
 0x2cb   : > { %v3778_v8 = vpop.f32.mrf.mxu1  ;;  %v1224_v23 = vadd.f32 %v9525_v61, %v1175_v25  ;;  %v9543_v61 = vld [vmem:[#allocation87_spill] sm:$0xff] }
 0x2cc   : > { %v953_v2 = vadd.f32 %v9512_v14, %v844_v51  ;;  %v3665_v21 = vadd.f32 %v3664_v4, %v3620_v53  ;;  %v3775_v27 = vadd.f32 %v3774_v28, %v3734_v9  ;;  %v9538_v53 = vld [vmem:[#allocation85_spill] sm:$0xff] }
 0x2cd   : > { %v3932_v30 = vpop.f32.mrf.mxu3  ;;  %v1329_v43 = vadd.f32 %v9526_v1, %v1224_v23 }
 0x2ce   : > { %v1011_v52 = vadd.f32 %v9513_v34, %v953_v2  ;;  %v3820_v3 = vadd.f32 %v3819_v32, %v3775_v27  ;;  %v9530_v2 = vld [vmem:[#allocation77_spill] sm:$0xff] }
 0x2cf   : > { %v1388_v14 = vadd.f32 %v9529_v17, %v1329_v43  ;;  %v9542_v27 = vld [vmem:[#allocation89_spill] sm:$0xff] }
 0x2d0   : > { %v1055_v33 = vadd.f32 %v9515_v5, %v1011_v52  ;;  %v3929_v34 = vadd.f32 %v3928_v11, %v3820_v3 }
 0x2d1   : > { %v3737_v40 = vpop.f32.mrf.mxu0  ;;  %v1433_v37 = vadd.f32 %v9531_v0, %v1388_v14 }
 0x2d2   : > { %v1130_v36 = vadd.f32 %v9517_v39, %v1055_v33  ;;  %v3738_v35 = vadd.f32 %v3737_v40, %v3665_v21  ;;  %v9532_v33 = vld [vmem:[#allocation78_spill] sm:$0xff]  ;;  %v9534_v39 = vld [vmem:[#allocation81_spill] sm:$0xff] }
 0x2d3   : > { %v9540_v21 = vld [vmem:[#allocation86_spill] sm:$0xff] }
 0x2d4   : > { %v1171_v62 = vadd.f32 %v9519_v38, %v1130_v36  ;;  %v4030_v47 = vpop.f32.mrf.mxu1  ;;  %v4105_v49 = vpop.f32.mrf.mxu2  ;;  %v3779_v51 = vadd.f32 %v3778_v8, %v3738_v35  ;;  %v9533_v8 = vld [vmem:[#allocation80_spill] sm:$0xff] }
 0x2d5   : > { %v1506_v55 = vadd.f32 %v9533_v8, %v1433_v37  ;;  %v9536_v38 = vld [vmem:[#allocation84_spill] sm:$0xff] }
 0x2d6   : > { %v1216_v60 = vadd.f32 %v9520_v19, %v1171_v62  ;;  %v3828_v28 = vadd.f32 %v3827_v6, %v3779_v51  ;;  %v9537_v62 = vld [vmem:[#allocation82_spill] sm:$0xff] }
 0x2d7   : > { %v4146_v57 = vpop.f32.mrf.mxu3  ;;  %v1547_v36 = vadd.f32 %v9534_v39, %v1506_v55 }
 0x2d8   : > { %v1325_v16 = vadd.f32 %v9522_v10, %v1216_v60  ;;  %v3933_v63 = vadd.f32 %v3932_v30, %v3828_v28 }
 0x2d9   : > { %v3986_v58 = vpop.f32.mrf.mxu0  ;;  %v1596_v48 = vadd.f32 %v9537_v62, %v1547_v36 }
 0x2da   : > { %v1383_v22 = vadd.f32 %v9524_v26, %v1325_v16  ;;  %v3987_v52 = vadd.f32 %v3986_v58, %v3929_v34 }
 0x2db   : > { %v1701_v10 = vadd.f32 %v9539_v56, %v1596_v48 }
 0x2dc   : > { %v1427_v59 = vadd.f32 %v9527_v24, %v1383_v22  ;;  %v4031_v32 = vadd.f32 %v4030_v47, %v3987_v52  ;;  %v9544_v24 = vld [vmem:[#allocation90_spill] sm:$0xff] }
 0x2dd   : > { %v4036_v29 = vpop.f32.mrf.mxu1 }
 0x2de   : > { %v1502_v46 = vadd.f32 %v9528_v42, %v1427_v59  ;;  %v4109_v13 = vpop.f32.mrf.mxu2  ;;  %v4106_v20 = vadd.f32 %v4105_v49, %v4031_v32 }
 0x2e0   : > { %v1543_v31 = vadd.f32 %v9530_v2, %v1502_v46  ;;  %v4147_v60 = vadd.f32 %v4146_v57, %v4106_v20  ;;  %v5140_v46 = vmul.f32 -1.442695, %v8481_v50  ;;  %v9545_v2 = vld [vmem:[#allocation91_spill] sm:$0xff] }
 0x2e1   : > { %v3991_v18 = vpop.f32.mrf.mxu0  ;;  %v4150_v40 = vpop.f32.mrf.mxu3 }
 0x2e2   : > { %v1588_v12 = vadd.f32 %v9532_v33, %v1543_v31  ;;  %v3992_v11 = vadd.f32 %v3991_v18, %v3933_v63  ;;  %v9541_v18 = vld [vmem:[#allocation88_spill] sm:$0xff] }
 0x2e3   : > { %v1760_v26 = vadd.f32 %v9541_v18, %v1701_v10 }
 0x2e4   : > { %v1697_v7 = vadd.f32 %v9535_v44, %v1588_v12  ;;  %v4037_v30 = vadd.f32 %v4036_v29, %v3992_v11 }
 0x2e5   : > { %v1805_v35 = vadd.f32 %v9542_v27, %v1760_v26 }
 0x2e6   : > { %v1755_v58 = vadd.f32 %v9536_v38, %v1697_v7  ;;  %v4110_v41 = vadd.f32 %v4109_v13, %v4037_v30 }
 0x2e7   : > { %v1878_v59 = vadd.f32 %v9544_v24, %v1805_v35 }
 0x2e8   : > { %v1799_v19 = vadd.f32 %v9538_v53, %v1755_v58  ;;  %v4151_v1 = vadd.f32 %v4150_v40, %v4110_v41 }
 0x2e9   : > { %v1919_v31 = vadd.f32 %v9545_v2, %v1878_v59 }
 0x2ea   : > { %v1874_v9 = vadd.f32 %v9540_v21, %v1799_v19 }
 0x2eb   : > { %v5142_v40 = vmul.f32 -1.442695, %v1919_v31 }
 0x2ec   : > { %v1915_v23 = vadd.f32 %v9543_v61, %v1874_v9 }
 0x2ee   : > { %v4191_v4 = vpop.f32.mrf.mxu0  ;;  %v5139_v3 = vmul.f32 -1.442695, %v1915_v23 }
 0x2ef   : > { %v4192_v54 = vadd.f32 %v4191_v4, %v4147_v60 }
 0x2f0   : > { %5226 = vpow2.f32 %v5139_v3 }
 0x2f1   : > { %5228 = vpow2.f32 %v5140_v46 }
 0x2f2   : > { %5230 = vpow2.f32 %v5142_v40 }
 0x2f6   : > { %v5227_v63 = vpop.eup %5226 }
 0x2f7   : > { %v4199_v15 = vpop.f32.mrf.mxu0  ;;  %v5229_v50 = vpop.eup %5228  ;;  %v8849_v36 = vadd.f32 1.0, %v5227_v63 }
 0x2f8   : > { %v4300_v5 = vpop.f32.mrf.mxu1  ;;  %v4358_v45 = vpop.f32.mrf.mxu2  ;;  %v4200_v29 = vadd.f32 %v4199_v15, %v4151_v1  ;;  %v8851_v15 = vadd.f32 1.0, %v5229_v50 }
 0x2f9   : > { %v4301_v25 = vadd.f32 %v4300_v5, %v4192_v54  ;;  %v9546_v5 = vld [vmem:[#allocation14_spill] sm:$0xff]  ;;  %vm4926_vm0 = vweird.f32 %v8849_v36  ;;  %v4932_v2 = vand.u32 2147483648, %v8849_v36 }
 0x2fa   : > { %v5143_v33 = vmul.f32 -1.442695, %v9546_v5  ;;  %v4947_v31 = vand.u32 2147483648, %v8851_v15  ;;  %vm4941_vm4 = vweird.f32 %v8851_v15  ;;  %v4945_v40 = vand.u32 2147483647, %v8851_v15 }
 0x2fb   : > { %v4402_v6 = vpop.f32.mrf.mxu3  ;;  %v4359_v57 = vadd.f32 %v4358_v45, %v4301_v25 }
 0x2fc   : > { %5232 = vpow2.f32 %v5143_v33  ;;  %vm4946_vm7 = vcmp.eq.f32.partialorder %v4945_v40, 8.507059e+37 }
 0x2fd   : > { %v4403_v51 = vadd.f32 %v4402_v6, %v4359_v57  ;;  %v5231_v6 = vpop.eup %5230  ;;  %5234 = vrcp.f32 %v8849_v36 }
 0x2fe   : > { %5236 = vrcp.f32 %v8851_v15  ;;  %v8855_v53 = vadd.f32 1.0, %v5231_v6 }
 0x300   : > { %5238 = vrcp.f32 %v8855_v53  ;;  %vm4971_vm15 = vweird.f32 %v8855_v53 }
 0x301   : > { %v4304_v47 = vpop.f32.mrf.mxu1 }
 0x302   : > { %v4363_v49 = vpop.f32.mrf.mxu2  ;;  %v4305_v4 = vadd.f32 %v4304_v47, %v4200_v29  ;;  %v5233_v58 = vpop.eup %5232 }
 0x303   : > { %v8857_v47 = vadd.f32 1.0, %v5233_v58  ;;  %v5235_v56 = vpop.eup %5234 }
 0x304   : > { %v4364_v34 = vadd.f32 %v4363_v49, %v4305_v4  ;;  %v5237_v21 = vpop.eup %5236  ;;  %v4922_v25 = vmul.f32 %v5235_v56, %v8849_v36  ;;  %vm4927_vm1 = vweird.f32 %v5235_v56 }
 0x305   : > { %v4408_v22 = vpop.f32.mrf.mxu3  ;;  %v4937_v49 = vmul.f32 %v5237_v21, %v8851_v15  ;;  %vm4942_vm2 = vweird.f32 %v5237_v21  ;;  %vm8877_vm3 = vmor %vm4926_vm0, %vm4927_vm1  ;;  %vm4986_vm12 = vweird.f32 %v8857_v47  ;;  %v4992_v6 = vand.u32 2147483648, %v8857_v47 }
 0x306   : > { %v4409_v0 = vadd.f32 %v4408_v22, %v4364_v34  ;;  %v8863_v27 = vpop.eup %5238  ;;  %v4923_v61 = vsub.f32 1.0, %v4922_v25  ;;  %vm8884_vm5 = vmor %vm4941_vm4, %vm4942_vm2 }
 0x307   : > { %v4938_v23 = vsub.f32 1.0, %v4937_v49  ;;  %v4967_v29 = vmul.f32 %v8863_v27, %v8855_v53  ;;  %vm4972_vm9 = vweird.f32 %v8863_v27 }
 0x308   : > { %v4924_v24 = vmul.f32 %v5235_v56, %v4923_v61  ;;  %vm8915_vm1 = vmor %vm4971_vm15, %vm4972_vm9 }
 0x309   : > { %v4939_v59 = vmul.f32 %v5237_v21, %v4938_v23 }
 0x30b   : > { %v4940_v46 = vadd.f32 %v5237_v21, %v4939_v59 }
 0x30d   : > { %v4944_v33 = vsel %vm8884_vm5, %v5237_v21, %v4940_v46 }
 0x312   : > { %v4477_v16 = vpop.f32.mrf.mxu0 }
 0x313   : > { %v4478_v17 = vadd.f32 %v4477_v16, %v4403_v51  ;;  %v4968_v51 = vsub.f32 1.0, %v4967_v29 }
 0x31b   : > { %v4481_v13 = vpop.f32.mrf.mxu0 }
 0x31c   : > { %v4518_v43 = vpop.f32.mrf.mxu1  ;;  %v4563_v42 = vpop.f32.mrf.mxu2  ;;  %v4482_v32 = vadd.f32 %v4481_v13, %v4409_v0  ;;  %v4969_v0 = vmul.f32 %v8863_v27, %v4968_v51 }
 0x31d   : > { %v4519_v28 = vadd.f32 %v4518_v43, %v4478_v17 }
 0x31f   : > { %v4672_v14 = vpop.f32.mrf.mxu3  ;;  %v4564_v37 = vadd.f32 %v4563_v42, %v4519_v28  ;;  %v4925_v42 = vadd.f32 %v5235_v56, %v4924_v24 }
 0x321   : > { %v4673_v55 = vadd.f32 %v4672_v14, %v4564_v37  ;;  %v4930_v14 = vand.u32 2147483647, %v8849_v36  ;;  %v4929_v5 = vsel %vm8877_vm3, %v5235_v56, %v4925_v42  ;;  %v4970_v36 = vadd.f32 %v8863_v27, %v4969_v0 }
 0x323   : > { %vm4931_vm6 = vcmp.eq.f32.partialorder %v4930_v14, 8.507059e+37  ;;  %v4974_v21 = vsel %vm8915_vm1, %v8863_v27, %v4970_v36 }
 0x325   : > { %v4522_v52 = vpop.f32.mrf.mxu1 }
 0x326   : > { %v4571_v8 = vpop.f32.mrf.mxu2  ;;  %v4523_v45 = vadd.f32 %v4522_v52, %v4482_v32  ;;  %v4933_v32 = vor.u32 1.1754944e-38, %v4932_v2 }
 0x328   : > { %v4572_v20 = vadd.f32 %v4571_v8, %v4523_v45  ;;  %v4948_v8 = vor.u32 1.1754944e-38, %v4947_v31 }
 0x329   : > { %v4676_v39 = vpop.f32.mrf.mxu3 }
 0x32a   : > { %v4677_v19 = vadd.f32 %v4676_v39, %v4572_v20  ;;  %v4934_v39 = vsel %vm4931_vm6, %v4933_v32, %v4929_v5  ;;  %v4949_v15 = vsel %vm4946_vm7, %v4948_v8, %v4944_v33 }
 0x32b   : > { %v5011_v58 = vmul.f32 %v4949_v15, %v4934_v39 }
 0x336   : > { %v4730_v12 = vpop.f32.mrf.mxu0 }
 0x337   : > { %v4731_v44 = vadd.f32 %v4730_v12, %v4673_v55 }
 0x33d   : > { %v4774_v7 = vpop.f32.mrf.mxu1 }
 0x33e   : > { %v4775_v11 = vadd.f32 %v4774_v7, %v4731_v44  ;;  %v4735_v62 = vpop.f32.mrf.mxu0 }
 0x33f   : > { %v4736_v54 = vadd.f32 %v4735_v62, %v4677_v19  ;;  %v4977_v19 = vand.u32 2147483648, %v8855_v53 }
 0x340   : > { %v4849_v38 = vpop.f32.mrf.mxu2 }
 0x341   : > { %v4850_v48 = vadd.f32 %v4849_v38, %v4775_v11  ;;  %v4990_v11 = vand.u32 2147483647, %v8857_v47  ;;  %v4978_v49 = vor.u32 1.1754944e-38, %v4977_v19 }
 0x342   : > { %v4890_v60 = vpop.f32.mrf.mxu3 }
 0x343   : > { %v4891_v30 = vadd.f32 %v4890_v60, %v4850_v48  ;;  %vm4991_vm2 = vcmp.eq.f32.partialorder %v4990_v11, 8.507059e+37 }
 0x345   : > { %v5141_v10 = vmul.f32 -1.442695, %v4891_v30  ;;  %v4780_v16 = vpop.f32.mrf.mxu1 }
 0x346   : > { %v4781_v9 = vadd.f32 %v4780_v16, %v4736_v54  ;;  %v4975_v54 = vand.u32 2147483647, %v8855_v53 }
 0x347   : > { %5240 = vpow2.f32 %v5141_v10 }
 0x348   : > { %5242 = vrcp.f32 %v8857_v47  ;;  %v4853_v41 = vpop.f32.mrf.mxu2  ;;  %vm4976_vm4 = vcmp.eq.f32.partialorder %v4975_v54, 8.507059e+37 }
 0x349   : > { %v4854_v18 = vadd.f32 %v4853_v41, %v4781_v9  ;;  %v4993_v9 = vor.u32 1.1754944e-38, %v4992_v6 }
 0x34a   : > { %v4894_v26 = vpop.f32.mrf.mxu3 }
 0x34b   : > { %v4895_v22 = vadd.f32 %v4894_v26, %v4854_v18 }
 0x34d   : > { %v5241_v35 = vpop.eup %5240  ;;  %v5144_v1 = vmul.f32 -1.442695, %v4895_v22  ;;  %v4979_v22 = vsel %vm4976_vm4, %v4978_v49, %v4974_v21 }
 0x34e   : > { %v8865_v57 = vpop.eup %5242  ;;  %v4917_v43 = vadd.f32 1.0, %v5241_v35 }
 0x34f   : > { %5244 = vpow2.f32 %v5144_v1  ;;  %v4982_v3 = vmul.f32 %v8865_v57, %v8857_v47  ;;  %vm4987_vm10 = vweird.f32 %v8865_v57 }
 0x350   : > { %5246 = vrcp.f32 %v4917_v43  ;;  %v4962_v50 = vand.u32 2147483648, %v4917_v43  ;;  %v4960_v45 = vand.u32 2147483647, %v4917_v43  ;;  %vm4956_vm11 = vweird.f32 %v4917_v43  ;;  %vm8909_vm0 = vmor %vm4986_vm12, %vm4987_vm10 }
 0x351   : > { %v4983_v13 = vsub.f32 1.0, %v4982_v3 }
 0x352   : > { %v4963_v38 = vor.u32 1.1754944e-38, %v4962_v50  ;;  %vm4961_vm14 = vcmp.eq.f32.partialorder %v4960_v45, 8.507059e+37 }
 0x353   : > { %v4984_v12 = vmul.f32 %v8865_v57, %v4983_v13 }
 0x355   : > { %v5245_v4 = vpop.eup %5244  ;;  %v4985_v44 = vadd.f32 %v8865_v57, %v4984_v12 }
 0x356   : > { %v5247_v17 = vpop.eup %5246  ;;  %v8875_v34 = vadd.f32 1.0, %v5245_v4 }
 0x357   : > { %v4952_v52 = vmul.f32 %v5247_v17, %v4917_v43  ;;  %vm4957_vm8 = vweird.f32 %v5247_v17  ;;  %v4989_v56 = vsel %vm8909_vm0, %v8865_v57, %v4985_v44 }
 0x358   : > { %5248 = vrcp.f32 %v8875_v34  ;;  %vm4958_vm13 = vmor %vm4956_vm11, %vm4957_vm8  ;;  %v5007_v41 = vand.u32 2147483648, %v8875_v34  ;;  %v5005_v53 = vand.u32 2147483647, %v8875_v34  ;;  %v4994_v18 = vsel %vm4991_vm2, %v4993_v9, %v4989_v56 }
 0x359   : > { %v4953_v63 = vsub.f32 1.0, %v4952_v52  ;;  %vm5001_vm5 = vweird.f32 %v8875_v34  ;;  %v5012_v35 = vmul.f32 %v4994_v18, %v4979_v22 }
 0x35a   : > { %v5008_v27 = vor.u32 1.1754944e-38, %v5007_v41  ;;  %vm5006_vm7 = vcmp.eq.f32.partialorder %v5005_v53, 8.507059e+37 }
 0x35b   : > { %v4954_v55 = vmul.f32 %v5247_v17, %v4953_v63 }
 0x35d   : > { %v4955_v7 = vadd.f32 %v5247_v17, %v4954_v55 }
 0x35e   : > { %v5249_v20 = vpop.eup %5248 }
 0x35f   : > { %v4959_v62 = vsel %vm4958_vm13, %v5247_v17, %v4955_v7  ;;  %v4997_v48 = vmul.f32 %v5249_v20, %v8875_v34  ;;  %vm5002_vm3 = vweird.f32 %v5249_v20 }
 0x360   : > { %v4964_v30 = vsel %vm4961_vm14, %v4963_v38, %v4959_v62  ;;  %vm5003_vm6 = vmor %vm5001_vm5, %vm5002_vm3 }
 0x361   : > { %v5013_v10 = vmul.f32 %v5011_v58, %v4964_v30  ;;  %v4998_v16 = vsub.f32 1.0, %v4997_v48 }
 0x363   : > { %v4999_v25 = vmul.f32 %v5249_v20, %v4998_v16  ;;  %5015 = vst [vmem:[%s222_s28] sm:$0xff] %v5013_v10 }
 0x365   : > { %v5000_v26 = vadd.f32 %v5249_v20, %v4999_v25 }
 0x367   : > { %v5004_v61 = vsel %vm5003_vm6, %v5249_v20, %v5000_v26 }
 0x368   : > { %v5009_v23 = vsel %vm5006_vm7, %v5008_v27, %v5004_v61 }
 0x369   : > { %v5014_v1 = vmul.f32 %v5012_v35, %v5009_v23 }
 0x36b   : > { %5016 = vst [vmem:[%s222_s28 + $0x8] sm:$0xff] %v5014_v1 }
 0x36c   : > { %5368 = shalt.err (!%p5365_p10)
}
 0x36d   : > { %s5419_s22 = smov 128   ;;  %s5420_s25 = smov 8  }
 0x36e   : > { %5163 = dma.vmem_to_hbm [thread:$0]  (%p5506_p0), %s5031_s29, 256, %s5033_s4, %s5018_s5, %s5419_s22, %s5419_s22, %s5420_s25  }
 0x36f PF: > { %p5185_p11 = scmp.ge.s32.totalorder %s5411_s15, 2  ;;  %s5047_s30 = sand.u32 1, %s5399_s12  }
 0x370   : > { %s5048_s18 = scalar_lea.sflag [#allocation4], %s5047_s30 }
 0x371   : > { %p5177_p12 = pnand %p5185_p11, %p5476_p6 }
 0x373   : > { %p5178_p13 = pneg %p5177_p12 }
 0x375   : > { %5394 = dma.done.wait (%p5178_p13), %s5048_s18, 256  }
 0x376   : > { %5396 = vsyncadd (%p5178_p13), %s5048_s18, 4294967040  ;;  %p17_p3 = scmp.ge.s32.totalorder %s5496_s6, 5   ;;  %s9555_s12 = smov %s5403_s13 }
 0x377   : > { %s9556_s13 = smov %s5407_s14  ;;  %s9557_s14 = smov %s5512_s10 }
 0x378   : > { %s9558_s15 = smov %s5496_s6  ;;  %19 = sbr.rel (!%p17_p3) target bundleno = 6 (0x6), region = 85 }
 0x37d   :  { %5054 = vsyncpa [#allocation3], 1 }
 0x37e   :  { %5056 = vsyncpa [#allocation3 + $0x1], 1 }
 0x37f   :  { %5057 = vsyncpa [#allocation6], 1 }
 0x380   :  { %5058 = vsyncpa [#allocation4], 1 }
 0x381   :  { %5060 = vsyncpa [#allocation4 + $0x1], 1 }

</bundles_post_ra>
